<compile_context>
chip_gen: v5e
topology: v5e:2x2
jax: 0.10.0
libtpu: 0.0.40
codegen_flags: <defaults>
</compile_context>

<pallas_src>
import math
import functools

import jax
import jax.numpy as jnp
from jax.experimental import pallas as pl
from jax.experimental.pallas import tpu as pltpu


# ----------------------------- in-kernel helpers -----------------------------

def _rms_norm(x, w, eps):
    """T5 RMSNorm: fp32 stats, no mean subtraction, no bias. x:(S,D) f32, w:(1,D) f32."""
    var = jnp.mean(x * x, axis=-1, keepdims=True)
    return x * jax.lax.rsqrt(var + eps) * w


def _attn_sublayer(x, ln_w, wqkv, wo, bias, *, n_heads, d_kv, eps):
    """T5 self-attention sublayer: x + O(softmax(Q K^T + bias) V).

    Q/K/V come from one fused lane-dense projection of RMSNorm(x).  No 1/sqrt(d_kv)
    scaling (T5 convention).  Everything stays in VMEM / vregs.

    x:(S,D) f32; ln_w:(1,D) f32; wqkv:(D,3*inner) bf16; wo:(inner,D) bf16;
    bias:(H,S,S) f32 or None (layers > 0: zero bias, skipped at trace time).
    """
    inner = n_heads * d_kv
    normed = _rms_norm(x, ln_w, eps).astype(jnp.bfloat16)
    # Single fused QKV matmul; downcast the result to bf16 exactly once.
    qkv = jnp.dot(normed, wqkv, preferred_element_type=jnp.float32).astype(jnp.bfloat16)

    def heads(base):
        return jnp.stack(
            [qkv[:, base + h * d_kv: base + (h + 1) * d_kv] for h in range(n_heads)],
            axis=0)                                              # (H, S, d_kv)

    q, k, v = heads(0), heads(inner), heads(2 * inner)

    # Head-batched scores on the MXU: (H,S,dk) x (H,S,dk) -> (H,S,S), fp32 accumulate.
    scores = jax.lax.dot_general(q, k, (((2,), (2,)), ((0,), (0,))),
                                 preferred_element_type=jnp.float32)
    if bias is not None:
        scores = scores + bias

    # Softmax in fp32 (exact divide, closest to the fp32 PyTorch reference).
    m = jnp.max(scores, axis=-1, keepdims=True)
    e = jnp.exp(scores - m)
    probs = e / jnp.sum(e, axis=-1, keepdims=True)

    # Head-batched PV: (H,S,S) x (H,S,dk) -> (H,S,dk).
    ctx = jax.lax.dot_general(probs.astype(jnp.bfloat16), v,
                              (((2,), (1,)), ((0,), (0,))),
                              preferred_element_type=jnp.float32)

    # Concatenate heads -> single (S,inner) @ (inner,D) output projection.
    ctx_flat = jnp.concatenate([ctx[h] for h in range(n_heads)],
                               axis=-1).astype(jnp.bfloat16)
    return x + jnp.dot(ctx_flat, wo, preferred_element_type=jnp.float32)


def _ffn_sublayer(x, ln_w, wi, wo, *, eps):
    """T5LayerFF: x + wo(relu(wi(RMSNorm(x)))).  Dropouts are identity (eval forward)."""
    h = jnp.dot(_rms_norm(x, ln_w, eps).astype(jnp.bfloat16), wi,
                preferred_element_type=jnp.float32)
    h = jnp.maximum(h, 0.0).astype(jnp.bfloat16)
    return x + jnp.dot(h, wo, preferred_element_type=jnp.float32)


# ----------------------------- fused stage kernel -----------------------------

def _stage_kernel(embeds_ref, bias_m_ref, bias_s_ref,
                  first_down_ref, downs_ref,
                  m_sa_ln_ref, m_wqkv_ref, m_wo_ref, m_ff_ln_ref, m_wi_ref, m_wo_ff_ref,
                  s_sa_ln_ref, s_wqkv_ref, s_wo_ref, s_ff_ln_ref, s_wi_ref, s_wo_ff_ref,
                  final_ln_ref, final_side_ln_ref,
                  hid_out_ref, side_out_ref,
                  *, n_layers, n_heads, d_kv, side_d_kv, eps):
    """Whole SideStage forward for one batch element; hidden/side never leave VMEM."""
    hidden = embeds_ref[0]                                          # (S, D) f32; dropout=id

    # Fused side_first_downsample (no separate pallas_call / HBM round-trip).
    side = jnp.dot(hidden.astype(jnp.bfloat16), first_down_ref[...],
                   preferred_element_type=jnp.float32)              # (S, Ds)

    for l in range(n_layers):                                       # static unroll (L small)
        # --- main T5 block ----------------------------------------------------
        hidden = _attn_sublayer(hidden, m_sa_ln_ref[l], m_wqkv_ref[l], m_wo_ref[l],
                                bias_m_ref[...] if l == 0 else None,
                                n_heads=n_heads, d_kv=d_kv, eps=eps)
        hidden = _ffn_sublayer(hidden, m_ff_ln_ref[l], m_wi_ref[l], m_wo_ff_ref[l],
                               eps=eps)

        # --- side stream: residual downsample of the updated main hidden -------
        side = side + jnp.dot(hidden.astype(jnp.bfloat16), downs_ref[l],
                              preferred_element_type=jnp.float32)

        # --- side T5 block ------------------------------------------------------
        side = _attn_sublayer(side, s_sa_ln_ref[l], s_wqkv_ref[l], s_wo_ref[l],
                              bias_s_ref[...] if l == 0 else None,
                              n_heads=n_heads, d_kv=side_d_kv, eps=eps)
        side = _ffn_sublayer(side, s_ff_ln_ref[l], s_wi_ref[l], s_wo_ff_ref[l], eps=eps)

    # is_encoder_last: final RMSNorms fused into the same kernel (dropout = identity).
    hid_out_ref[0] = _rms_norm(hidden, final_ln_ref[...], eps)
    side_out_ref[0] = _rms_norm(side, final_side_ln_ref[...], eps)


def _full_spec(arr):
    """Whole-array BlockSpec shared across the batch grid (weights / bias)."""
    zeros = (0,) * arr.ndim
    return pl.BlockSpec(arr.shape, lambda i, _z=zeros: _z)


# ------------------------- position-bias glue (plain JAX) -------------------------

def relative_position_bucket(relative_position, num_buckets, max_distance):
    # bidirectional (encoder) variant; matches HF T5Attention._relative_position_bucket
    num_buckets = num_buckets // 2
    relative_buckets = (relative_position > 0).astype(jnp.int32) * num_buckets
    relative_position = jnp.abs(relative_position)
    max_exact = num_buckets // 2
    is_small = relative_position < max_exact
    rel_f = jnp.maximum(relative_position, 1).astype(jnp.float32)
    rel_if_large = max_exact + (
        jnp.log(rel_f / max_exact) / math.log(max_distance / max_exact)
        * (num_buckets - max_exact)
    ).astype(jnp.int32)
    rel_if_large = jnp.minimum(rel_if_large, num_buckets - 1)
    relative_buckets = relative_buckets + jnp.where(is_small, relative_position, rel_if_large)
    return relative_buckets


def compute_bias(rel_emb, qlen, klen, num_buckets, max_distance):
    ctx = jnp.arange(qlen, dtype=jnp.int32)[:, None]
    mem = jnp.arange(klen, dtype=jnp.int32)[None, :]
    buckets = relative_position_bucket(mem - ctx, num_buckets, max_distance)
    values = rel_emb[buckets]                       # (q, k, H) gather in plain JAX
    return jnp.transpose(values, (2, 0, 1))         # (H, q, k) shared across batch


# ----------------------------- config & params -----------------------------

class Config:
    vocab_size = 64
    d_model = 32
    d_kv = 8
    d_ff = 64
    num_heads = 4
    num_layers = 2                      # num_pp_encoder_layers for this stage
    relative_attention_num_buckets = 32
    relative_attention_max_distance = 128
    layer_norm_epsilon = 1e-6
    dropout_rate = 0.1                  # identity in eval-mode forward
    side_reduction_factor = 2
    add_bias_sampling = False
    is_encoder = True
    is_encoder_first = True
    is_encoder_last = True
    is_decoder = False
    is_last_stage = False

    @property
    def side_d_model(self):
        return self.d_model // self.side_reduction_factor

    @property
    def side_d_kv(self):
        return self.d_kv // self.side_reduction_factor

    @property
    def side_d_ff(self):
        return self.d_ff // self.side_reduction_factor


class KeyGen:
    def __init__(self, key):
        self.key = key

    def __call__(self):
        self.key, sub = jax.random.split(self.key)
        return sub


def _normal(kg, shape, scale=0.05):
    return jax.random.normal(kg(), shape, dtype=jnp.float32) * scale


def init_params(cfg, seed=0):
    kg = KeyGen(jax.random.PRNGKey(seed))
    L, D, Ds, H = cfg.num_layers, cfg.d_model, cfg.side_d_model, cfg.num_heads
    inner, s_inner = H * cfg.d_kv, H * cfg.side_d_kv

    def stacked_blocks(d_model, inner_dim, d_ff):
        # Per-layer weights stacked along a leading layer axis (single operand set).
        return {
            'sa_ln':  jnp.ones((L, 1, d_model), jnp.float32),
            'wqkv':   _normal(kg, (L, d_model, 3 * inner_dim)).astype(jnp.bfloat16),
            'wo':     _normal(kg, (L, inner_dim, d_model)).astype(jnp.bfloat16),
            'ff_ln':  jnp.ones((L, 1, d_model), jnp.float32),
            'wi':     _normal(kg, (L, d_model, d_ff)).astype(jnp.bfloat16),
            'wo_ff':  _normal(kg, (L, d_ff, d_model)).astype(jnp.bfloat16),
        }

    return {
        'shared': _normal(kg, (cfg.vocab_size, D), scale=1.0),
        'rel_emb_main': _normal(kg, (cfg.relative_attention_num_buckets, H)),
        'rel_emb_side': _normal(kg, (cfg.relative_attention_num_buckets, H)),
        'main': stacked_blocks(D, inner, cfg.d_ff),
        'side': stacked_blocks(Ds, s_inner, cfg.side_d_ff),
        'side_first_downsample': _normal(kg, (D, Ds)).astype(jnp.bfloat16),
        'side_downsamples': _normal(kg, (L, D, Ds)).astype(jnp.bfloat16),
        'final_ln': jnp.ones((1, D), jnp.float32),
        'final_side_ln': jnp.ones((1, Ds), jnp.float32),
    }


# ----------------------------- stage forward -----------------------------

def side_stage_forward(params, input_ids, *, cfg):
    """SideStageModel.forward for the encoder-first / encoder-last stage.
    x[0] = input_ids -> returns (encoder_outputs, side_encoder_outputs)."""
    eps = cfg.layer_norm_epsilon
    b, s = input_ids.shape
    d, ds = cfg.d_model, cfg.side_d_model

    # Embedding lookup + relative-position bias: plain JAX gathers feeding the kernel.
    embeds = params['shared'][input_ids]                    # (B, S, D); dropout = identity
    bias_main = compute_bias(params['rel_emb_main'], s, s,
                             cfg.relative_attention_num_buckets,
                             cfg.relative_attention_max_distance)   # (H, S, S)
    bias_side = compute_bias(params['rel_emb_side'], s, s,
                             cfg.relative_attention_num_buckets,
                             cfg.relative_attention_max_distance)   # (H, S, S)
    # All-ones attention mask -> extended mask contributes 0; omitted.

    m, sd = params['main'], params['side']
    inputs = [embeds, bias_main, bias_side,
              params['side_first_downsample'], params['side_downsamples'],
              m['sa_ln'], m['wqkv'], m['wo'], m['ff_ln'], m['wi'], m['wo_ff'],
              sd['sa_ln'], sd['wqkv'], sd['wo'], sd['ff_ln'], sd['wi'], sd['wo_ff'],
              params['final_ln'], params['final_side_ln']]

    in_specs = ([pl.BlockSpec((1, s, d), lambda i: (i, 0, 0))]
                + [_full_spec(a) for a in inputs[1:]])

    kernel = functools.partial(_stage_kernel,
                               n_layers=cfg.num_layers, n_heads=cfg.num_heads,
                               d_kv=cfg.d_kv, side_d_kv=cfg.side_d_kv, eps=eps)

    hidden, side = pl.pallas_call(
        kernel,
        out_shape=(jax.ShapeDtypeStruct((b, s, d), jnp.float32),
                   jax.ShapeDtypeStruct((b, s, ds), jnp.float32)),
        grid=(b,),
        in_specs=in_specs,
        out_specs=(pl.BlockSpec((1, s, d), lambda i: (i, 0, 0)),
                   pl.BlockSpec((1, s, ds), lambda i: (i, 0, 0))),
        compiler_params=pltpu.CompilerParams(dimension_semantics=("parallel",)),
    )(*inputs)
    return hidden, side


# --------------------------------- main ---------------------------------

if __name__ == "__main__":
    cfg = Config()
    params = init_params(cfg, seed=0)

    batch, seq = 2, 8
    input_ids = jax.random.randint(jax.random.PRNGKey(0), (batch, seq), 0,
                                   cfg.vocab_size, dtype=jnp.int32)

    fwd = jax.jit(functools.partial(side_stage_forward, cfg=cfg))
    hidden_out, side_out = fwd(params, input_ids)
    hidden_out = jax.block_until_ready(hidden_out)
    side_out = jax.block_until_ready(side_out)

    assert hidden_out.shape == (batch, seq, cfg.d_model)
    assert side_out.shape == (batch, seq, cfg.side_d_model)
    assert bool(jnp.all(jnp.isfinite(hidden_out))) and bool(jnp.all(jnp.isfinite(side_out)))
    print("KERNEL_OK")
</pallas_src>

<mosaic_0001>
module attributes {stable_mosaic.version = 11 : i64} {
  func.func @_stage_kernel(%arg0: i32, %arg1: memref<1x8x32xf32, #tpu.memory_space<vmem>>, %arg2: memref<4x8x8xf32, #tpu.memory_space<vmem>>, %arg3: memref<4x8x8xf32, #tpu.memory_space<vmem>>, %arg4: memref<32x16xbf16, #tpu.memory_space<vmem>>, %arg5: memref<2x32x16xbf16, #tpu.memory_space<vmem>>, %arg6: memref<2x1x32xf32, #tpu.memory_space<vmem>>, %arg7: memref<2x32x96xbf16, #tpu.memory_space<vmem>>, %arg8: memref<2x32x32xbf16, #tpu.memory_space<vmem>>, %arg9: memref<2x1x32xf32, #tpu.memory_space<vmem>>, %arg10: memref<2x32x64xbf16, #tpu.memory_space<vmem>>, %arg11: memref<2x64x32xbf16, #tpu.memory_space<vmem>>, %arg12: memref<2x1x16xf32, #tpu.memory_space<vmem>>, %arg13: memref<2x16x48xbf16, #tpu.memory_space<vmem>>, %arg14: memref<2x16x16xbf16, #tpu.memory_space<vmem>>, %arg15: memref<2x1x16xf32, #tpu.memory_space<vmem>>, %arg16: memref<2x16x32xbf16, #tpu.memory_space<vmem>>, %arg17: memref<2x32x16xbf16, #tpu.memory_space<vmem>>, %arg18: memref<1x32xf32, #tpu.memory_space<vmem>>, %arg19: memref<1x16xf32, #tpu.memory_space<vmem>>, %arg20: memref<1x8x32xf32, #tpu.memory_space<vmem>>, %arg21: memref<1x8x16xf32, #tpu.memory_space<vmem>>) attributes {dimension_semantics = [#tpu.dimension_semantics<parallel>], iteration_bounds = array<i64: 2>, scalar_prefetch = 0 : i64, scratch_operands = 0 : i64, tpu.core_type = #tpu.core_type<tc>, window_params = [{transform_indices = @transform_0, window_bounds = array<i64: 1, 8, 32>}, {pipeline_mode = #tpu.pipeline_mode<synchronous>, transform_indices = @transform_1, window_bounds = array<i64: 4, 8, 8>}, {pipeline_mode = #tpu.pipeline_mode<synchronous>, transform_indices = @transform_2, window_bounds = array<i64: 4, 8, 8>}, {pipeline_mode = #tpu.pipeline_mode<synchronous>, transform_indices = @transform_3, window_bounds = array<i64: 32, 16>}, {pipeline_mode = #tpu.pipeline_mode<synchronous>, transform_indices = @transform_4, window_bounds = array<i64: 2, 32, 16>}, {pipeline_mode = #tpu.pipeline_mode<synchronous>, transform_indices = @transform_5, window_bounds = array<i64: 2, 1, 32>}, {pipeline_mode = #tpu.pipeline_mode<synchronous>, transform_indices = @transform_6, window_bounds = array<i64: 2, 32, 96>}, {pipeline_mode = #tpu.pipeline_mode<synchronous>, transform_indices = @transform_7, window_bounds = array<i64: 2, 32, 32>}, {pipeline_mode = #tpu.pipeline_mode<synchronous>, transform_indices = @transform_8, window_bounds = array<i64: 2, 1, 32>}, {pipeline_mode = #tpu.pipeline_mode<synchronous>, transform_indices = @transform_9, window_bounds = array<i64: 2, 32, 64>}, {pipeline_mode = #tpu.pipeline_mode<synchronous>, transform_indices = @transform_10, window_bounds = array<i64: 2, 64, 32>}, {pipeline_mode = #tpu.pipeline_mode<synchronous>, transform_indices = @transform_11, window_bounds = array<i64: 2, 1, 16>}, {pipeline_mode = #tpu.pipeline_mode<synchronous>, transform_indices = @transform_12, window_bounds = array<i64: 2, 16, 48>}, {pipeline_mode = #tpu.pipeline_mode<synchronous>, transform_indices = @transform_13, window_bounds = array<i64: 2, 16, 16>}, {pipeline_mode = #tpu.pipeline_mode<synchronous>, transform_indices = @transform_14, window_bounds = array<i64: 2, 1, 16>}, {pipeline_mode = #tpu.pipeline_mode<synchronous>, transform_indices = @transform_15, window_bounds = array<i64: 2, 16, 32>}, {pipeline_mode = #tpu.pipeline_mode<synchronous>, transform_indices = @transform_16, window_bounds = array<i64: 2, 32, 16>}, {pipeline_mode = #tpu.pipeline_mode<synchronous>, transform_indices = @transform_17, window_bounds = array<i64: 1, 32>}, {pipeline_mode = #tpu.pipeline_mode<synchronous>, transform_indices = @transform_18, window_bounds = array<i64: 1, 16>}, {transform_indices = @transform_19, window_bounds = array<i64: 1, 8, 32>}, {transform_indices = @transform_20, window_bounds = array<i64: 1, 8, 16>}]} {
    %c0 = arith.constant 0 : index
    %c0_0 = arith.constant 0 : index
    %c0_1 = arith.constant 0 : index
    %0 = vector.load %arg1[%c0, %c0_0, %c0_1] : memref<1x8x32xf32, #tpu.memory_space<vmem>>, vector<1x8x32xf32>
    %1 = vector.shape_cast %0 : vector<1x8x32xf32> to vector<8x32xf32>
    %2 = arith.truncf %1 : vector<8x32xf32> to vector<8x32xbf16>
    %c0_2 = arith.constant 0 : index
    %c0_3 = arith.constant 0 : index
    %3 = vector.load %arg4[%c0_2, %c0_3] : memref<32x16xbf16, #tpu.memory_space<vmem>>, vector<32x16xbf16>
    %cst = arith.constant dense<0.000000e+00> : vector<8x16xf32>
    %4 = tpu.matmul %2, %3, %cst {dimension_numbers = #tpu.dot_dimension_numbers<[1], [0], [0], [1], [0, 0, 1, 1], [], []>} : vector<8x32xbf16>, vector<32x16xbf16>, vector<8x16xf32> -> vector<8x16xf32>
    %c0_4 = arith.constant 0 : index
    %c0_5 = arith.constant 0 : index
    %c0_6 = arith.constant 0 : index
    %5 = vector.load %arg6[%c0_4, %c0_5, %c0_6] : memref<2x1x32xf32, #tpu.memory_space<vmem>>, vector<1x1x32xf32>
    %6 = vector.shape_cast %5 : vector<1x1x32xf32> to vector<1x32xf32>
    %c0_7 = arith.constant 0 : index
    %c0_8 = arith.constant 0 : index
    %c0_9 = arith.constant 0 : index
    %7 = vector.load %arg7[%c0_7, %c0_8, %c0_9] : memref<2x32x96xbf16, #tpu.memory_space<vmem>>, vector<1x32x96xbf16>
    %8 = vector.shape_cast %7 : vector<1x32x96xbf16> to vector<32x96xbf16>
    %c0_10 = arith.constant 0 : index
    %c0_11 = arith.constant 0 : index
    %c0_12 = arith.constant 0 : index
    %9 = vector.load %arg8[%c0_10, %c0_11, %c0_12] : memref<2x32x32xbf16, #tpu.memory_space<vmem>>, vector<1x32x32xbf16>
    %10 = vector.shape_cast %9 : vector<1x32x32xbf16> to vector<32x32xbf16>
    %c0_13 = arith.constant 0 : index
    %c0_14 = arith.constant 0 : index
    %c0_15 = arith.constant 0 : index
    %11 = vector.load %arg2[%c0_13, %c0_14, %c0_15] : memref<4x8x8xf32, #tpu.memory_space<vmem>>, vector<4x8x8xf32>
    %12 = arith.mulf %1, %1 : vector<8x32xf32>
    %cst_16 = arith.constant dense<0.000000e+00> : vector<8xf32>
    %13 = vector.multi_reduction <add>, %12, %cst_16 [1] : vector<8x32xf32> to vector<8xf32>
    %14 = vector.shape_cast %13 : vector<8xf32> to vector<8x1xf32>
    %cst_17 = arith.constant 3.200000e+01 : f32
    %15 = vector.broadcast %cst_17 : f32 to vector<8x1xf32>
    %16 = arith.divf %14, %15 : vector<8x1xf32>
    %cst_18 = arith.constant 9.99999997E-7 : f32
    %17 = vector.broadcast %cst_18 : f32 to vector<8x1xf32>
    %18 = arith.addf %16, %17 : vector<8x1xf32>
    %19 = math.rsqrt %18 : vector<8x1xf32>
    %20 = vector.broadcast %19 : vector<8x1xf32> to vector<8x32xf32>
    %21 = arith.mulf %1, %20 : vector<8x32xf32>
    %22 = vector.broadcast %6 : vector<1x32xf32> to vector<8x32xf32>
    %23 = arith.mulf %21, %22 : vector<8x32xf32>
    %24 = arith.truncf %23 : vector<8x32xf32> to vector<8x32xbf16>
    %cst_19 = arith.constant dense<0.000000e+00> : vector<8x96xf32>
    %25 = tpu.matmul %24, %8, %cst_19 {dimension_numbers = #tpu.dot_dimension_numbers<[1], [0], [0], [1], [0, 0, 1, 1], [], []>} : vector<8x32xbf16>, vector<32x96xbf16>, vector<8x96xf32> -> vector<8x96xf32>
    %26 = arith.truncf %25 : vector<8x96xf32> to vector<8x96xbf16>
    %27 = vector.extract_strided_slice %26 {offsets = [0, 0], sizes = [8, 8], strides = [1, 1]} : vector<8x96xbf16> to vector<8x8xbf16>
    %28 = vector.extract_strided_slice %26 {offsets = [0, 8], sizes = [8, 8], strides = [1, 1]} : vector<8x96xbf16> to vector<8x8xbf16>
    %29 = vector.extract_strided_slice %26 {offsets = [0, 16], sizes = [8, 8], strides = [1, 1]} : vector<8x96xbf16> to vector<8x8xbf16>
    %30 = vector.extract_strided_slice %26 {offsets = [0, 24], sizes = [8, 8], strides = [1, 1]} : vector<8x96xbf16> to vector<8x8xbf16>
    %31 = vector.shape_cast %27 : vector<8x8xbf16> to vector<1x8x8xbf16>
    %32 = vector.shape_cast %28 : vector<8x8xbf16> to vector<1x8x8xbf16>
    %33 = vector.shape_cast %29 : vector<8x8xbf16> to vector<1x8x8xbf16>
    %34 = vector.shape_cast %30 : vector<8x8xbf16> to vector<1x8x8xbf16>
    %35 = tpu.concatenate %31, %32, %33, %34 in 0 : vector<1x8x8xbf16>, vector<1x8x8xbf16>, vector<1x8x8xbf16>, vector<1x8x8xbf16> -> vector<4x8x8xbf16>
    %36 = vector.extract_strided_slice %26 {offsets = [0, 32], sizes = [8, 8], strides = [1, 1]} : vector<8x96xbf16> to vector<8x8xbf16>
    %37 = vector.extract_strided_slice %26 {offsets = [0, 40], sizes = [8, 8], strides = [1, 1]} : vector<8x96xbf16> to vector<8x8xbf16>
    %38 = vector.extract_strided_slice %26 {offsets = [0, 48], sizes = [8, 8], strides = [1, 1]} : vector<8x96xbf16> to vector<8x8xbf16>
    %39 = vector.extract_strided_slice %26 {offsets = [0, 56], sizes = [8, 8], strides = [1, 1]} : vector<8x96xbf16> to vector<8x8xbf16>
    %40 = vector.shape_cast %36 : vector<8x8xbf16> to vector<1x8x8xbf16>
    %41 = vector.shape_cast %37 : vector<8x8xbf16> to vector<1x8x8xbf16>
    %42 = vector.shape_cast %38 : vector<8x8xbf16> to vector<1x8x8xbf16>
    %43 = vector.shape_cast %39 : vector<8x8xbf16> to vector<1x8x8xbf16>
    %44 = tpu.concatenate %40, %41, %42, %43 in 0 : vector<1x8x8xbf16>, vector<1x8x8xbf16>, vector<1x8x8xbf16>, vector<1x8x8xbf16> -> vector<4x8x8xbf16>
    %45 = vector.extract_strided_slice %26 {offsets = [0, 64], sizes = [8, 8], strides = [1, 1]} : vector<8x96xbf16> to vector<8x8xbf16>
    %46 = vector.extract_strided_slice %26 {offsets = [0, 72], sizes = [8, 8], strides = [1, 1]} : vector<8x96xbf16> to vector<8x8xbf16>
    %47 = vector.extract_strided_slice %26 {offsets = [0, 80], sizes = [8, 8], strides = [1, 1]} : vector<8x96xbf16> to vector<8x8xbf16>
    %48 = vector.extract_strided_slice %26 {offsets = [0, 88], sizes = [8, 8], strides = [1, 1]} : vector<8x96xbf16> to vector<8x8xbf16>
    %49 = vector.shape_cast %45 : vector<8x8xbf16> to vector<1x8x8xbf16>
    %50 = vector.shape_cast %46 : vector<8x8xbf16> to vector<1x8x8xbf16>
    %51 = vector.shape_cast %47 : vector<8x8xbf16> to vector<1x8x8xbf16>
    %52 = vector.shape_cast %48 : vector<8x8xbf16> to vector<1x8x8xbf16>
    %53 = tpu.concatenate %49, %50, %51, %52 in 0 : vector<1x8x8xbf16>, vector<1x8x8xbf16>, vector<1x8x8xbf16>, vector<1x8x8xbf16> -> vector<4x8x8xbf16>
    %cst_20 = arith.constant dense<0.000000e+00> : vector<4x8x8xf32>
    %54 = tpu.matmul %35, %44, %cst_20 {dimension_numbers = #tpu.dot_dimension_numbers<[2], [2], [1], [1], [0, 0, 0, 1, 1, 1], [0], [0]>} : vector<4x8x8xbf16>, vector<4x8x8xbf16>, vector<4x8x8xf32> -> vector<4x8x8xf32>
    %55 = arith.addf %54, %11 : vector<4x8x8xf32>
    %cst_21 = arith.constant dense<0xFF800000> : vector<4x8xf32>
    %56 = vector.multi_reduction <maximumf>, %55, %cst_21 [2] : vector<4x8x8xf32> to vector<4x8xf32>
    %57 = vector.shape_cast %56 : vector<4x8xf32> to vector<4x8x1xf32>
    %58 = vector.broadcast %57 : vector<4x8x1xf32> to vector<4x8x8xf32>
    %59 = arith.subf %55, %58 : vector<4x8x8xf32>
    %60 = math.exp %59 : vector<4x8x8xf32>
    %cst_22 = arith.constant dense<0.000000e+00> : vector<4x8xf32>
    %61 = vector.multi_reduction <add>, %60, %cst_22 [2] : vector<4x8x8xf32> to vector<4x8xf32>
    %62 = vector.shape_cast %61 : vector<4x8xf32> to vector<4x8x1xf32>
    %63 = vector.broadcast %62 : vector<4x8x1xf32> to vector<4x8x8xf32>
    %64 = arith.divf %60, %63 : vector<4x8x8xf32>
    %65 = arith.truncf %64 : vector<4x8x8xf32> to vector<4x8x8xbf16>
    %cst_23 = arith.constant dense<0.000000e+00> : vector<4x8x8xf32>
    %66 = tpu.matmul %65, %53, %cst_23 {dimension_numbers = #tpu.dot_dimension_numbers<[2], [1], [1], [2], [0, 0, 0, 1, 1, 2], [0], [0]>} : vector<4x8x8xbf16>, vector<4x8x8xbf16>, vector<4x8x8xf32> -> vector<4x8x8xf32>
    %67 = vector.extract_strided_slice %66 {offsets = [0, 0, 0], sizes = [1, 8, 8], strides = [1, 1, 1]} : vector<4x8x8xf32> to vector<1x8x8xf32>
    %68 = vector.shape_cast %67 : vector<1x8x8xf32> to vector<8x8xf32>
    %69 = vector.extract_strided_slice %66 {offsets = [1, 0, 0], sizes = [1, 8, 8], strides = [1, 1, 1]} : vector<4x8x8xf32> to vector<1x8x8xf32>
    %70 = vector.shape_cast %69 : vector<1x8x8xf32> to vector<8x8xf32>
    %71 = vector.extract_strided_slice %66 {offsets = [2, 0, 0], sizes = [1, 8, 8], strides = [1, 1, 1]} : vector<4x8x8xf32> to vector<1x8x8xf32>
    %72 = vector.shape_cast %71 : vector<1x8x8xf32> to vector<8x8xf32>
    %73 = vector.extract_strided_slice %66 {offsets = [3, 0, 0], sizes = [1, 8, 8], strides = [1, 1, 1]} : vector<4x8x8xf32> to vector<1x8x8xf32>
    %74 = vector.shape_cast %73 : vector<1x8x8xf32> to vector<8x8xf32>
    %75 = tpu.concatenate %68, %70, %72, %74 in 1 : vector<8x8xf32>, vector<8x8xf32>, vector<8x8xf32>, vector<8x8xf32> -> vector<8x32xf32>
    %76 = arith.truncf %75 : vector<8x32xf32> to vector<8x32xbf16>
    %cst_24 = arith.constant dense<0.000000e+00> : vector<8x32xf32>
    %77 = tpu.matmul %76, %10, %cst_24 {dimension_numbers = #tpu.dot_dimension_numbers<[1], [0], [0], [1], [0, 0, 1, 1], [], []>} : vector<8x32xbf16>, vector<32x32xbf16>, vector<8x32xf32> -> vector<8x32xf32>
    %78 = arith.addf %1, %77 : vector<8x32xf32>
    %c0_25 = arith.constant 0 : index
    %c0_26 = arith.constant 0 : index
    %c0_27 = arith.constant 0 : index
    %79 = vector.load %arg9[%c0_25, %c0_26, %c0_27] : memref<2x1x32xf32, #tpu.memory_space<vmem>>, vector<1x1x32xf32>
    %80 = vector.shape_cast %79 : vector<1x1x32xf32> to vector<1x32xf32>
    %c0_28 = arith.constant 0 : index
    %c0_29 = arith.constant 0 : index
    %c0_30 = arith.constant 0 : index
    %81 = vector.load %arg10[%c0_28, %c0_29, %c0_30] : memref<2x32x64xbf16, #tpu.memory_space<vmem>>, vector<1x32x64xbf16>
    %82 = vector.shape_cast %81 : vector<1x32x64xbf16> to vector<32x64xbf16>
    %c0_31 = arith.constant 0 : index
    %c0_32 = arith.constant 0 : index
    %c0_33 = arith.constant 0 : index
    %83 = vector.load %arg11[%c0_31, %c0_32, %c0_33] : memref<2x64x32xbf16, #tpu.memory_space<vmem>>, vector<1x64x32xbf16>
    %84 = vector.shape_cast %83 : vector<1x64x32xbf16> to vector<64x32xbf16>
    %85 = arith.mulf %78, %78 : vector<8x32xf32>
    %cst_34 = arith.constant dense<0.000000e+00> : vector<8xf32>
    %86 = vector.multi_reduction <add>, %85, %cst_34 [1] : vector<8x32xf32> to vector<8xf32>
    %87 = vector.shape_cast %86 : vector<8xf32> to vector<8x1xf32>
    %cst_35 = arith.constant 3.200000e+01 : f32
    %88 = vector.broadcast %cst_35 : f32 to vector<8x1xf32>
    %89 = arith.divf %87, %88 : vector<8x1xf32>
    %cst_36 = arith.constant 9.99999997E-7 : f32
    %90 = vector.broadcast %cst_36 : f32 to vector<8x1xf32>
    %91 = arith.addf %89, %90 : vector<8x1xf32>
    %92 = math.rsqrt %91 : vector<8x1xf32>
    %93 = vector.broadcast %92 : vector<8x1xf32> to vector<8x32xf32>
    %94 = arith.mulf %78, %93 : vector<8x32xf32>
    %95 = vector.broadcast %80 : vector<1x32xf32> to vector<8x32xf32>
    %96 = arith.mulf %94, %95 : vector<8x32xf32>
    %97 = arith.truncf %96 : vector<8x32xf32> to vector<8x32xbf16>
    %cst_37 = arith.constant dense<0.000000e+00> : vector<8x64xf32>
    %98 = tpu.matmul %97, %82, %cst_37 {dimension_numbers = #tpu.dot_dimension_numbers<[1], [0], [0], [1], [0, 0, 1, 1], [], []>} : vector<8x32xbf16>, vector<32x64xbf16>, vector<8x64xf32> -> vector<8x64xf32>
    %cst_38 = arith.constant 0.000000e+00 : f32
    %99 = vector.broadcast %cst_38 : f32 to vector<8x64xf32>
    %100 = arith.maximumf %98, %99 : vector<8x64xf32>
    %101 = arith.truncf %100 : vector<8x64xf32> to vector<8x64xbf16>
    %cst_39 = arith.constant dense<0.000000e+00> : vector<8x32xf32>
    %102 = tpu.matmul %101, %84, %cst_39 {dimension_numbers = #tpu.dot_dimension_numbers<[1], [0], [0], [1], [0, 0, 1, 1], [], []>} : vector<8x64xbf16>, vector<64x32xbf16>, vector<8x32xf32> -> vector<8x32xf32>
    %103 = arith.addf %78, %102 : vector<8x32xf32>
    %104 = arith.truncf %103 : vector<8x32xf32> to vector<8x32xbf16>
    %c0_40 = arith.constant 0 : index
    %c0_41 = arith.constant 0 : index
    %c0_42 = arith.constant 0 : index
    %105 = vector.load %arg5[%c0_40, %c0_41, %c0_42] : memref<2x32x16xbf16, #tpu.memory_space<vmem>>, vector<1x32x16xbf16>
    %106 = vector.shape_cast %105 : vector<1x32x16xbf16> to vector<32x16xbf16>
    %cst_43 = arith.constant dense<0.000000e+00> : vector<8x16xf32>
    %107 = tpu.matmul %104, %106, %cst_43 {dimension_numbers = #tpu.dot_dimension_numbers<[1], [0], [0], [1], [0, 0, 1, 1], [], []>} : vector<8x32xbf16>, vector<32x16xbf16>, vector<8x16xf32> -> vector<8x16xf32>
    %108 = arith.addf %4, %107 : vector<8x16xf32>
    %c0_44 = arith.constant 0 : index
    %c0_45 = arith.constant 0 : index
    %c0_46 = arith.constant 0 : index
    %109 = vector.load %arg12[%c0_44, %c0_45, %c0_46] : memref<2x1x16xf32, #tpu.memory_space<vmem>>, vector<1x1x16xf32>
    %110 = vector.shape_cast %109 : vector<1x1x16xf32> to vector<1x16xf32>
    %c0_47 = arith.constant 0 : index
    %c0_48 = arith.constant 0 : index
    %c0_49 = arith.constant 0 : index
    %111 = vector.load %arg13[%c0_47, %c0_48, %c0_49] : memref<2x16x48xbf16, #tpu.memory_space<vmem>>, vector<1x16x48xbf16>
    %112 = vector.shape_cast %111 : vector<1x16x48xbf16> to vector<16x48xbf16>
    %c0_50 = arith.constant 0 : index
    %c0_51 = arith.constant 0 : index
    %c0_52 = arith.constant 0 : index
    %113 = vector.load %arg14[%c0_50, %c0_51, %c0_52] : memref<2x16x16xbf16, #tpu.memory_space<vmem>>, vector<1x16x16xbf16>
    %114 = vector.shape_cast %113 : vector<1x16x16xbf16> to vector<16x16xbf16>
    %c0_53 = arith.constant 0 : index
    %c0_54 = arith.constant 0 : index
    %c0_55 = arith.constant 0 : index
    %115 = vector.load %arg3[%c0_53, %c0_54, %c0_55] : memref<4x8x8xf32, #tpu.memory_space<vmem>>, vector<4x8x8xf32>
    %116 = arith.mulf %108, %108 : vector<8x16xf32>
    %cst_56 = arith.constant dense<0.000000e+00> : vector<8xf32>
    %117 = vector.multi_reduction <add>, %116, %cst_56 [1] : vector<8x16xf32> to vector<8xf32>
    %118 = vector.shape_cast %117 : vector<8xf32> to vector<8x1xf32>
    %cst_57 = arith.constant 1.600000e+01 : f32
    %119 = vector.broadcast %cst_57 : f32 to vector<8x1xf32>
    %120 = arith.divf %118, %119 : vector<8x1xf32>
    %cst_58 = arith.constant 9.99999997E-7 : f32
    %121 = vector.broadcast %cst_58 : f32 to vector<8x1xf32>
    %122 = arith.addf %120, %121 : vector<8x1xf32>
    %123 = math.rsqrt %122 : vector<8x1xf32>
    %124 = vector.broadcast %123 : vector<8x1xf32> to vector<8x16xf32>
    %125 = arith.mulf %108, %124 : vector<8x16xf32>
    %126 = vector.broadcast %110 : vector<1x16xf32> to vector<8x16xf32>
    %127 = arith.mulf %125, %126 : vector<8x16xf32>
    %128 = arith.truncf %127 : vector<8x16xf32> to vector<8x16xbf16>
    %cst_59 = arith.constant dense<0.000000e+00> : vector<8x48xf32>
    %129 = tpu.matmul %128, %112, %cst_59 {dimension_numbers = #tpu.dot_dimension_numbers<[1], [0], [0], [1], [0, 0, 1, 1], [], []>} : vector<8x16xbf16>, vector<16x48xbf16>, vector<8x48xf32> -> vector<8x48xf32>
    %130 = arith.truncf %129 : vector<8x48xf32> to vector<8x48xbf16>
    %131 = vector.extract_strided_slice %130 {offsets = [0, 0], sizes = [8, 4], strides = [1, 1]} : vector<8x48xbf16> to vector<8x4xbf16>
    %132 = vector.extract_strided_slice %130 {offsets = [0, 4], sizes = [8, 4], strides = [1, 1]} : vector<8x48xbf16> to vector<8x4xbf16>
    %133 = vector.extract_strided_slice %130 {offsets = [0, 8], sizes = [8, 4], strides = [1, 1]} : vector<8x48xbf16> to vector<8x4xbf16>
    %134 = vector.extract_strided_slice %130 {offsets = [0, 12], sizes = [8, 4], strides = [1, 1]} : vector<8x48xbf16> to vector<8x4xbf16>
    %135 = vector.shape_cast %131 : vector<8x4xbf16> to vector<1x8x4xbf16>
    %136 = vector.shape_cast %132 : vector<8x4xbf16> to vector<1x8x4xbf16>
    %137 = vector.shape_cast %133 : vector<8x4xbf16> to vector<1x8x4xbf16>
    %138 = vector.shape_cast %134 : vector<8x4xbf16> to vector<1x8x4xbf16>
    %139 = tpu.concatenate %135, %136, %137, %138 in 0 : vector<1x8x4xbf16>, vector<1x8x4xbf16>, vector<1x8x4xbf16>, vector<1x8x4xbf16> -> vector<4x8x4xbf16>
    %140 = vector.extract_strided_slice %130 {offsets = [0, 16], sizes = [8, 4], strides = [1, 1]} : vector<8x48xbf16> to vector<8x4xbf16>
    %141 = vector.extract_strided_slice %130 {offsets = [0, 20], sizes = [8, 4], strides = [1, 1]} : vector<8x48xbf16> to vector<8x4xbf16>
    %142 = vector.extract_strided_slice %130 {offsets = [0, 24], sizes = [8, 4], strides = [1, 1]} : vector<8x48xbf16> to vector<8x4xbf16>
    %143 = vector.extract_strided_slice %130 {offsets = [0, 28], sizes = [8, 4], strides = [1, 1]} : vector<8x48xbf16> to vector<8x4xbf16>
    %144 = vector.shape_cast %140 : vector<8x4xbf16> to vector<1x8x4xbf16>
    %145 = vector.shape_cast %141 : vector<8x4xbf16> to vector<1x8x4xbf16>
    %146 = vector.shape_cast %142 : vector<8x4xbf16> to vector<1x8x4xbf16>
    %147 = vector.shape_cast %143 : vector<8x4xbf16> to vector<1x8x4xbf16>
    %148 = tpu.concatenate %144, %145, %146, %147 in 0 : vector<1x8x4xbf16>, vector<1x8x4xbf16>, vector<1x8x4xbf16>, vector<1x8x4xbf16> -> vector<4x8x4xbf16>
    %149 = vector.extract_strided_slice %130 {offsets = [0, 32], sizes = [8, 4], strides = [1, 1]} : vector<8x48xbf16> to vector<8x4xbf16>
    %150 = vector.extract_strided_slice %130 {offsets = [0, 36], sizes = [8, 4], strides = [1, 1]} : vector<8x48xbf16> to vector<8x4xbf16>
    %151 = vector.extract_strided_slice %130 {offsets = [0, 40], sizes = [8, 4], strides = [1, 1]} : vector<8x48xbf16> to vector<8x4xbf16>
    %152 = vector.extract_strided_slice %130 {offsets = [0, 44], sizes = [8, 4], strides = [1, 1]} : vector<8x48xbf16> to vector<8x4xbf16>
    %153 = vector.shape_cast %149 : vector<8x4xbf16> to vector<1x8x4xbf16>
    %154 = vector.shape_cast %150 : vector<8x4xbf16> to vector<1x8x4xbf16>
    %155 = vector.shape_cast %151 : vector<8x4xbf16> to vector<1x8x4xbf16>
    %156 = vector.shape_cast %152 : vector<8x4xbf16> to vector<1x8x4xbf16>
    %157 = tpu.concatenate %153, %154, %155, %156 in 0 : vector<1x8x4xbf16>, vector<1x8x4xbf16>, vector<1x8x4xbf16>, vector<1x8x4xbf16> -> vector<4x8x4xbf16>
    %cst_60 = arith.constant dense<0.000000e+00> : vector<4x8x8xf32>
    %158 = tpu.matmul %139, %148, %cst_60 {dimension_numbers = #tpu.dot_dimension_numbers<[2], [2], [1], [1], [0, 0, 0, 1, 1, 1], [0], [0]>} : vector<4x8x4xbf16>, vector<4x8x4xbf16>, vector<4x8x8xf32> -> vector<4x8x8xf32>
    %159 = arith.addf %158, %115 : vector<4x8x8xf32>
    %cst_61 = arith.constant dense<0xFF800000> : vector<4x8xf32>
    %160 = vector.multi_reduction <maximumf>, %159, %cst_61 [2] : vector<4x8x8xf32> to vector<4x8xf32>
    %161 = vector.shape_cast %160 : vector<4x8xf32> to vector<4x8x1xf32>
    %162 = vector.broadcast %161 : vector<4x8x1xf32> to vector<4x8x8xf32>
    %163 = arith.subf %159, %162 : vector<4x8x8xf32>
    %164 = math.exp %163 : vector<4x8x8xf32>
    %cst_62 = arith.constant dense<0.000000e+00> : vector<4x8xf32>
    %165 = vector.multi_reduction <add>, %164, %cst_62 [2] : vector<4x8x8xf32> to vector<4x8xf32>
    %166 = vector.shape_cast %165 : vector<4x8xf32> to vector<4x8x1xf32>
    %167 = vector.broadcast %166 : vector<4x8x1xf32> to vector<4x8x8xf32>
    %168 = arith.divf %164, %167 : vector<4x8x8xf32>
    %169 = arith.truncf %168 : vector<4x8x8xf32> to vector<4x8x8xbf16>
    %cst_63 = arith.constant dense<0.000000e+00> : vector<4x8x4xf32>
    %170 = tpu.matmul %169, %157, %cst_63 {dimension_numbers = #tpu.dot_dimension_numbers<[2], [1], [1], [2], [0, 0, 0, 1, 1, 2], [0], [0]>} : vector<4x8x8xbf16>, vector<4x8x4xbf16>, vector<4x8x4xf32> -> vector<4x8x4xf32>
    %171 = vector.extract_strided_slice %170 {offsets = [0, 0, 0], sizes = [1, 8, 4], strides = [1, 1, 1]} : vector<4x8x4xf32> to vector<1x8x4xf32>
    %172 = vector.shape_cast %171 : vector<1x8x4xf32> to vector<8x4xf32>
    %173 = vector.extract_strided_slice %170 {offsets = [1, 0, 0], sizes = [1, 8, 4], strides = [1, 1, 1]} : vector<4x8x4xf32> to vector<1x8x4xf32>
    %174 = vector.shape_cast %173 : vector<1x8x4xf32> to vector<8x4xf32>
    %175 = vector.extract_strided_slice %170 {offsets = [2, 0, 0], sizes = [1, 8, 4], strides = [1, 1, 1]} : vector<4x8x4xf32> to vector<1x8x4xf32>
    %176 = vector.shape_cast %175 : vector<1x8x4xf32> to vector<8x4xf32>
    %177 = vector.extract_strided_slice %170 {offsets = [3, 0, 0], sizes = [1, 8, 4], strides = [1, 1, 1]} : vector<4x8x4xf32> to vector<1x8x4xf32>
    %178 = vector.shape_cast %177 : vector<1x8x4xf32> to vector<8x4xf32>
    %179 = tpu.concatenate %172, %174, %176, %178 in 1 : vector<8x4xf32>, vector<8x4xf32>, vector<8x4xf32>, vector<8x4xf32> -> vector<8x16xf32>
    %180 = arith.truncf %179 : vector<8x16xf32> to vector<8x16xbf16>
    %cst_64 = arith.constant dense<0.000000e+00> : vector<8x16xf32>
    %181 = tpu.matmul %180, %114, %cst_64 {dimension_numbers = #tpu.dot_dimension_numbers<[1], [0], [0], [1], [0, 0, 1, 1], [], []>} : vector<8x16xbf16>, vector<16x16xbf16>, vector<8x16xf32> -> vector<8x16xf32>
    %182 = arith.addf %108, %181 : vector<8x16xf32>
    %c0_65 = arith.constant 0 : index
    %c0_66 = arith.constant 0 : index
    %c0_67 = arith.constant 0 : index
    %183 = vector.load %arg15[%c0_65, %c0_66, %c0_67] : memref<2x1x16xf32, #tpu.memory_space<vmem>>, vector<1x1x16xf32>
    %184 = vector.shape_cast %183 : vector<1x1x16xf32> to vector<1x16xf32>
    %c0_68 = arith.constant 0 : index
    %c0_69 = arith.constant 0 : index
    %c0_70 = arith.constant 0 : index
    %185 = vector.load %arg16[%c0_68, %c0_69, %c0_70] : memref<2x16x32xbf16, #tpu.memory_space<vmem>>, vector<1x16x32xbf16>
    %186 = vector.shape_cast %185 : vector<1x16x32xbf16> to vector<16x32xbf16>
    %c0_71 = arith.constant 0 : index
    %c0_72 = arith.constant 0 : index
    %c0_73 = arith.constant 0 : index
    %187 = vector.load %arg17[%c0_71, %c0_72, %c0_73] : memref<2x32x16xbf16, #tpu.memory_space<vmem>>, vector<1x32x16xbf16>
    %188 = vector.shape_cast %187 : vector<1x32x16xbf16> to vector<32x16xbf16>
    %189 = arith.mulf %182, %182 : vector<8x16xf32>
    %cst_74 = arith.constant dense<0.000000e+00> : vector<8xf32>
    %190 = vector.multi_reduction <add>, %189, %cst_74 [1] : vector<8x16xf32> to vector<8xf32>
    %191 = vector.shape_cast %190 : vector<8xf32> to vector<8x1xf32>
    %cst_75 = arith.constant 1.600000e+01 : f32
    %192 = vector.broadcast %cst_75 : f32 to vector<8x1xf32>
    %193 = arith.divf %191, %192 : vector<8x1xf32>
    %cst_76 = arith.constant 9.99999997E-7 : f32
    %194 = vector.broadcast %cst_76 : f32 to vector<8x1xf32>
    %195 = arith.addf %193, %194 : vector<8x1xf32>
    %196 = math.rsqrt %195 : vector<8x1xf32>
    %197 = vector.broadcast %196 : vector<8x1xf32> to vector<8x16xf32>
    %198 = arith.mulf %182, %197 : vector<8x16xf32>
    %199 = vector.broadcast %184 : vector<1x16xf32> to vector<8x16xf32>
    %200 = arith.mulf %198, %199 : vector<8x16xf32>
    %201 = arith.truncf %200 : vector<8x16xf32> to vector<8x16xbf16>
    %cst_77 = arith.constant dense<0.000000e+00> : vector<8x32xf32>
    %202 = tpu.matmul %201, %186, %cst_77 {dimension_numbers = #tpu.dot_dimension_numbers<[1], [0], [0], [1], [0, 0, 1, 1], [], []>} : vector<8x16xbf16>, vector<16x32xbf16>, vector<8x32xf32> -> vector<8x32xf32>
    %cst_78 = arith.constant 0.000000e+00 : f32
    %203 = vector.broadcast %cst_78 : f32 to vector<8x32xf32>
    %204 = arith.maximumf %202, %203 : vector<8x32xf32>
    %205 = arith.truncf %204 : vector<8x32xf32> to vector<8x32xbf16>
    %cst_79 = arith.constant dense<0.000000e+00> : vector<8x16xf32>
    %206 = tpu.matmul %205, %188, %cst_79 {dimension_numbers = #tpu.dot_dimension_numbers<[1], [0], [0], [1], [0, 0, 1, 1], [], []>} : vector<8x32xbf16>, vector<32x16xbf16>, vector<8x16xf32> -> vector<8x16xf32>
    %207 = arith.addf %182, %206 : vector<8x16xf32>
    %c1 = arith.constant 1 : index
    %c0_80 = arith.constant 0 : index
    %c0_81 = arith.constant 0 : index
    %208 = vector.load %arg6[%c1, %c0_80, %c0_81] : memref<2x1x32xf32, #tpu.memory_space<vmem>>, vector<1x1x32xf32>
    %209 = vector.shape_cast %208 : vector<1x1x32xf32> to vector<1x32xf32>
    %c1_82 = arith.constant 1 : index
    %c0_83 = arith.constant 0 : index
    %c0_84 = arith.constant 0 : index
    %210 = vector.load %arg7[%c1_82, %c0_83, %c0_84] : memref<2x32x96xbf16, #tpu.memory_space<vmem>>, vector<1x32x96xbf16>
    %211 = vector.shape_cast %210 : vector<1x32x96xbf16> to vector<32x96xbf16>
    %c1_85 = arith.constant 1 : index
    %c0_86 = arith.constant 0 : index
    %c0_87 = arith.constant 0 : index
    %212 = vector.load %arg8[%c1_85, %c0_86, %c0_87] : memref<2x32x32xbf16, #tpu.memory_space<vmem>>, vector<1x32x32xbf16>
    %213 = vector.shape_cast %212 : vector<1x32x32xbf16> to vector<32x32xbf16>
    %214 = arith.mulf %103, %103 : vector<8x32xf32>
    %cst_88 = arith.constant dense<0.000000e+00> : vector<8xf32>
    %215 = vector.multi_reduction <add>, %214, %cst_88 [1] : vector<8x32xf32> to vector<8xf32>
    %216 = vector.shape_cast %215 : vector<8xf32> to vector<8x1xf32>
    %cst_89 = arith.constant 3.200000e+01 : f32
    %217 = vector.broadcast %cst_89 : f32 to vector<8x1xf32>
    %218 = arith.divf %216, %217 : vector<8x1xf32>
    %cst_90 = arith.constant 9.99999997E-7 : f32
    %219 = vector.broadcast %cst_90 : f32 to vector<8x1xf32>
    %220 = arith.addf %218, %219 : vector<8x1xf32>
    %221 = math.rsqrt %220 : vector<8x1xf32>
    %222 = vector.broadcast %221 : vector<8x1xf32> to vector<8x32xf32>
    %223 = arith.mulf %103, %222 : vector<8x32xf32>
    %224 = vector.broadcast %209 : vector<1x32xf32> to vector<8x32xf32>
    %225 = arith.mulf %223, %224 : vector<8x32xf32>
    %226 = arith.truncf %225 : vector<8x32xf32> to vector<8x32xbf16>
    %cst_91 = arith.constant dense<0.000000e+00> : vector<8x96xf32>
    %227 = tpu.matmul %226, %211, %cst_91 {dimension_numbers = #tpu.dot_dimension_numbers<[1], [0], [0], [1], [0, 0, 1, 1], [], []>} : vector<8x32xbf16>, vector<32x96xbf16>, vector<8x96xf32> -> vector<8x96xf32>
    %228 = arith.truncf %227 : vector<8x96xf32> to vector<8x96xbf16>
    %229 = vector.extract_strided_slice %228 {offsets = [0, 0], sizes = [8, 8], strides = [1, 1]} : vector<8x96xbf16> to vector<8x8xbf16>
    %230 = vector.extract_strided_slice %228 {offsets = [0, 8], sizes = [8, 8], strides = [1, 1]} : vector<8x96xbf16> to vector<8x8xbf16>
    %231 = vector.extract_strided_slice %228 {offsets = [0, 16], sizes = [8, 8], strides = [1, 1]} : vector<8x96xbf16> to vector<8x8xbf16>
    %232 = vector.extract_strided_slice %228 {offsets = [0, 24], sizes = [8, 8], strides = [1, 1]} : vector<8x96xbf16> to vector<8x8xbf16>
    %233 = vector.shape_cast %229 : vector<8x8xbf16> to vector<1x8x8xbf16>
    %234 = vector.shape_cast %230 : vector<8x8xbf16> to vector<1x8x8xbf16>
    %235 = vector.shape_cast %231 : vector<8x8xbf16> to vector<1x8x8xbf16>
    %236 = vector.shape_cast %232 : vector<8x8xbf16> to vector<1x8x8xbf16>
    %237 = tpu.concatenate %233, %234, %235, %236 in 0 : vector<1x8x8xbf16>, vector<1x8x8xbf16>, vector<1x8x8xbf16>, vector<1x8x8xbf16> -> vector<4x8x8xbf16>
    %238 = vector.extract_strided_slice %228 {offsets = [0, 32], sizes = [8, 8], strides = [1, 1]} : vector<8x96xbf16> to vector<8x8xbf16>
    %239 = vector.extract_strided_slice %228 {offsets = [0, 40], sizes = [8, 8], strides = [1, 1]} : vector<8x96xbf16> to vector<8x8xbf16>
    %240 = vector.extract_strided_slice %228 {offsets = [0, 48], sizes = [8, 8], strides = [1, 1]} : vector<8x96xbf16> to vector<8x8xbf16>
    %241 = vector.extract_strided_slice %228 {offsets = [0, 56], sizes = [8, 8], strides = [1, 1]} : vector<8x96xbf16> to vector<8x8xbf16>
    %242 = vector.shape_cast %238 : vector<8x8xbf16> to vector<1x8x8xbf16>
    %243 = vector.shape_cast %239 : vector<8x8xbf16> to vector<1x8x8xbf16>
    %244 = vector.shape_cast %240 : vector<8x8xbf16> to vector<1x8x8xbf16>
    %245 = vector.shape_cast %241 : vector<8x8xbf16> to vector<1x8x8xbf16>
    %246 = tpu.concatenate %242, %243, %244, %245 in 0 : vector<1x8x8xbf16>, vector<1x8x8xbf16>, vector<1x8x8xbf16>, vector<1x8x8xbf16> -> vector<4x8x8xbf16>
    %247 = vector.extract_strided_slice %228 {offsets = [0, 64], sizes = [8, 8], strides = [1, 1]} : vector<8x96xbf16> to vector<8x8xbf16>
    %248 = vector.extract_strided_slice %228 {offsets = [0, 72], sizes = [8, 8], strides = [1, 1]} : vector<8x96xbf16> to vector<8x8xbf16>
    %249 = vector.extract_strided_slice %228 {offsets = [0, 80], sizes = [8, 8], strides = [1, 1]} : vector<8x96xbf16> to vector<8x8xbf16>
    %250 = vector.extract_strided_slice %228 {offsets = [0, 88], sizes = [8, 8], strides = [1, 1]} : vector<8x96xbf16> to vector<8x8xbf16>
    %251 = vector.shape_cast %247 : vector<8x8xbf16> to vector<1x8x8xbf16>
    %252 = vector.shape_cast %248 : vector<8x8xbf16> to vector<1x8x8xbf16>
    %253 = vector.shape_cast %249 : vector<8x8xbf16> to vector<1x8x8xbf16>
    %254 = vector.shape_cast %250 : vector<8x8xbf16> to vector<1x8x8xbf16>
    %255 = tpu.concatenate %251, %252, %253, %254 in 0 : vector<1x8x8xbf16>, vector<1x8x8xbf16>, vector<1x8x8xbf16>, vector<1x8x8xbf16> -> vector<4x8x8xbf16>
    %cst_92 = arith.constant dense<0.000000e+00> : vector<4x8x8xf32>
    %256 = tpu.matmul %237, %246, %cst_92 {dimension_numbers = #tpu.dot_dimension_numbers<[2], [2], [1], [1], [0, 0, 0, 1, 1, 1], [0], [0]>} : vector<4x8x8xbf16>, vector<4x8x8xbf16>, vector<4x8x8xf32> -> vector<4x8x8xf32>
    %cst_93 = arith.constant dense<0xFF800000> : vector<4x8xf32>
    %257 = vector.multi_reduction <maximumf>, %256, %cst_93 [2] : vector<4x8x8xf32> to vector<4x8xf32>
    %258 = vector.shape_cast %257 : vector<4x8xf32> to vector<4x8x1xf32>
    %259 = vector.broadcast %258 : vector<4x8x1xf32> to vector<4x8x8xf32>
    %260 = arith.subf %256, %259 : vector<4x8x8xf32>
    %261 = math.exp %260 : vector<4x8x8xf32>
    %cst_94 = arith.constant dense<0.000000e+00> : vector<4x8xf32>
    %262 = vector.multi_reduction <add>, %261, %cst_94 [2] : vector<4x8x8xf32> to vector<4x8xf32>
    %263 = vector.shape_cast %262 : vector<4x8xf32> to vector<4x8x1xf32>
    %264 = vector.broadcast %263 : vector<4x8x1xf32> to vector<4x8x8xf32>
    %265 = arith.divf %261, %264 : vector<4x8x8xf32>
    %266 = arith.truncf %265 : vector<4x8x8xf32> to vector<4x8x8xbf16>
    %cst_95 = arith.constant dense<0.000000e+00> : vector<4x8x8xf32>
    %267 = tpu.matmul %266, %255, %cst_95 {dimension_numbers = #tpu.dot_dimension_numbers<[2], [1], [1], [2], [0, 0, 0, 1, 1, 2], [0], [0]>} : vector<4x8x8xbf16>, vector<4x8x8xbf16>, vector<4x8x8xf32> -> vector<4x8x8xf32>
    %268 = vector.extract_strided_slice %267 {offsets = [0, 0, 0], sizes = [1, 8, 8], strides = [1, 1, 1]} : vector<4x8x8xf32> to vector<1x8x8xf32>
    %269 = vector.shape_cast %268 : vector<1x8x8xf32> to vector<8x8xf32>
    %270 = vector.extract_strided_slice %267 {offsets = [1, 0, 0], sizes = [1, 8, 8], strides = [1, 1, 1]} : vector<4x8x8xf32> to vector<1x8x8xf32>
    %271 = vector.shape_cast %270 : vector<1x8x8xf32> to vector<8x8xf32>
    %272 = vector.extract_strided_slice %267 {offsets = [2, 0, 0], sizes = [1, 8, 8], strides = [1, 1, 1]} : vector<4x8x8xf32> to vector<1x8x8xf32>
    %273 = vector.shape_cast %272 : vector<1x8x8xf32> to vector<8x8xf32>
    %274 = vector.extract_strided_slice %267 {offsets = [3, 0, 0], sizes = [1, 8, 8], strides = [1, 1, 1]} : vector<4x8x8xf32> to vector<1x8x8xf32>
    %275 = vector.shape_cast %274 : vector<1x8x8xf32> to vector<8x8xf32>
    %276 = tpu.concatenate %269, %271, %273, %275 in 1 : vector<8x8xf32>, vector<8x8xf32>, vector<8x8xf32>, vector<8x8xf32> -> vector<8x32xf32>
    %277 = arith.truncf %276 : vector<8x32xf32> to vector<8x32xbf16>
    %cst_96 = arith.constant dense<0.000000e+00> : vector<8x32xf32>
    %278 = tpu.matmul %277, %213, %cst_96 {dimension_numbers = #tpu.dot_dimension_numbers<[1], [0], [0], [1], [0, 0, 1, 1], [], []>} : vector<8x32xbf16>, vector<32x32xbf16>, vector<8x32xf32> -> vector<8x32xf32>
    %279 = arith.addf %103, %278 : vector<8x32xf32>
    %c1_97 = arith.constant 1 : index
    %c0_98 = arith.constant 0 : index
    %c0_99 = arith.constant 0 : index
    %280 = vector.load %arg9[%c1_97, %c0_98, %c0_99] : memref<2x1x32xf32, #tpu.memory_space<vmem>>, vector<1x1x32xf32>
    %281 = vector.shape_cast %280 : vector<1x1x32xf32> to vector<1x32xf32>
    %c1_100 = arith.constant 1 : index
    %c0_101 = arith.constant 0 : index
    %c0_102 = arith.constant 0 : index
    %282 = vector.load %arg10[%c1_100, %c0_101, %c0_102] : memref<2x32x64xbf16, #tpu.memory_space<vmem>>, vector<1x32x64xbf16>
    %283 = vector.shape_cast %282 : vector<1x32x64xbf16> to vector<32x64xbf16>
    %c1_103 = arith.constant 1 : index
    %c0_104 = arith.constant 0 : index
    %c0_105 = arith.constant 0 : index
    %284 = vector.load %arg11[%c1_103, %c0_104, %c0_105] : memref<2x64x32xbf16, #tpu.memory_space<vmem>>, vector<1x64x32xbf16>
    %285 = vector.shape_cast %284 : vector<1x64x32xbf16> to vector<64x32xbf16>
    %286 = arith.mulf %279, %279 : vector<8x32xf32>
    %cst_106 = arith.constant dense<0.000000e+00> : vector<8xf32>
    %287 = vector.multi_reduction <add>, %286, %cst_106 [1] : vector<8x32xf32> to vector<8xf32>
    %288 = vector.shape_cast %287 : vector<8xf32> to vector<8x1xf32>
    %cst_107 = arith.constant 3.200000e+01 : f32
    %289 = vector.broadcast %cst_107 : f32 to vector<8x1xf32>
    %290 = arith.divf %288, %289 : vector<8x1xf32>
    %cst_108 = arith.constant 9.99999997E-7 : f32
    %291 = vector.broadcast %cst_108 : f32 to vector<8x1xf32>
    %292 = arith.addf %290, %291 : vector<8x1xf32>
    %293 = math.rsqrt %292 : vector<8x1xf32>
    %294 = vector.broadcast %293 : vector<8x1xf32> to vector<8x32xf32>
    %295 = arith.mulf %279, %294 : vector<8x32xf32>
    %296 = vector.broadcast %281 : vector<1x32xf32> to vector<8x32xf32>
    %297 = arith.mulf %295, %296 : vector<8x32xf32>
    %298 = arith.truncf %297 : vector<8x32xf32> to vector<8x32xbf16>
    %cst_109 = arith.constant dense<0.000000e+00> : vector<8x64xf32>
    %299 = tpu.matmul %298, %283, %cst_109 {dimension_numbers = #tpu.dot_dimension_numbers<[1], [0], [0], [1], [0, 0, 1, 1], [], []>} : vector<8x32xbf16>, vector<32x64xbf16>, vector<8x64xf32> -> vector<8x64xf32>
    %cst_110 = arith.constant 0.000000e+00 : f32
    %300 = vector.broadcast %cst_110 : f32 to vector<8x64xf32>
    %301 = arith.maximumf %299, %300 : vector<8x64xf32>
    %302 = arith.truncf %301 : vector<8x64xf32> to vector<8x64xbf16>
    %cst_111 = arith.constant dense<0.000000e+00> : vector<8x32xf32>
    %303 = tpu.matmul %302, %285, %cst_111 {dimension_numbers = #tpu.dot_dimension_numbers<[1], [0], [0], [1], [0, 0, 1, 1], [], []>} : vector<8x64xbf16>, vector<64x32xbf16>, vector<8x32xf32> -> vector<8x32xf32>
    %304 = arith.addf %279, %303 : vector<8x32xf32>
    %305 = arith.truncf %304 : vector<8x32xf32> to vector<8x32xbf16>
    %c1_112 = arith.constant 1 : index
    %c0_113 = arith.constant 0 : index
    %c0_114 = arith.constant 0 : index
    %306 = vector.load %arg5[%c1_112, %c0_113, %c0_114] : memref<2x32x16xbf16, #tpu.memory_space<vmem>>, vector<1x32x16xbf16>
    %307 = vector.shape_cast %306 : vector<1x32x16xbf16> to vector<32x16xbf16>
    %cst_115 = arith.constant dense<0.000000e+00> : vector<8x16xf32>
    %308 = tpu.matmul %305, %307, %cst_115 {dimension_numbers = #tpu.dot_dimension_numbers<[1], [0], [0], [1], [0, 0, 1, 1], [], []>} : vector<8x32xbf16>, vector<32x16xbf16>, vector<8x16xf32> -> vector<8x16xf32>
    %309 = arith.addf %207, %308 : vector<8x16xf32>
    %c1_116 = arith.constant 1 : index
    %c0_117 = arith.constant 0 : index
    %c0_118 = arith.constant 0 : index
    %310 = vector.load %arg12[%c1_116, %c0_117, %c0_118] : memref<2x1x16xf32, #tpu.memory_space<vmem>>, vector<1x1x16xf32>
    %311 = vector.shape_cast %310 : vector<1x1x16xf32> to vector<1x16xf32>
    %c1_119 = arith.constant 1 : index
    %c0_120 = arith.constant 0 : index
    %c0_121 = arith.constant 0 : index
    %312 = vector.load %arg13[%c1_119, %c0_120, %c0_121] : memref<2x16x48xbf16, #tpu.memory_space<vmem>>, vector<1x16x48xbf16>
    %313 = vector.shape_cast %312 : vector<1x16x48xbf16> to vector<16x48xbf16>
    %c1_122 = arith.constant 1 : index
    %c0_123 = arith.constant 0 : index
    %c0_124 = arith.constant 0 : index
    %314 = vector.load %arg14[%c1_122, %c0_123, %c0_124] : memref<2x16x16xbf16, #tpu.memory_space<vmem>>, vector<1x16x16xbf16>
    %315 = vector.shape_cast %314 : vector<1x16x16xbf16> to vector<16x16xbf16>
    %316 = arith.mulf %309, %309 : vector<8x16xf32>
    %cst_125 = arith.constant dense<0.000000e+00> : vector<8xf32>
    %317 = vector.multi_reduction <add>, %316, %cst_125 [1] : vector<8x16xf32> to vector<8xf32>
    %318 = vector.shape_cast %317 : vector<8xf32> to vector<8x1xf32>
    %cst_126 = arith.constant 1.600000e+01 : f32
    %319 = vector.broadcast %cst_126 : f32 to vector<8x1xf32>
    %320 = arith.divf %318, %319 : vector<8x1xf32>
    %cst_127 = arith.constant 9.99999997E-7 : f32
    %321 = vector.broadcast %cst_127 : f32 to vector<8x1xf32>
    %322 = arith.addf %320, %321 : vector<8x1xf32>
    %323 = math.rsqrt %322 : vector<8x1xf32>
    %324 = vector.broadcast %323 : vector<8x1xf32> to vector<8x16xf32>
    %325 = arith.mulf %309, %324 : vector<8x16xf32>
    %326 = vector.broadcast %311 : vector<1x16xf32> to vector<8x16xf32>
    %327 = arith.mulf %325, %326 : vector<8x16xf32>
    %328 = arith.truncf %327 : vector<8x16xf32> to vector<8x16xbf16>
    %cst_128 = arith.constant dense<0.000000e+00> : vector<8x48xf32>
    %329 = tpu.matmul %328, %313, %cst_128 {dimension_numbers = #tpu.dot_dimension_numbers<[1], [0], [0], [1], [0, 0, 1, 1], [], []>} : vector<8x16xbf16>, vector<16x48xbf16>, vector<8x48xf32> -> vector<8x48xf32>
    %330 = arith.truncf %329 : vector<8x48xf32> to vector<8x48xbf16>
    %331 = vector.extract_strided_slice %330 {offsets = [0, 0], sizes = [8, 4], strides = [1, 1]} : vector<8x48xbf16> to vector<8x4xbf16>
    %332 = vector.extract_strided_slice %330 {offsets = [0, 4], sizes = [8, 4], strides = [1, 1]} : vector<8x48xbf16> to vector<8x4xbf16>
    %333 = vector.extract_strided_slice %330 {offsets = [0, 8], sizes = [8, 4], strides = [1, 1]} : vector<8x48xbf16> to vector<8x4xbf16>
    %334 = vector.extract_strided_slice %330 {offsets = [0, 12], sizes = [8, 4], strides = [1, 1]} : vector<8x48xbf16> to vector<8x4xbf16>
    %335 = vector.shape_cast %331 : vector<8x4xbf16> to vector<1x8x4xbf16>
    %336 = vector.shape_cast %332 : vector<8x4xbf16> to vector<1x8x4xbf16>
    %337 = vector.shape_cast %333 : vector<8x4xbf16> to vector<1x8x4xbf16>
    %338 = vector.shape_cast %334 : vector<8x4xbf16> to vector<1x8x4xbf16>
    %339 = tpu.concatenate %335, %336, %337, %338 in 0 : vector<1x8x4xbf16>, vector<1x8x4xbf16>, vector<1x8x4xbf16>, vector<1x8x4xbf16> -> vector<4x8x4xbf16>
    %340 = vector.extract_strided_slice %330 {offsets = [0, 16], sizes = [8, 4], strides = [1, 1]} : vector<8x48xbf16> to vector<8x4xbf16>
    %341 = vector.extract_strided_slice %330 {offsets = [0, 20], sizes = [8, 4], strides = [1, 1]} : vector<8x48xbf16> to vector<8x4xbf16>
    %342 = vector.extract_strided_slice %330 {offsets = [0, 24], sizes = [8, 4], strides = [1, 1]} : vector<8x48xbf16> to vector<8x4xbf16>
    %343 = vector.extract_strided_slice %330 {offsets = [0, 28], sizes = [8, 4], strides = [1, 1]} : vector<8x48xbf16> to vector<8x4xbf16>
    %344 = vector.shape_cast %340 : vector<8x4xbf16> to vector<1x8x4xbf16>
    %345 = vector.shape_cast %341 : vector<8x4xbf16> to vector<1x8x4xbf16>
    %346 = vector.shape_cast %342 : vector<8x4xbf16> to vector<1x8x4xbf16>
    %347 = vector.shape_cast %343 : vector<8x4xbf16> to vector<1x8x4xbf16>
    %348 = tpu.concatenate %344, %345, %346, %347 in 0 : vector<1x8x4xbf16>, vector<1x8x4xbf16>, vector<1x8x4xbf16>, vector<1x8x4xbf16> -> vector<4x8x4xbf16>
    %349 = vector.extract_strided_slice %330 {offsets = [0, 32], sizes = [8, 4], strides = [1, 1]} : vector<8x48xbf16> to vector<8x4xbf16>
    %350 = vector.extract_strided_slice %330 {offsets = [0, 36], sizes = [8, 4], strides = [1, 1]} : vector<8x48xbf16> to vector<8x4xbf16>
    %351 = vector.extract_strided_slice %330 {offsets = [0, 40], sizes = [8, 4], strides = [1, 1]} : vector<8x48xbf16> to vector<8x4xbf16>
    %352 = vector.extract_strided_slice %330 {offsets = [0, 44], sizes = [8, 4], strides = [1, 1]} : vector<8x48xbf16> to vector<8x4xbf16>
    %353 = vector.shape_cast %349 : vector<8x4xbf16> to vector<1x8x4xbf16>
    %354 = vector.shape_cast %350 : vector<8x4xbf16> to vector<1x8x4xbf16>
    %355 = vector.shape_cast %351 : vector<8x4xbf16> to vector<1x8x4xbf16>
    %356 = vector.shape_cast %352 : vector<8x4xbf16> to vector<1x8x4xbf16>
    %357 = tpu.concatenate %353, %354, %355, %356 in 0 : vector<1x8x4xbf16>, vector<1x8x4xbf16>, vector<1x8x4xbf16>, vector<1x8x4xbf16> -> vector<4x8x4xbf16>
    %cst_129 = arith.constant dense<0.000000e+00> : vector<4x8x8xf32>
    %358 = tpu.matmul %339, %348, %cst_129 {dimension_numbers = #tpu.dot_dimension_numbers<[2], [2], [1], [1], [0, 0, 0, 1, 1, 1], [0], [0]>} : vector<4x8x4xbf16>, vector<4x8x4xbf16>, vector<4x8x8xf32> -> vector<4x8x8xf32>
    %cst_130 = arith.constant dense<0xFF800000> : vector<4x8xf32>
    %359 = vector.multi_reduction <maximumf>, %358, %cst_130 [2] : vector<4x8x8xf32> to vector<4x8xf32>
    %360 = vector.shape_cast %359 : vector<4x8xf32> to vector<4x8x1xf32>
    %361 = vector.broadcast %360 : vector<4x8x1xf32> to vector<4x8x8xf32>
    %362 = arith.subf %358, %361 : vector<4x8x8xf32>
    %363 = math.exp %362 : vector<4x8x8xf32>
    %cst_131 = arith.constant dense<0.000000e+00> : vector<4x8xf32>
    %364 = vector.multi_reduction <add>, %363, %cst_131 [2] : vector<4x8x8xf32> to vector<4x8xf32>
    %365 = vector.shape_cast %364 : vector<4x8xf32> to vector<4x8x1xf32>
    %366 = vector.broadcast %365 : vector<4x8x1xf32> to vector<4x8x8xf32>
    %367 = arith.divf %363, %366 : vector<4x8x8xf32>
    %368 = arith.truncf %367 : vector<4x8x8xf32> to vector<4x8x8xbf16>
    %cst_132 = arith.constant dense<0.000000e+00> : vector<4x8x4xf32>
    %369 = tpu.matmul %368, %357, %cst_132 {dimension_numbers = #tpu.dot_dimension_numbers<[2], [1], [1], [2], [0, 0, 0, 1, 1, 2], [0], [0]>} : vector<4x8x8xbf16>, vector<4x8x4xbf16>, vector<4x8x4xf32> -> vector<4x8x4xf32>
    %370 = vector.extract_strided_slice %369 {offsets = [0, 0, 0], sizes = [1, 8, 4], strides = [1, 1, 1]} : vector<4x8x4xf32> to vector<1x8x4xf32>
    %371 = vector.shape_cast %370 : vector<1x8x4xf32> to vector<8x4xf32>
    %372 = vector.extract_strided_slice %369 {offsets = [1, 0, 0], sizes = [1, 8, 4], strides = [1, 1, 1]} : vector<4x8x4xf32> to vector<1x8x4xf32>
    %373 = vector.shape_cast %372 : vector<1x8x4xf32> to vector<8x4xf32>
    %374 = vector.extract_strided_slice %369 {offsets = [2, 0, 0], sizes = [1, 8, 4], strides = [1, 1, 1]} : vector<4x8x4xf32> to vector<1x8x4xf32>
    %375 = vector.shape_cast %374 : vector<1x8x4xf32> to vector<8x4xf32>
    %376 = vector.extract_strided_slice %369 {offsets = [3, 0, 0], sizes = [1, 8, 4], strides = [1, 1, 1]} : vector<4x8x4xf32> to vector<1x8x4xf32>
    %377 = vector.shape_cast %376 : vector<1x8x4xf32> to vector<8x4xf32>
    %378 = tpu.concatenate %371, %373, %375, %377 in 1 : vector<8x4xf32>, vector<8x4xf32>, vector<8x4xf32>, vector<8x4xf32> -> vector<8x16xf32>
    %379 = arith.truncf %378 : vector<8x16xf32> to vector<8x16xbf16>
    %cst_133 = arith.constant dense<0.000000e+00> : vector<8x16xf32>
    %380 = tpu.matmul %379, %315, %cst_133 {dimension_numbers = #tpu.dot_dimension_numbers<[1], [0], [0], [1], [0, 0, 1, 1], [], []>} : vector<8x16xbf16>, vector<16x16xbf16>, vector<8x16xf32> -> vector<8x16xf32>
    %381 = arith.addf %309, %380 : vector<8x16xf32>
    %c1_134 = arith.constant 1 : index
    %c0_135 = arith.constant 0 : index
    %c0_136 = arith.constant 0 : index
    %382 = vector.load %arg15[%c1_134, %c0_135, %c0_136] : memref<2x1x16xf32, #tpu.memory_space<vmem>>, vector<1x1x16xf32>
    %383 = vector.shape_cast %382 : vector<1x1x16xf32> to vector<1x16xf32>
    %c1_137 = arith.constant 1 : index
    %c0_138 = arith.constant 0 : index
    %c0_139 = arith.constant 0 : index
    %384 = vector.load %arg16[%c1_137, %c0_138, %c0_139] : memref<2x16x32xbf16, #tpu.memory_space<vmem>>, vector<1x16x32xbf16>
    %385 = vector.shape_cast %384 : vector<1x16x32xbf16> to vector<16x32xbf16>
    %c1_140 = arith.constant 1 : index
    %c0_141 = arith.constant 0 : index
    %c0_142 = arith.constant 0 : index
    %386 = vector.load %arg17[%c1_140, %c0_141, %c0_142] : memref<2x32x16xbf16, #tpu.memory_space<vmem>>, vector<1x32x16xbf16>
    %387 = vector.shape_cast %386 : vector<1x32x16xbf16> to vector<32x16xbf16>
    %388 = arith.mulf %381, %381 : vector<8x16xf32>
    %cst_143 = arith.constant dense<0.000000e+00> : vector<8xf32>
    %389 = vector.multi_reduction <add>, %388, %cst_143 [1] : vector<8x16xf32> to vector<8xf32>
    %390 = vector.shape_cast %389 : vector<8xf32> to vector<8x1xf32>
    %cst_144 = arith.constant 1.600000e+01 : f32
    %391 = vector.broadcast %cst_144 : f32 to vector<8x1xf32>
    %392 = arith.divf %390, %391 : vector<8x1xf32>
    %cst_145 = arith.constant 9.99999997E-7 : f32
    %393 = vector.broadcast %cst_145 : f32 to vector<8x1xf32>
    %394 = arith.addf %392, %393 : vector<8x1xf32>
    %395 = math.rsqrt %394 : vector<8x1xf32>
    %396 = vector.broadcast %395 : vector<8x1xf32> to vector<8x16xf32>
    %397 = arith.mulf %381, %396 : vector<8x16xf32>
    %398 = vector.broadcast %383 : vector<1x16xf32> to vector<8x16xf32>
    %399 = arith.mulf %397, %398 : vector<8x16xf32>
    %400 = arith.truncf %399 : vector<8x16xf32> to vector<8x16xbf16>
    %cst_146 = arith.constant dense<0.000000e+00> : vector<8x32xf32>
    %401 = tpu.matmul %400, %385, %cst_146 {dimension_numbers = #tpu.dot_dimension_numbers<[1], [0], [0], [1], [0, 0, 1, 1], [], []>} : vector<8x16xbf16>, vector<16x32xbf16>, vector<8x32xf32> -> vector<8x32xf32>
    %cst_147 = arith.constant 0.000000e+00 : f32
    %402 = vector.broadcast %cst_147 : f32 to vector<8x32xf32>
    %403 = arith.maximumf %401, %402 : vector<8x32xf32>
    %404 = arith.truncf %403 : vector<8x32xf32> to vector<8x32xbf16>
    %cst_148 = arith.constant dense<0.000000e+00> : vector<8x16xf32>
    %405 = tpu.matmul %404, %387, %cst_148 {dimension_numbers = #tpu.dot_dimension_numbers<[1], [0], [0], [1], [0, 0, 1, 1], [], []>} : vector<8x32xbf16>, vector<32x16xbf16>, vector<8x16xf32> -> vector<8x16xf32>
    %406 = arith.addf %381, %405 : vector<8x16xf32>
    %c0_149 = arith.constant 0 : index
    %c0_150 = arith.constant 0 : index
    %407 = vector.load %arg18[%c0_149, %c0_150] : memref<1x32xf32, #tpu.memory_space<vmem>>, vector<1x32xf32>
    %408 = arith.mulf %304, %304 : vector<8x32xf32>
    %cst_151 = arith.constant dense<0.000000e+00> : vector<8xf32>
    %409 = vector.multi_reduction <add>, %408, %cst_151 [1] : vector<8x32xf32> to vector<8xf32>
    %410 = vector.shape_cast %409 : vector<8xf32> to vector<8x1xf32>
    %cst_152 = arith.constant 3.200000e+01 : f32
    %411 = vector.broadcast %cst_152 : f32 to vector<8x1xf32>
    %412 = arith.divf %410, %411 : vector<8x1xf32>
    %cst_153 = arith.constant 9.99999997E-7 : f32
    %413 = vector.broadcast %cst_153 : f32 to vector<8x1xf32>
    %414 = arith.addf %412, %413 : vector<8x1xf32>
    %415 = math.rsqrt %414 : vector<8x1xf32>
    %416 = vector.broadcast %415 : vector<8x1xf32> to vector<8x32xf32>
    %417 = arith.mulf %304, %416 : vector<8x32xf32>
    %418 = vector.broadcast %407 : vector<1x32xf32> to vector<8x32xf32>
    %419 = arith.mulf %417, %418 : vector<8x32xf32>
    %c0_154 = arith.constant 0 : index
    %c0_155 = arith.constant 0 : index
    %c0_156 = arith.constant 0 : index
    %420 = vector.load %arg20[%c0_154, %c0_155, %c0_156] : memref<1x8x32xf32, #tpu.memory_space<vmem>>, vector<1x8x32xf32>
    %421 = vector.shape_cast %420 : vector<1x8x32xf32> to vector<8x32xf32>
    %422 = vector.shape_cast %419 : vector<8x32xf32> to vector<1x8x32xf32>
    tpu.vector_store %arg20[%c0_154, %c0_155, %c0_156], %422 {strides = array<i32>} : memref<1x8x32xf32, #tpu.memory_space<vmem>>, vector<1x8x32xf32>,
    %c0_157 = arith.constant 0 : index
    %c0_158 = arith.constant 0 : index
    %423 = vector.load %arg19[%c0_157, %c0_158] : memref<1x16xf32, #tpu.memory_space<vmem>>, vector<1x16xf32>
    %424 = arith.mulf %406, %406 : vector<8x16xf32>
    %cst_159 = arith.constant dense<0.000000e+00> : vector<8xf32>
    %425 = vector.multi_reduction <add>, %424, %cst_159 [1] : vector<8x16xf32> to vector<8xf32>
    %426 = vector.shape_cast %425 : vector<8xf32> to vector<8x1xf32>
    %cst_160 = arith.constant 1.600000e+01 : f32
    %427 = vector.broadcast %cst_160 : f32 to vector<8x1xf32>
    %428 = arith.divf %426, %427 : vector<8x1xf32>
    %cst_161 = arith.constant 9.99999997E-7 : f32
    %429 = vector.broadcast %cst_161 : f32 to vector<8x1xf32>
    %430 = arith.addf %428, %429 : vector<8x1xf32>
    %431 = math.rsqrt %430 : vector<8x1xf32>
    %432 = vector.broadcast %431 : vector<8x1xf32> to vector<8x16xf32>
    %433 = arith.mulf %406, %432 : vector<8x16xf32>
    %434 = vector.broadcast %423 : vector<1x16xf32> to vector<8x16xf32>
    %435 = arith.mulf %433, %434 : vector<8x16xf32>
    %c0_162 = arith.constant 0 : index
    %c0_163 = arith.constant 0 : index
    %c0_164 = arith.constant 0 : index
    %436 = vector.load %arg21[%c0_162, %c0_163, %c0_164] : memref<1x8x16xf32, #tpu.memory_space<vmem>>, vector<1x8x16xf32>
    %437 = vector.shape_cast %436 : vector<1x8x16xf32> to vector<8x16xf32>
    %438 = vector.shape_cast %435 : vector<8x16xf32> to vector<1x8x16xf32>
    tpu.vector_store %arg21[%c0_162, %c0_163, %c0_164], %438 {strides = array<i32>} : memref<1x8x16xf32, #tpu.memory_space<vmem>>, vector<1x8x16xf32>,
    return
  }
  func.func @transform_0(%arg0: i32) -> (i32, i32, i32) {
    %c0_i32 = arith.constant 0 : i32
    %c0_i32_0 = arith.constant 0 : i32
    %c0_i32_1 = arith.constant 0 : i32
    return %arg0, %c0_i32, %c0_i32_0 : i32, i32, i32
  }
  func.func @transform_1(%arg0: i32) -> (i32, i32, i32) {
    %c0_i32 = arith.constant 0 : i32
    %c0_i32_0 = arith.constant 0 : i32
    %c0_i32_1 = arith.constant 0 : i32
    %c0_i32_2 = arith.constant 0 : i32
    return %c0_i32, %c0_i32_0, %c0_i32_1 : i32, i32, i32
  }
  func.func @transform_2(%arg0: i32) -> (i32, i32, i32) {
    %c0_i32 = arith.constant 0 : i32
    %c0_i32_0 = arith.constant 0 : i32
    %c0_i32_1 = arith.constant 0 : i32
    %c0_i32_2 = arith.constant 0 : i32
    return %c0_i32, %c0_i32_0, %c0_i32_1 : i32, i32, i32
  }
  func.func @transform_3(%arg0: i32) -> (i32, i32) {
    %c0_i32 = arith.constant 0 : i32
    %c0_i32_0 = arith.constant 0 : i32
    %c0_i32_1 = arith.constant 0 : i32
    return %c0_i32, %c0_i32_0 : i32, i32
  }
  func.func @transform_4(%arg0: i32) -> (i32, i32, i32) {
    %c0_i32 = arith.constant 0 : i32
    %c0_i32_0 = arith.constant 0 : i32
    %c0_i32_1 = arith.constant 0 : i32
    %c0_i32_2 = arith.constant 0 : i32
    return %c0_i32, %c0_i32_0, %c0_i32_1 : i32, i32, i32
  }
  func.func @transform_5(%arg0: i32) -> (i32, i32, i32) {
    %c0_i32 = arith.constant 0 : i32
    %c0_i32_0 = arith.constant 0 : i32
    %c0_i32_1 = arith.constant 0 : i32
    %c0_i32_2 = arith.constant 0 : i32
    return %c0_i32, %c0_i32_0, %c0_i32_1 : i32, i32, i32
  }
  func.func @transform_6(%arg0: i32) -> (i32, i32, i32) {
    %c0_i32 = arith.constant 0 : i32
    %c0_i32_0 = arith.constant 0 : i32
    %c0_i32_1 = arith.constant 0 : i32
    %c0_i32_2 = arith.constant 0 : i32
    return %c0_i32, %c0_i32_0, %c0_i32_1 : i32, i32, i32
  }
  func.func @transform_7(%arg0: i32) -> (i32, i32, i32) {
    %c0_i32 = arith.constant 0 : i32
    %c0_i32_0 = arith.constant 0 : i32
    %c0_i32_1 = arith.constant 0 : i32
    %c0_i32_2 = arith.constant 0 : i32
    return %c0_i32, %c0_i32_0, %c0_i32_1 : i32, i32, i32
  }
  func.func @transform_8(%arg0: i32) -> (i32, i32, i32) {
    %c0_i32 = arith.constant 0 : i32
    %c0_i32_0 = arith.constant 0 : i32
    %c0_i32_1 = arith.constant 0 : i32
    %c0_i32_2 = arith.constant 0 : i32
    return %c0_i32, %c0_i32_0, %c0_i32_1 : i32, i32, i32
  }
  func.func @transform_9(%arg0: i32) -> (i32, i32, i32) {
    %c0_i32 = arith.constant 0 : i32
    %c0_i32_0 = arith.constant 0 : i32
    %c0_i32_1 = arith.constant 0 : i32
    %c0_i32_2 = arith.constant 0 : i32
    return %c0_i32, %c0_i32_0, %c0_i32_1 : i32, i32, i32
  }
  func.func @transform_10(%arg0: i32) -> (i32, i32, i32) {
    %c0_i32 = arith.constant 0 : i32
    %c0_i32_0 = arith.constant 0 : i32
    %c0_i32_1 = arith.constant 0 : i32
    %c0_i32_2 = arith.constant 0 : i32
    return %c0_i32, %c0_i32_0, %c0_i32_1 : i32, i32, i32
  }
  func.func @transform_11(%arg0: i32) -> (i32, i32, i32) {
    %c0_i32 = arith.constant 0 : i32
    %c0_i32_0 = arith.constant 0 : i32
    %c0_i32_1 = arith.constant 0 : i32
    %c0_i32_2 = arith.constant 0 : i32
    return %c0_i32, %c0_i32_0, %c0_i32_1 : i32, i32, i32
  }
  func.func @transform_12(%arg0: i32) -> (i32, i32, i32) {
    %c0_i32 = arith.constant 0 : i32
    %c0_i32_0 = arith.constant 0 : i32
    %c0_i32_1 = arith.constant 0 : i32
    %c0_i32_2 = arith.constant 0 : i32
    return %c0_i32, %c0_i32_0, %c0_i32_1 : i32, i32, i32
  }
  func.func @transform_13(%arg0: i32) -> (i32, i32, i32) {
    %c0_i32 = arith.constant 0 : i32
    %c0_i32_0 = arith.constant 0 : i32
    %c0_i32_1 = arith.constant 0 : i32
    %c0_i32_2 = arith.constant 0 : i32
    return %c0_i32, %c0_i32_0, %c0_i32_1 : i32, i32, i32
  }
  func.func @transform_14(%arg0: i32) -> (i32, i32, i32) {
    %c0_i32 = arith.constant 0 : i32
    %c0_i32_0 = arith.constant 0 : i32
    %c0_i32_1 = arith.constant 0 : i32
    %c0_i32_2 = arith.constant 0 : i32
    return %c0_i32, %c0_i32_0, %c0_i32_1 : i32, i32, i32
  }
  func.func @transform_15(%arg0: i32) -> (i32, i32, i32) {
    %c0_i32 = arith.constant 0 : i32
    %c0_i32_0 = arith.constant 0 : i32
    %c0_i32_1 = arith.constant 0 : i32
    %c0_i32_2 = arith.constant 0 : i32
    return %c0_i32, %c0_i32_0, %c0_i32_1 : i32, i32, i32
  }
  func.func @transform_16(%arg0: i32) -> (i32, i32, i32) {
    %c0_i32 = arith.constant 0 : i32
    %c0_i32_0 = arith.constant 0 : i32
    %c0_i32_1 = arith.constant 0 : i32
    %c0_i32_2 = arith.constant 0 : i32
    return %c0_i32, %c0_i32_0, %c0_i32_1 : i32, i32, i32
  }
  func.func @transform_17(%arg0: i32) -> (i32, i32) {
    %c0_i32 = arith.constant 0 : i32
    %c0_i32_0 = arith.constant 0 : i32
    %c0_i32_1 = arith.constant 0 : i32
    return %c0_i32, %c0_i32_0 : i32, i32
  }
  func.func @transform_18(%arg0: i32) -> (i32, i32) {
    %c0_i32 = arith.constant 0 : i32
    %c0_i32_0 = arith.constant 0 : i32
    %c0_i32_1 = arith.constant 0 : i32
    return %c0_i32, %c0_i32_0 : i32, i32
  }
  func.func @transform_19(%arg0: i32) -> (i32, i32, i32) {
    %c0_i32 = arith.constant 0 : i32
    %c0_i32_0 = arith.constant 0 : i32
    %c0_i32_1 = arith.constant 0 : i32
    return %arg0, %c0_i32, %c0_i32_0 : i32, i32, i32
  }
  func.func @transform_20(%arg0: i32) -> (i32, i32, i32) {
    %c0_i32 = arith.constant 0 : i32
    %c0_i32_0 = arith.constant 0 : i32
    %c0_i32_1 = arith.constant 0 : i32
    return %arg0, %c0_i32, %c0_i32_0 : i32, i32, i32
  }
}

</mosaic_0001>

<bundles_post_ra>
// kernel: side_stage_forward.1
= control target key start
LH: loop header
LB: loop body
LE: loop exit
PB: predicated region body
PF: predicated region fallthrough
CT: control target
= control target key end

     0   :  { %s4121_s0 = inlined_call_operand.vmem [shape: f32[2,8,32], index: 0, kind: input, shape index: {}]   ;;  %s4122_s1 = inlined_call_operand.vmem [shape: f32[4,8,8], index: 1, kind: input, shape index: {}]   ;;  %s4123_s2 = inlined_call_operand.vmem [shape: f32[4,8,8], index: 2, kind: input, shape index: {}]   ;;  %s4124_s3 = inlined_call_operand.vmem [shape: bf16[32,16], index: 3, kind: input, shape index: {}]   ;;  %s4125_s4 = inlined_call_operand.vmem [shape: bf16[2,32,16], index: 4, kind: input, shape index: {}]   ;;  %s4126_s5 = inlined_call_operand.vmem [shape: f32[2,1,32], index: 5, kind: input, shape index: {}]   ;;  %s4127_s6 = inlined_call_operand.vmem [shape: bf16[2,32,96], index: 6, kind: input, shape index: {}]   ;;  %s4128_s7 = inlined_call_operand.vmem [shape: bf16[2,32,32], index: 7, kind: input, shape index: {}]   ;;  %s4129_s8 = inlined_call_operand.vmem [shape: f32[2,1,32], index: 8, kind: input, shape index: {}]   ;;  %s4130_s9 = inlined_call_operand.vmem [shape: bf16[2,32,64], index: 9, kind: input, shape index: {}]   ;;  %s4131_s10 = inlined_call_operand.vmem [shape: bf16[2,64,32], index: 10, kind: input, shape index: {}]   ;;  %s4132_s11 = inlined_call_operand.vmem [shape: f32[2,1,16], index: 11, kind: input, shape index: {}]   ;;  %s4133_s12 = inlined_call_operand.vmem [shape: bf16[2,16,48], index: 12, kind: input, shape index: {}]   ;;  %s4134_s13 = inlined_call_operand.vmem [shape: bf16[2,16,16], index: 13, kind: input, shape index: {}]   ;;  %s4135_s14 = inlined_call_operand.vmem [shape: f32[2,1,16], index: 14, kind: input, shape index: {}]   ;;  %s4136_s15 = inlined_call_operand.vmem [shape: bf16[2,16,32], index: 15, kind: input, shape index: {}]   ;;  %s4137_s16 = inlined_call_operand.vmem [shape: bf16[2,32,16], index: 16, kind: input, shape index: {}]   ;;  %s4138_s17 = inlined_call_operand.vmem [shape: f32[1,32], index: 17, kind: input, shape index: {}]   ;;  %s4139_s18 = inlined_call_operand.vmem [shape: f32[1,16], index: 18, kind: input, shape index: {}]   ;;  %s4140_s19 = inlined_call_operand.hbm [shape: f32[2,8,32], index: 19, kind: output, shape index: {0}]   ;;  %s4141_s20 = inlined_call_operand.hbm [shape: f32[2,8,16], index: 20, kind: output, shape index: {1}]  }
   0x1   :  { %4171 = sst [smem:[#allocation13_spill]] %s4121_s0 }
   0x2   :  { %4172 = sst [smem:[#allocation14_spill]] %s4122_s1 }
   0x3   :  { %4173 = sst [smem:[#allocation15_spill]] %s4123_s2 }
   0x4   :  { %4174 = sst [smem:[#allocation16_spill]] %s4124_s3 }
   0x5   :  { %4175 = sst [smem:[#allocation17_spill]] %s4125_s4 }
   0x6   :  { %4176 = sst [smem:[#allocation18_spill]] %s4126_s5 }
   0x7   :  { %4177 = sst [smem:[#allocation19_spill]] %s4127_s6 }
   0x8   :  { %4178 = sst [smem:[#allocation20_spill]] %s4128_s7 }
   0x9   :  { %4179 = sst [smem:[#allocation21_spill]] %s4129_s8 }
   0xa   :  { %4180 = sst [smem:[#allocation22_spill]] %s4130_s9 }
   0xb   :  { %4181 = sst [smem:[#allocation23_spill]] %s4131_s10 }
   0xc   :  { %4182 = sst [smem:[#allocation24_spill]] %s4132_s11 }
   0xd   :  { %26 = vsyncpa [#allocation3], 0 }
   0xe   :  { %28 = vsyncpa [#allocation3 + $0x1], 0 }
   0xf   :  { %29 = vsyncpa [#allocation5], 0 }
  0x10   :  { %31 = vsyncpa [#allocation5 + $0x1], 0  ;;  %s3503_s1 = smov 0   ;;  %s3505_s22 = smov 0  }
  0x11   :  { %s3507_s23 = smov 0   ;;  %s3509_s24 = smov 0  }
  0x12 LB: > { %4183 = sst [smem:[#allocation8_spill]] %s3370_s1  ;;  %s3524_s2 = sadd.s32 4294967295, %s3382_s24   ;;  %s3382_s24 = sphi %s3509_s24, %s4218_s24   ;;  %s3378_s23 = sphi %s3507_s23, %s4220_s23   ;;  %s3374_s22 = sphi %s3505_s22, %s4222_s22   ;;  %s3370_s1 = sphi %s3503_s1, %s4221_s1  }
  0x13   : > { %4184 = sst [smem:[#allocation9_spill]] %s3378_s23  ;;  %s2850_s25 = sadd.s32 4294967294, %s3382_s24  }
  0x14   : > { %s3528_s3 = sadd.s32 1, %s3382_s24   ;;  %s448_s26 = sadd.s32 1, %s3378_s23 }
  0x15   : > { %4185 = sst [smem:[#allocation10_spill]] %s3528_s3  ;;  %s445_s27 = ssub.s32 %s3382_s24, %s3528_s3 }
  0x16   : > { %p458_p0 = scmp.ne.s32.totalorder %s3378_s23, %s3374_s22  ;;  %p446_p1 = scmp.eq.s32.totalorder %s445_s27, 0 }
  0x17   : > { %p459_p2 = scmp.eq.s32.totalorder %s3524_s2, 1  ;;  %p464_p3 = scmp.ne.s32.totalorder %s3374_s22, %s3370_s1 }
  0x18   : > { %p465_p4 = scmp.eq.s32.totalorder %s2850_s25, 1  ;;  %p2853_p7 = scmp.ge.s32.totalorder %s3382_s24, 1 }
  0x19   : > { %s3539_s28 = scalar_select %p446_p1, %s3378_s23, %s448_s26  }
  0x1a   : > { %p3541_p5 = por %p459_p2, %p458_p0  ;;  %p3545_p6 = por %p465_p4, %p464_p3 }
  0x1b   : > { %4186 = sst [smem:[#allocation11_spill]] %s3539_s28  ;;  %p570_p8 = scmp.lt.s32.totalorder %s3382_s24, 3 }
  0x1c   : > { %s4188_s29 = scalar_select %p3545_p6, 1, 0 }
  0x1d   : > { %p571_p9 = pnand %p2853_p7, %p570_p8 }
  0x1e   : > { %4189 = sst [smem:[#allocation12_spill]] %s4188_s29  ;;  %p632_p10 = scmp.lt.s32.totalorder (!%p571_p9), %s3524_s2, 1 }
  0x1f   : > { %574 = sbr.rel (%p571_p9) target bundleno = 6674 (0x1a12), region = 96  ;;  %s4190_s26 = sld [smem:[#allocation13_spill]] (!%p571_p9) }
  0x20   : > { %s4191_s6 = sld [smem:[#allocation19_spill]] (!%p571_p9)  ;;  %s4158_s28 = smov (!%p571_p9), 24  }
  0x21   : > { %s4192_s5 = sld [smem:[#allocation18_spill]] (!%p571_p9)  ;;  %s4203_s3 = smov (!%p571_p9), 112  }
  0x22   : > { %s4193_s25 = sld [smem:[#allocation14_spill]] (!%p571_p9)  ;;  %s4167_s21 = smov (!%p571_p9), 12  }
  0x23   : > { %s4194_s7 = sld [smem:[#allocation20_spill]] (!%p571_p9)  ;;  %s4208_s1 = smov (!%p571_p9), 64  }
  0x24   : > { %s633_s30 = scalar_select %p632_p10, %s3524_s2, 1  ;;  %vm657_vm0 = vcmask 261120   ;;  %v3384_v3 = vmov 32.0   ;;  %vm726_vm5 = vcmask 64512   ;;  %vm920_vm12 = vcmask 1043456  }
  0x25   : > { %3200 = vrcp.f32 %v3384_v3  ;;  %s4195_s9 = sld [smem:[#allocation22_spill]] }
  0x26   : > { %s2856_s0 = sshll.u32 %s633_s30, 3  ;;  %v3099_v7 = vld [vmem:[%s4191_s6 + $0x8] sm:$0xff]  ;;  %v3098_v9 = vld [vmem:[%s4191_s6] sm:$0xff]  ;;  %s4146_s30 = smov 104  }
  0x27   : > { %s635_s27 = scalar_lea.vmem %s4190_s26, %s2856_s0  ;;  %707 = vmatpush.bf16.msra.mxu0 %v3099_v7  ;;  %v3190_v21 = vld [vmem:[%s4192_s5] ss:$0 sm:$0xff]  ;;  %s4149_s26 = smov 112  }
  0x28   : > { %v3556_v0 = vld [vmem:[%s635_s27] sm:$0xff]  ;;  %s4151_s27 = smov 120   ;;  %s4147_s0 = smov 96   ;;  %v653_v48 = vld [vmem:[%s4193_s25 + $0x8] sm:$0xff]  ;;  %v654_v52 = vld [vmem:[%s4193_s25 + $0x10] sm:$0xff] }
  0x29   : > { %v656_v1 = vmul.f32 %v3556_v0, %v3556_v0  ;;  %v652_v58 = vld [vmem:[%s4193_s25] sm:$0xff]  ;;  %v655_v63 = vld [vmem:[%s4193_s25 + $0x18] sm:$0xff]  ;;  %s4196_s10 = sld [smem:[#allocation23_spill]] }
  0x2a   : > { %s4197_s8 = sld [smem:[#allocation21_spill]] }
  0x2b   : > { %v658_v2 = vsel %vm657_vm0, %v656_v1, 0.0  ;;  %v3201_v4 = vpop.eup %3200  ;;  %708 = vmatpush.bf16.msra.mxu0 %v3098_v9  ;;  %s4199_s23 = sld [smem:[#allocation17_spill]] }
  0x2c   : > { %659 = vadd.xlane.f32.xlu0 %v658_v2  ;;  %v662_v5 = vmul.f32 32.0, %v3201_v4  ;;  %vm666_vm1 = vweird.f32 %v3201_v4  ;;  %s4201_s11 = sld [smem:[#allocation24_spill]] }
  0x2d   : > { %s4204_s29 = sld [smem:[#allocation15_spill]] }
  0x2e   : > { %v663_v6 = vsub.f32 1.0, %v662_v5 }
  0x30   : > { %v664_v8 = vmul.f32 %v3201_v4, %v663_v6 }
  0x31   : > { %s4200_s25 = smov %s4199_s23 }
  0x32   : > { %v665_v10 = vadd.f32 %v3201_v4, %v664_v8 }
  0x34   : > { %v3567_v11 = vsel %vm666_vm1, %v3201_v4, %v665_v10 }
  0x9f   : > { %v660_v12 = vpop.xlane.xlu0 %659 }
  0xa0   : > { %v668_v13 = vmul.f32 %v3567_v11, %v660_v12 }
  0xa2   : > { %v669_v14 = vadd.f32 1e-06, %v668_v13 }
  0xa4   : > { %3202 = vrsqrt.f32 %v669_v14  ;;  %vm676_vm3 = vweird.f32 %v669_v14 }
  0xaa   : > { %v3203_v15 = vpop.eup %3202 }
  0xab   : > { %v671_v16 = vmul.f32 %v3203_v15, %v669_v14  ;;  %vm677_vm2 = vweird.f32 %v3203_v15 }
  0xac   : > { %vm678_vm4 = vmor %vm676_vm3, %vm677_vm2 }
  0xad   : > { %v672_v17 = vmul.f32 %v3203_v15, %v671_v16 }
  0xaf   : > { %v673_v18 = vmul.f32 0.5, %v672_v17 }
  0xb1   : > { %v674_v19 = vsub.f32 1.5, %v673_v18 }
  0xb3   : > { %v675_v20 = vmul.f32 %v3203_v15, %v674_v19 }
  0xb5   : > { %v679_v22 = vsel %vm678_vm4, %v3203_v15, %v675_v20 }
  0xb6   : > { %v680_v23 = vmul.f32 %v679_v22, %v3556_v0 }
  0xb8   : > { %v684_v24 = vmul.f32 %v3190_v21, %v680_v23 }
  0xba   : > { %v685_v25 = vpack.c.bf16 %v684_v24, %v684_v24 }
  0xbc   : > { %2865 = vmatmul.msk.bf16.vlgmr.msra.gmra.mxu0 %vm657_vm0, %v685_v25 }
 0x139   : > { %v710_v26 = vpop.f32.mrf.mxu0 }
 0x13a   : > { %v714_v27 = vpack.c.bf16 %v710_v26, %v710_v26 }
 0x13c   : > { %718 = vrot.lane.b32.xlu1 %v714_v27, %s4149_s26  ;;  %716 = vrot.lane.b32.xlu0 %v714_v27, %s4151_s27  ;;  %v722_v38 = vunpack.c.l.b16 %v714_v27  ;;  %s4153_s26 = smov 64   ;;  %s4155_s27 = smov 8  }
 0x13e   : > { %v3590_v39 = vpack.c.b16 %v722_v38, %v722_v38 }
 0x141   : > { %v712_v28 = vpop.f32.mrf.mxu0 }
 0x144   : > { %720 = vrot.lane.b32.xlu1 %v714_v27, %s4146_s30  ;;  %s4166_s30 = smov 124  }
 0x1ae   : > { %v719_v29 = vpop.permute.xlu1 %718  ;;  %v717_v30 = vpop.permute.xlu0 %716 }
 0x1af   : > { %v746_v31 = vunpack.c.l.b16 %v717_v30  ;;  %v769_v33 = vunpack.c.l.b16 %v719_v29 }
 0x1b1   : > { %v3578_v32 = vpack.c.b16 %v746_v31, %v746_v31  ;;  %v3582_v36 = vpack.c.b16 %v769_v33, %v769_v33 }
 0x1b3   : > { %748 = vrot.lane.b32.xlu2 %v3578_v32, %s4147_s0 }
 0x1b6   : > { %v721_v34 = vpop.permute.xlu1 %720 }
 0x1b7   : > { %v792_v35 = vunpack.c.l.b16 %v721_v34 }
 0x1b9   : > { %v3584_v37 = vpack.c.b16 %v792_v35, %v792_v35 }
 0x1bb   : > { %794 = vrot.lane.b32.xlu1 %v3584_v37, %s4147_s0  ;;  %771 = vrot.lane.b32.xlu2 %v3582_v36, %s4147_s0 }
 0x1c3   : > { %724 = vrot.lane.b32.xlu2 %v3590_v39, %s4147_s0  ;;  %s4157_s0 = smov 16  }
 0x20d   : > { %v749_v40 = vpop.permute.xlu2 %748 }
 0x20e   : > { %v754_v41 = vsel %vm726_vm5, %v749_v40, 0 }
 0x20f   : > { %763 = vmatpush.bf16.xpose.msra.mxu2 %v754_v41 }
 0x215   : > { %v772_v42 = vpop.permute.xlu2 %771 }
 0x216   : > { %2867 = vmatmul.msk.bf16.vlgmr.msra.gmra.mxu2 %vm726_vm5, %v717_v30  ;;  %v777_v43 = vsel %vm726_vm5, %v772_v42, 0 }
 0x217   : > { %786 = vmatpush.bf16.xpose.msra.mxu3 %v777_v43 }
 0x21d   : > { %v725_v44 = vpop.permute.xlu2 %724 }
 0x21e   : > { %2868 = vmatmul.msk.bf16.vlgmr.msra.gmra.mxu3 %vm726_vm5, %v719_v29  ;;  %v731_v45 = vsel %vm726_vm5, %v725_v44, 0 }
 0x21f   : > { %740 = vmatpush.bf16.xpose.msra.mxu1 %v731_v45 }
 0x226   : > { %2866 = vmatmul.msk.bf16.vlgmr.msra.gmra.mxu1 %vm726_vm5, %v714_v27 }
 0x22d   : > { %v795_v46 = vpop.permute.xlu1 %794 }
 0x22e   : > { %v800_v47 = vsel %vm726_vm5, %v795_v46, 0 }
 0x22f   : > { %809 = vmatpush.bf16.xpose.msrb.mxu0 %v800_v47 }
 0x236   : > { %2869 = vmatmul.msk.bf16.vlgmr.msrb.gmra.mxu0 %vm726_vm5, %v721_v34 }
 0x299   : > { %v765_v49 = vpop.f32.mrf.mxu2 }
 0x29a   : > { %v766_v50 = vadd.f32 %v765_v49, %v653_v48 }
 0x29c   : > { %v818_v51 = vsel %vm726_vm5, %v766_v50, -inf }
 0x29d   : > { %819 = vmax.xlane.f32.xlu1 %v818_v51 }
 0x2a1   : > { %v767_v53 = vpop.f32.mrf.mxu2  ;;  %v788_v54 = vpop.f32.mrf.mxu3 }
 0x2a2   : > { %v789_v55 = vadd.f32 %v788_v54, %v654_v52 }
 0x2a3   : > { %v742_v56 = vpop.f32.mrf.mxu1 }
 0x2a4   : > { %v821_v57 = vsel %vm726_vm5, %v789_v55, -inf  ;;  %v743_v59 = vadd.f32 %v742_v56, %v652_v58 }
 0x2a5   : > { %822 = vmax.xlane.f32.xlu2 %v821_v57 }
 0x2a6   : > { %v815_v62 = vsel %vm726_vm5, %v743_v59, -inf }
 0x2a9   : > { %v790_v60 = vpop.f32.mrf.mxu3 }
 0x2ab   : > { %v744_v61 = vpop.f32.mrf.mxu1 }
 0x2ad   : > { %816 = vmax.xlane.f32.xlu2 %v815_v62 }
 0x2b3   : > { %v811_v1 = vpop.f32.mrf.mxu0 }
 0x2b4   : > { %v812_v2 = vadd.f32 %v811_v1, %v655_v63 }
 0x2b6   : > { %v824_v3 = vsel %vm726_vm5, %v812_v2, -inf }
 0x2b7   : > { %825 = vmax.xlane.f32.xlu0 %v824_v3 }
 0x2bb   : > { %v813_v4 = vpop.f32.mrf.mxu0 }
 0x310   : > { %v820_v5 = vpop.xlane.xlu1 %819 }
 0x311   : > { %v828_v6 = vsub.f32 %v766_v50, %v820_v5 }
 0x313   : > { %v833_v7 = vmul.f32 1.442695, %v828_v6 }
 0x315   : > { %3204 = vpow2.f32 %v833_v7 }
 0x318   : > { %v823_v8 = vpop.xlane.xlu2 %822 }
 0x319   : > { %v829_v9 = vsub.f32 %v789_v55, %v823_v8 }
 0x31b   : > { %v3205_v10 = vpop.eup %3204  ;;  %v835_v12 = vmul.f32 1.442695, %v829_v9 }
 0x31c   : > { %v842_v13 = vsel %vm726_vm5, %v3205_v10, 0.0 }
 0x31d   : > { %3206 = vpow2.f32 %v835_v12  ;;  %843 = vadd.xlane.f32.xlu1 %v842_v13 }
 0x320   : > { %v817_v21 = vpop.xlane.xlu2 %816 }
 0x321   : > { %v827_v22 = vsub.f32 %v743_v59, %v817_v21 }
 0x323   : > { %v3207_v14 = vpop.eup %3206  ;;  %v831_v23 = vmul.f32 1.442695, %v827_v22 }
 0x324   : > { %v845_v15 = vsel %vm726_vm5, %v3207_v14, 0.0 }
 0x325   : > { %846 = vadd.xlane.f32.xlu0 %v845_v15 }
 0x32a   : > { %v826_v16 = vpop.xlane.xlu0 %825 }
 0x32b   : > { %v830_v17 = vsub.f32 %v812_v2, %v826_v16 }
 0x32d   : > { %v837_v18 = vmul.f32 1.442695, %v830_v17 }
 0x32f   : > { %3208 = vpow2.f32 %v837_v18 }
 0x330   : > { %3210 = vpow2.f32 %v831_v23 }
 0x335   : > { %v3620_v19 = vpop.eup %3208 }
 0x336   : > { %937 = vrot.lane.b32.xlu1 %v3578_v32, %s4153_s26  ;;  %v848_v20 = vsel %vm726_vm5, %v3620_v19, 0.0  ;;  %v3632_v24 = vpop.eup %3210 }
 0x337   : > { %849 = vadd.xlane.f32.xlu2 %v848_v20  ;;  %v839_v25 = vsel %vm726_vm5, %v3632_v24, 0.0 }
 0x339   : > { %958 = vrot.lane.b32.xlu0 %v3582_v36, %s4153_s26 }
 0x33e   : > { %915 = vrot.lane.b32.xlu1 %v3590_v39, %s4153_s26 }
 0x34f   : > { %979 = vrot.lane.b32.xlu2 %v3584_v37, %s4153_s26  ;;  %s4198_s26 = sld [smem:[#allocation16_spill]] }
 0x363   : > { %840 = vadd.xlane.f32.xlu0 %v839_v25 }
 0x390   : > { %v844_v26 = vpop.xlane.xlu1 %843 }
 0x391   : > { %3212 = vrcp.f32 %v844_v26  ;;  %v877_v33 = vand.u32 2147483648, %v844_v26  ;;  %vm871_vm7 = vweird.f32 %v844_v26  ;;  %v875_v35 = vand.u32 2147483647, %v844_v26 }
 0x393   : > { %v878_v38 = vor.u32 1.1754944e-38, %v877_v33  ;;  %vm876_vm9 = vcmp.eq.f32.partialorder %v875_v35, 8.507059e+37  ;;  %v3100_v33 = vld [vmem:[%s4194_s7] sm:$0xff] }
 0x397   : > { %v3213_v27 = vpop.eup %3212 }
 0x398   : > { %v867_v28 = vmul.f32 %v3213_v27, %v844_v26  ;;  %v847_v29 = vpop.xlane.xlu0 %846  ;;  %vm872_vm6 = vweird.f32 %v3213_v27 }
 0x399   : > { %3214 = vrcp.f32 %v847_v29  ;;  %vm873_vm8 = vmor %vm871_vm7, %vm872_vm6  ;;  %v892_v40 = vand.u32 2147483648, %v847_v29  ;;  %v890_v42 = vand.u32 2147483647, %v847_v29  ;;  %vm886_vm11 = vweird.f32 %v847_v29 }
 0x39a   : > { %v868_v30 = vsub.f32 1.0, %v867_v28 }
 0x39b   : > { %v893_v45 = vor.u32 1.1754944e-38, %v892_v40  ;;  %vm891_vm14 = vcmp.eq.f32.partialorder %v890_v42, 8.507059e+37 }
 0x39c   : > { %v869_v31 = vmul.f32 %v3213_v27, %v868_v30 }
 0x39e   : > { %v870_v32 = vadd.f32 %v3213_v27, %v869_v31 }
 0x39f   : > { %v3215_v34 = vpop.eup %3214 }
 0x3a0   : > { %v882_v36 = vmul.f32 %v3215_v34, %v847_v29  ;;  %v874_v37 = vsel %vm873_vm8, %v3213_v27, %v870_v32  ;;  %vm887_vm10 = vweird.f32 %v3215_v34  ;;  %v3101_v32 = vld [vmem:[%s4194_s7 + $0x8] sm:$0xff] }
 0x3a1   : > { %v879_v43 = vsel %vm876_vm9, %v878_v38, %v874_v37  ;;  %vm888_vm13 = vmor %vm886_vm11, %vm887_vm10  ;;  %vm1013_vm9 = vcmask 130048   ;;  %vm1015_vm10 = vcmask 195584  }
 0x3a2   : > { %v883_v39 = vsub.f32 1.0, %v882_v36  ;;  %v880_v46 = vmul.f32 %v3205_v10, %v879_v43 }
 0x3a4   : > { %v884_v41 = vmul.f32 %v3215_v34, %v883_v39  ;;  %v912_v54 = vpack.c.bf16 %v880_v46, %v880_v46  ;;  %v3103_v46 = vld [vmem:[%s4195_s9 + $0x8] sm:$0xff] }
 0x3a6   : > { %v885_v44 = vadd.f32 %v3215_v34, %v884_v41 }
 0x3a8   : > { %v938_v47 = vpop.permute.xlu1 %937  ;;  %v889_v48 = vsel %vm888_vm13, %v3215_v34, %v885_v44 }
 0x3a9   : > { %v943_v49 = vsel %vm920_vm12, %v938_v47, 0  ;;  %v894_v50 = vsel %vm891_vm14, %v893_v45, %v889_v48  ;;  %v3102_v47 = vld [vmem:[%s4195_s9] sm:$0xff]  ;;  %v3107_v48 = vld [vmem:[%s4196_s10 + $0x18] sm:$0xff] }
 0x3aa   : > { %952 = vmatpush.bf16.msrb.mxu2 %v943_v49  ;;  %v850_v51 = vpop.xlane.xlu2 %849  ;;  %v895_v52 = vmul.f32 %v3207_v14, %v894_v50  ;;  %v3106_v49 = vld [vmem:[%s4196_s10 + $0x10] sm:$0xff] }
 0x3ab   : > { %3216 = vrcp.f32 %v850_v51  ;;  %v959_v53 = vpop.permute.xlu0 %958  ;;  %v907_v1 = vand.u32 2147483648, %v850_v51  ;;  %v905_v3 = vand.u32 2147483647, %v850_v51  ;;  %vm901_vm1 = vweird.f32 %v850_v51 }
 0x3ac   : > { %v964_v55 = vsel %vm920_vm12, %v959_v53, 0  ;;  %v913_v56 = vpack.c.bf16 %v895_v52, %v895_v52  ;;  %v3105_v53 = vld [vmem:[%s4196_s10 + $0x8] sm:$0xff] }
 0x3ad   : > { %2871 = vmatmul.msk.bf16.vlgmr.msrb.gmra.mxu2 %vm726_vm5, %v912_v54  ;;  %973 = vmatpush.bf16.msrb.mxu3 %v964_v55  ;;  %v908_v5 = vor.u32 1.1754944e-38, %v907_v1  ;;  %vm906_vm3 = vcmp.eq.f32.partialorder %v905_v3, 8.507059e+37  ;;  %v3097_v3 = vld [vmem:[%s4198_s26 + $0x8] sm:$0xff] }
 0x3ae   : > { %1103 = vmatpush.bf16.msra.mxu2 %v3103_v46 }
 0x3b0   : > { %v916_v57 = vpop.permute.xlu1 %915  ;;  %2872 = vmatmul.msk.bf16.vlgmr.msrb.gmra.mxu3 %vm726_vm5, %v913_v56 }
 0x3b1   : > { %v3217_v58 = vpop.eup %3216  ;;  %v922_v59 = vsel %vm920_vm12, %v916_v57, 0  ;;  %1144 = vmatpush.bf16.msra.mxu3 %v3107_v48 }
 0x3b2   : > { %v897_v60 = vmul.f32 %v3217_v58, %v850_v51  ;;  %931 = vmatpush.bf16.msrb.mxu1 %v922_v59  ;;  %v980_v61 = vpop.permute.xlu2 %979  ;;  %vm902_vm15 = vweird.f32 %v3217_v58  ;;  %1104 = vmatpush.bf16.msra.mxu2 %v3102_v47 }
 0x3b3   : > { %v985_v62 = vsel %vm920_vm12, %v980_v61, 0  ;;  %vm903_vm2 = vmor %vm901_vm1, %vm902_vm15  ;;  %vm1136_vm15 = vcmask 523264  }
 0x3b4   : > { %v898_v63 = vsub.f32 1.0, %v897_v60  ;;  %994 = vmatpush.bf16.msra.mxu0 %v985_v62  ;;  %v3191_v60 = vld [vmem:[%s4197_s8] ss:$0 sm:$0xff] }
 0x3b5   : > { %1145 = vmatpush.bf16.msra.mxu3 %v3106_v49 }
 0x3b6   : > { %v899_v2 = vmul.f32 %v3217_v58, %v898_v63  ;;  %1039 = vmatpush.bf16.msra.mxu1 %v3101_v32 }
 0x3b8   : > { %v900_v4 = vadd.f32 %v3217_v58, %v899_v2  ;;  %v3104_v2 = vld [vmem:[%s4196_s10] sm:$0xff] }
 0x3b9   : > { %1146 = vmatpush.bf16.msra.mxu3 %v3105_v53 }
 0x3ba   : > { %v904_v6 = vsel %vm903_vm2, %v3217_v58, %v900_v4  ;;  %1040 = vmatpush.bf16.msra.mxu1 %v3100_v33  ;;  %v3109_v4 = vld [vmem:[%s4199_s23 + $0x8] sm:$0xff]  ;;  %s4202_s23 = smov 120  }
 0x3bb   : > { %v909_v7 = vsel %vm906_vm3, %v908_v5, %v904_v6  ;;  %v3096_v5 = vld [vmem:[%s4198_s26] sm:$0xff]  ;;  %1180 = vmatpush.bf16.msrb.mxu0 %v3109_v4  ;;  %v638_v6 = vpack.c.bf16 %v3556_v0, %v3556_v0  ;;  %s3092_s26 = sshll.u32 %s3524_s2, 3 }
 0x3bc   : > { %v910_v8 = vmul.f32 %v3620_v19, %v909_v7 }
 0x3bd   : > { %1147 = vmatpush.bf16.msra.mxu3 %v3104_v2 }
 0x3be   : > { %v914_v9 = vpack.c.bf16 %v910_v8, %v910_v8 }
 0x3c0   : > { %2873 = vmatmul.msk.bf16.vlgmr.msra.gmra.mxu0 %vm726_vm5, %v914_v9 }
 0x3d6   : > { %v841_v10 = vpop.xlane.xlu0 %840 }
 0x3d7   : > { %3218 = vrcp.f32 %v841_v10  ;;  %v862_v15 = vand.u32 2147483648, %v841_v10  ;;  %v860_v17 = vand.u32 2147483647, %v841_v10  ;;  %vm856_vm6 = vweird.f32 %v841_v10 }
 0x3d9   : > { %v863_v20 = vor.u32 1.1754944e-38, %v862_v15  ;;  %vm861_vm8 = vcmp.eq.f32.partialorder %v860_v17, 8.507059e+37 }
 0x3dd   : > { %v3219_v12 = vpop.eup %3218 }
 0x3de   : > { %v852_v13 = vmul.f32 %v3219_v12, %v841_v10  ;;  %vm857_vm4 = vweird.f32 %v3219_v12 }
 0x3df   : > { %vm858_vm7 = vmor %vm856_vm6, %vm857_vm4  ;;  %vm1287_vm6 = vcmask 31744  }
 0x3e0   : > { %v853_v14 = vsub.f32 1.0, %v852_v13 }
 0x3e2   : > { %v854_v16 = vmul.f32 %v3219_v12, %v853_v14 }
 0x3e4   : > { %v855_v18 = vadd.f32 %v3219_v12, %v854_v16 }
 0x3e6   : > { %v859_v21 = vsel %vm858_vm7, %v3219_v12, %v855_v18  ;;  %v3108_v12 = vld [vmem:[%s4200_s25] sm:$0xff] }
 0x3e7   : > { %v864_v22 = vsel %vm861_vm8, %v863_v20, %v859_v21  ;;  %1181 = vmatpush.bf16.msrb.mxu0 %v3108_v12 }
 0x3e8   : > { %v865_v19 = vmul.f32 %v3632_v24, %v864_v22 }
 0x3ea   : > { %v911_v23 = vpack.c.bf16 %v865_v19, %v865_v19 }
 0x3ec   : > { %2870 = vmatmul.msk.bf16.vlgmr.msrb.gmra.mxu1 %vm726_vm5, %v911_v23  ;;  %v3393_v23 = vmov 16.0  }
 0x3ed   : > { %1208 = vmatpush.bf16.msrb.mxu1 %v3097_v3 }
 0x3f1   : > { %1209 = vmatpush.bf16.msrb.mxu1 %v3096_v5 }
 0x430   : > { %v954_v25 = vpop.f32.mrf.mxu2 }
 0x431   : > { %1001 = vrot.lane.b32.xlu2 %v954_v25, %s4155_s27  ;;  %s4165_s27 = smov 116  }
 0x433   : > { %v975_v26 = vpop.f32.mrf.mxu3 }
 0x434   : > { %1005 = vrot.lane.b32.xlu1 %v975_v26, %s4157_s0  ;;  %s4207_s0 = smov 104  }
 0x438   : > { %v956_v27 = vpop.f32.mrf.mxu2 }
 0x43b   : > { %v977_v28 = vpop.f32.mrf.mxu3 }
 0x43d   : > { %v996_v29 = vpop.f32.mrf.mxu0 }
 0x43e   : > { %1009 = vrot.lane.b32.xlu2 %v996_v29, %s4158_s28  ;;  %v3110_v29 = vld [vmem:[%s4133_s12] sm:$0xff]  ;;  %s4206_s28 = smov 8  }
 0x43f   : > { %1269 = vmatpush.bf16.msrb.mxu2 %v3110_v29 }
 0x445   : > { %v998_v30 = vpop.f32.mrf.mxu0 }
 0x469   : > { %v933_v31 = vpop.f32.mrf.mxu1 }
 0x471   : > { %v935_v24 = vpop.f32.mrf.mxu1 }
 0x48b   : > { %v1002_v34 = vpop.permute.xlu2 %1001 }
 0x48c   : > { %v1012_v35 = vsel %vm726_vm5, %v933_v31, %v1002_v34 }
 0x498   : > { %v1010_v37 = vpop.permute.xlu2 %1009 }
 0x4a6   : > { %v1006_v36 = vpop.permute.xlu1 %1005 }
 0x4a7   : > { %v1014_v38 = vsel %vm1013_vm9, %v1012_v35, %v1006_v36 }
 0x4a8   : > { %v1016_v39 = vsel %vm1015_vm10, %v1014_v38, %v1010_v37 }
 0x4a9   : > { %v1017_v40 = vpack.c.bf16 %v1016_v39, %v1016_v39 }
 0x4ab   : > { %2882 = vmatmul.msk.bf16.vlgmr.msra.gmra.mxu1 %vm657_vm0, %v1017_v40  ;;  %v3192_v40 = vld [vmem:[%s4201_s11] ss:$0 sm:$0xff] }
 0x4bb   : > { %2926 = vmatmul.msk.bf16.vlgmr.msrb.gmra.mxu1 %vm657_vm0, %v638_v6  ;;  %v1223_v6 = vld [vmem:[%s4204_s29 + $0x18] sm:$0xff] }
 0x528   : > { %v1042_v41 = vpop.f32.mrf.mxu1 }
 0x529   : > { %v1046_v42 = vadd.f32 %v1042_v41, %v3556_v0 }
 0x52b   : > { %v1060_v43 = vmul.f32 %v1046_v42, %v1046_v42 }
 0x52d   : > { %v1061_v44 = vsel %vm657_vm0, %v1060_v43, 0.0 }
 0x52e   : > { %1062 = vadd.xlane.f32.xlu1 %v1061_v44 }
 0x530   : > { %v1044_v45 = vpop.f32.mrf.mxu1 }
 0x538   : > { %v1211_v13 = vpop.f32.mrf.mxu1 }
 0x540   : > { %v1213_v14 = vpop.f32.mrf.mxu1 }
 0x5a1   : > { %v1063_v50 = vpop.xlane.xlu1 %1062 }
 0x5a2   : > { %v1064_v51 = vmul.f32 %v1063_v50, %v3567_v11 }
 0x5a4   : > { %v1065_v52 = vadd.f32 1e-06, %v1064_v51 }
 0x5a6   : > { %3220 = vrsqrt.f32 %v1065_v52  ;;  %vm1072_vm13 = vweird.f32 %v1065_v52 }
 0x5a7   : > { %3222 = vrcp.f32 %v3393_v23 }
 0x5ac   : > { %v3221_v54 = vpop.eup %3220 }
 0x5ad   : > { %v1067_v55 = vmul.f32 %v3221_v54, %v1065_v52  ;;  %vm1073_vm11 = vweird.f32 %v3221_v54  ;;  %v3223_v25 = vpop.eup %3222 }
 0x5ae   : > { %vm1074_vm14 = vmor %vm1072_vm13, %vm1073_vm11  ;;  %v1229_v26 = vmul.f32 16.0, %v3223_v25  ;;  %vm1233_vm1 = vweird.f32 %v3223_v25 }
 0x5af   : > { %v1068_v56 = vmul.f32 %v3221_v54, %v1067_v55 }
 0x5b0   : > { %v1230_v27 = vsub.f32 1.0, %v1229_v26 }
 0x5b1   : > { %v1069_v57 = vmul.f32 0.5, %v1068_v56 }
 0x5b2   : > { %v1231_v28 = vmul.f32 %v3223_v25, %v1230_v27 }
 0x5b3   : > { %v1070_v58 = vsub.f32 1.5, %v1069_v57 }
 0x5b4   : > { %v1232_v30 = vadd.f32 %v3223_v25, %v1231_v28 }
 0x5b5   : > { %v1071_v59 = vmul.f32 %v3221_v54, %v1070_v58 }
 0x5b6   : > { %v3713_v31 = vsel %vm1233_vm1, %v3223_v25, %v1232_v30 }
 0x5b7   : > { %v1075_v61 = vsel %vm1074_vm14, %v3221_v54, %v1071_v59 }
 0x5b8   : > { %v1076_v62 = vmul.f32 %v1075_v61, %v1046_v42 }
 0x5ba   : > { %v1080_v63 = vmul.f32 %v3191_v60, %v1076_v62 }
 0x5bc   : > { %v1081_v1 = vpack.c.bf16 %v1080_v63, %v1080_v63 }
 0x5be   : > { %2891 = vmatmul.msk.bf16.vlgmr.msra.gmra.mxu2 %vm657_vm0, %v1081_v1 }
 0x641   : > { %v1106_v7 = vpop.f32.mrf.mxu2 }
 0x642   : > { %v1110_v8 = vmax.f32 %v1106_v7, 0.0 }
 0x644   : > { %v1111_v9 = vpack.c.bf16 %v1110_v8, %v1110_v8 }
 0x646   : > { %2908 = vmatmul.msk.bf16.vlgmr.msra.gmra.mxu3 %vm1136_vm15, %v1111_v9 }
 0x649   : > { %v1108_v10 = vpop.f32.mrf.mxu2 }
 0x64a   : > { %v1220_v10 = vld [vmem:[%s4204_s29] sm:$0xff] }
 0x6c9   : > { %v1149_v15 = vpop.f32.mrf.mxu3 }
 0x6ca   : > { %v3700_v16 = vadd.f32 %v1149_v15, %v1046_v42  ;;  %v1221_v15 = vld [vmem:[%s4204_s29 + $0x8] sm:$0xff] }
 0x6cc   : > { %v1154_v0 = vpack.c.bf16 %v3700_v16, %v3700_v16 }
 0x6ce   : > { %2917 = vmatmul.msk.bf16.vlgmr.msrb.gmra.mxu0 %vm657_vm0, %v1154_v0 }
 0x6d1   : > { %v1151_v17 = vpop.f32.mrf.mxu3 }
 0x74b   : > { %v1183_v18 = vpop.f32.mrf.mxu0 }
 0x74c   : > { %v3705_v20 = vadd.f32 %v1211_v13, %v1183_v18 }
 0x74e   : > { %v1224_v21 = vmul.f32 %v3705_v20, %v3705_v20 }
 0x750   : > { %v1225_v22 = vsel %vm1013_vm9, %v1224_v21, 0.0  ;;  %v1222_v21 = vld [vmem:[%s4204_s29 + $0x10] sm:$0xff] }
 0x751   : > { %1226 = vadd.xlane.f32.xlu2 %v1225_v22 }
 0x753   : > { %v1185_v19 = vpop.f32.mrf.mxu0 }
 0x7c4   : > { %v1227_v24 = vpop.xlane.xlu2 %1226 }
 0x7c5   : > { %v1235_v32 = vmul.f32 %v3713_v31, %v1227_v24 }
 0x7c7   : > { %v1236_v33 = vadd.f32 1e-06, %v1235_v32 }
 0x7c9   : > { %3224 = vrsqrt.f32 %v1236_v33  ;;  %vm1243_vm3 = vweird.f32 %v1236_v33 }
 0x7cf   : > { %v3225_v34 = vpop.eup %3224 }
 0x7d0   : > { %v1238_v35 = vmul.f32 %v3225_v34, %v1236_v33  ;;  %vm1244_vm2 = vweird.f32 %v3225_v34 }
 0x7d1   : > { %vm1245_vm4 = vmor %vm1243_vm3, %vm1244_vm2 }
 0x7d2   : > { %v1239_v36 = vmul.f32 %v3225_v34, %v1238_v35 }
 0x7d4   : > { %v1240_v37 = vmul.f32 0.5, %v1239_v36 }
 0x7d6   : > { %v1241_v38 = vsub.f32 1.5, %v1240_v37 }
 0x7d8   : > { %v1242_v39 = vmul.f32 %v3225_v34, %v1241_v38 }
 0x7da   : > { %v1246_v41 = vsel %vm1245_vm4, %v3225_v34, %v1242_v39 }
 0x7db   : > { %v1247_v42 = vmul.f32 %v1246_v41, %v3705_v20 }
 0x7dd   : > { %v1251_v43 = vmul.f32 %v3192_v40, %v1247_v42 }
 0x7df   : > { %v1252_v44 = vpack.c.bf16 %v1251_v43, %v1251_v43 }
 0x7e1   : > { %2931 = vmatmul.msk.bf16.vlgmr.msrb.gmra.mxu2 %vm1013_vm9, %v1252_v44 }
 0x864   : > { %v1271_v45 = vpop.f32.mrf.mxu2 }
 0x865   : > { %v1275_v46 = vpack.c.bf16 %v1271_v45, %v1271_v45 }
 0x867   : > { %1277 = vrot.lane.b32.xlu1 %v1275_v46, %s4166_s30  ;;  %1281 = vrot.lane.b32.xlu0 %v1275_v46, %s4165_s27  ;;  %v1283_v47 = vunpack.c.l.b16 %v1275_v46  ;;  %s4205_s30 = smov 96   ;;  %s4168_s27 = smov 4  }
 0x869   : > { %v3723_v49 = vpack.c.b16 %v1283_v47, %v1283_v47 }
 0x86c   : > { %v1273_v48 = vpop.f32.mrf.mxu2 }
 0x86f   : > { %1279 = vrot.lane.b32.xlu0 %v1275_v46, %s4202_s23  ;;  %1285 = vrot.lane.b32.xlu1 %v3723_v49, %s4203_s3 }
 0x8d9   : > { %v1278_v50 = vpop.permute.xlu1 %1277  ;;  %v1282_v51 = vpop.permute.xlu0 %1281 }
 0x8da   : > { %v1307_v52 = vunpack.c.l.b16 %v1278_v50  ;;  %v1353_v53 = vunpack.c.l.b16 %v1282_v51 }
 0x8dc   : > { %v3728_v54 = vpack.c.b16 %v1307_v52, %v1307_v52  ;;  %v3730_v55 = vpack.c.b16 %v1353_v53, %v1353_v53 }
 0x8de   : > { %1309 = vrot.lane.b32.xlu0 %v3728_v54, %s4203_s3  ;;  %1355 = vrot.lane.b32.xlu2 %v3730_v55, %s4203_s3 }
 0x8e1   : > { %v1280_v56 = vpop.permute.xlu0 %1279  ;;  %v1286_v57 = vpop.permute.xlu1 %1285 }
 0x8e2   : > { %v1330_v58 = vunpack.c.l.b16 %v1280_v56  ;;  %v1292_v59 = vsel %vm1287_vm6, %v1286_v57, 0 }
 0x8e3   : > { %1301 = vmatpush.bf16.xpose.msrb.mxu3 %v1292_v59 }
 0x8e4   : > { %v1331_v60 = vpack.c.b16 %v1330_v58, %v1330_v58 }
 0x8e6   : > { %1332 = vrot.lane.b32.xlu0 %v1331_v60, %s4203_s3 }
 0x8ea   : > { %2932 = vmatmul.msk.bf16.vlgmr.msrb.gmra.mxu3 %vm1287_vm6, %v1275_v46 }
 0x938   : > { %v1356_v61 = vpop.permute.xlu2 %1355 }
 0x939   : > { %v1361_v62 = vsel %vm1287_vm6, %v1356_v61, 0 }
 0x93a   : > { %1370 = vmatpush.bf16.xpose.msra.mxu2 %v1361_v62 }
 0x941   : > { %2935 = vmatmul.msk.bf16.vlgmr.msra.gmra.mxu2 %vm1287_vm6, %v1282_v51 }
 0x950   : > { %v1310_v63 = vpop.permute.xlu0 %1309 }
 0x951   : > { %v1315_v1 = vsel %vm1287_vm6, %v1310_v63, 0 }
 0x952   : > { %1324 = vmatpush.bf16.xpose.msra.mxu0 %v1315_v1 }
 0x958   : > { %v1333_v2 = vpop.permute.xlu0 %1332 }
 0x959   : > { %v1338_v3 = vsel %vm1287_vm6, %v1333_v2, 0  ;;  %2933 = vmatmul.msk.bf16.vlgmr.msra.gmra.mxu0 %vm1287_vm6, %v1278_v50 }
 0x95a   : > { %1347 = vmatpush.bf16.xpose.msra.mxu1 %v1338_v3 }
 0x961   : > { %2934 = vmatmul.msk.bf16.vlgmr.msra.gmra.mxu1 %vm1287_vm6, %v1280_v56 }
 0x96d   : > { %v1303_v4 = vpop.f32.mrf.mxu3 }
 0x96e   : > { %v1304_v12 = vadd.f32 %v1303_v4, %v1220_v10 }
 0x970   : > { %v1376_v14 = vsel %vm726_vm5, %v1304_v12, -inf }
 0x975   : > { %v1305_v5 = vpop.f32.mrf.mxu3 }
 0x9c4   : > { %v1372_v7 = vpop.f32.mrf.mxu2 }
 0x9c5   : > { %v1373_v8 = vadd.f32 %v1372_v7, %v1223_v6 }
 0x9c7   : > { %v1385_v9 = vsel %vm726_vm5, %v1373_v8, -inf }
 0x9c8   : > { %1386 = vmax.xlane.f32.xlu0 %v1385_v9 }
 0x9cc   : > { %v1374_v13 = vpop.f32.mrf.mxu2 }
 0x9d0   : > { %1377 = vmax.xlane.f32.xlu0 %v1376_v14 }
 0x9d6   : > { %v1326_v0 = vpop.f32.mrf.mxu0 }
 0x9d7   : > { %v1327_v17 = vadd.f32 %v1326_v0, %v1221_v15 }
 0x9d9   : > { %v1379_v18 = vsel %vm726_vm5, %v1327_v17, -inf }
 0x9da   : > { %1380 = vmax.xlane.f32.xlu2 %v1379_v18 }
 0x9de   : > { %v1328_v22 = vpop.f32.mrf.mxu0  ;;  %v1349_v19 = vpop.f32.mrf.mxu1 }
 0x9df   : > { %v1350_v23 = vadd.f32 %v1349_v19, %v1222_v21 }
 0x9e1   : > { %v1382_v25 = vsel %vm726_vm5, %v1350_v23, -inf }
 0x9e2   : > { %1383 = vmax.xlane.f32.xlu1 %v1382_v25 }
 0x9e6   : > { %v1351_v26 = vpop.f32.mrf.mxu1 }
 0xa3b   : > { %v1387_v27 = vpop.xlane.xlu0 %1386 }
 0xa3c   : > { %v1391_v28 = vsub.f32 %v1373_v8, %v1387_v27 }
 0xa3e   : > { %v1398_v29 = vmul.f32 1.442695, %v1391_v28 }
 0xa40   : > { %3226 = vpow2.f32 %v1398_v29 }
 0xa43   : > { %v1378_v42 = vpop.xlane.xlu0 %1377 }
 0xa44   : > { %v1388_v43 = vsub.f32 %v1304_v12, %v1378_v42 }
 0xa46   : > { %v3227_v30 = vpop.eup %3226  ;;  %v1392_v44 = vmul.f32 1.442695, %v1388_v43 }
 0xa47   : > { %v1409_v24 = vsel %vm726_vm5, %v3227_v30, 0.0 }
 0xa48   : > { %1410 = vadd.xlane.f32.xlu2 %v1409_v24 }
 0xa4d   : > { %v1381_v32 = vpop.xlane.xlu2 %1380 }
 0xa4e   : > { %v1389_v33 = vsub.f32 %v1327_v17, %v1381_v32 }
 0xa50   : > { %v1394_v34 = vmul.f32 1.442695, %v1389_v33 }
 0xa52   : > { %3228 = vpow2.f32 %v1394_v34 }
 0xa55   : > { %v1384_v35 = vpop.xlane.xlu1 %1383 }
 0xa56   : > { %v1390_v36 = vsub.f32 %v1350_v23, %v1384_v35 }
 0xa58   : > { %v3762_v37 = vpop.eup %3228  ;;  %v1396_v38 = vmul.f32 1.442695, %v1390_v36 }
 0xa59   : > { %v1403_v39 = vsel %vm726_vm5, %v3762_v37, 0.0 }
 0xa5a   : > { %3230 = vpow2.f32 %v1396_v38  ;;  %1404 = vadd.xlane.f32.xlu1 %v1403_v39 }
 0xa5b   : > { %3232 = vpow2.f32 %v1392_v44 }
 0xa60   : > { %v3766_v40 = vpop.eup %3230  ;;  %1539 = vrot.lane.b32.xlu2 %v3730_v55, %s4205_s30 }
 0xa61   : > { %v1406_v41 = vsel %vm726_vm5, %v3766_v40, 0.0  ;;  %v3777_v45 = vpop.eup %3232 }
 0xa62   : > { %1407 = vadd.xlane.f32.xlu0 %v1406_v41  ;;  %v1400_v46 = vsel %vm726_vm5, %v3777_v45, 0.0 }
 0xa73   : > { %1497 = vrot.lane.b32.xlu1 %v3728_v54, %s4205_s30 }
 0xa76   : > { %1518 = vrot.lane.b32.xlu0 %v1331_v60, %s4205_s30 }
 0xa7e   : > { %1476 = vrot.lane.b32.xlu0 %v3723_v49, %s4205_s30 }
 0xa89   : > { %1401 = vadd.xlane.f32.xlu2 %v1400_v46 }
 0xabb   : > { %v1411_v47 = vpop.xlane.xlu2 %1410 }
 0xabc   : > { %3234 = vrcp.f32 %v1411_v47  ;;  %v1468_v54 = vand.u32 2147483648, %v1411_v47  ;;  %v1466_v49 = vand.u32 2147483647, %v1411_v47  ;;  %vm1462_vm8 = vweird.f32 %v1411_v47 }
 0xabe   : > { %v1469_v57 = vor.u32 1.1754944e-38, %v1468_v54  ;;  %vm1467_vm13 = vcmp.eq.f32.partialorder %v1466_v49, 8.507059e+37 }
 0xac2   : > { %v3235_v48 = vpop.eup %3234 }
 0xac3   : > { %v1458_v50 = vmul.f32 %v3235_v48, %v1411_v47  ;;  %v1540_v51 = vpop.permute.xlu2 %1539  ;;  %vm1463_vm7 = vweird.f32 %v3235_v48 }
 0xac4   : > { %v1545_v52 = vsel %vm920_vm12, %v1540_v51, 0  ;;  %vm1464_vm11 = vmor %vm1462_vm8, %vm1463_vm7 }
 0xac5   : > { %v1459_v53 = vsub.f32 1.0, %v1458_v50  ;;  %1554 = vmatpush.bf16.msrb.mxu2 %v1545_v52 }
 0xac7   : > { %v1460_v55 = vmul.f32 %v3235_v48, %v1459_v53 }
 0xac9   : > { %v1461_v56 = vadd.f32 %v3235_v48, %v1460_v55 }
 0xacb   : > { %v1465_v58 = vsel %vm1464_vm11, %v3235_v48, %v1461_v56 }
 0xacc   : > { %v1470_v59 = vsel %vm1467_vm13, %v1469_v57, %v1465_v58  ;;  %v3111_v57 = vld [vmem:[%s4134_s13] sm:$0xff] }
 0xacd   : > { %v1471_v60 = vmul.f32 %v3227_v30, %v1470_v59  ;;  %v1405_v61 = vpop.xlane.xlu1 %1404 }
 0xace   : > { %3236 = vrcp.f32 %v1405_v61  ;;  %v1438_v6 = vand.u32 2147483648, %v1405_v61  ;;  %vm1432_vm1 = vweird.f32 %v1405_v61  ;;  %v1436_v8 = vand.u32 2147483647, %v1405_v61 }
 0xacf   : > { %v1475_v62 = vpack.c.bf16 %v1471_v60, %v1471_v60 }
 0xad0   : > { %v1439_v12 = vor.u32 1.1754944e-38, %v1438_v6  ;;  %vm1437_vm3 = vcmp.eq.f32.partialorder %v1436_v8, 8.507059e+37 }
 0xad1   : > { %2939 = vmatmul.msk.bf16.vlgmr.msrb.gmra.mxu2 %vm726_vm5, %v1475_v62 }
 0xad4   : > { %v3237_v63 = vpop.eup %3236 }
 0xad5   : > { %v1428_v1 = vmul.f32 %v3237_v63, %v1405_v61  ;;  %v1408_v2 = vpop.xlane.xlu0 %1407  ;;  %vm1433_vm14 = vweird.f32 %v3237_v63 }
 0xad6   : > { %3238 = vrcp.f32 %v1408_v2  ;;  %vm1434_vm2 = vmor %vm1432_vm1, %vm1433_vm14  ;;  %v1453_v14 = vand.u32 2147483648, %v1408_v2  ;;  %v1451_v17 = vand.u32 2147483647, %v1408_v2  ;;  %vm1447_vm7 = vweird.f32 %v1408_v2 }
 0xad7   : > { %v1429_v3 = vsub.f32 1.0, %v1428_v1 }
 0xad8   : > { %v1454_v22 = vor.u32 1.1754944e-38, %v1453_v14  ;;  %vm1452_vm11 = vcmp.eq.f32.partialorder %v1451_v17, 8.507059e+37  ;;  %v3193_v14 = vld [vmem:[%s4192_s5 + $0x1] ss:$0 sm:$0xff] }
 0xad9   : > { %v1430_v4 = vmul.f32 %v3237_v63, %v1429_v3  ;;  %v3115_v3 = vld [vmem:[%s4191_s6 + $0x10] sm:$0xff] }
 0xadb   : > { %v1431_v5 = vadd.f32 %v3237_v63, %v1430_v4 }
 0xadc   : > { %v3239_v7 = vpop.eup %3238 }
 0xadd   : > { %v1443_v9 = vmul.f32 %v3239_v7, %v1408_v2  ;;  %v1435_v10 = vsel %vm1434_vm2, %v3237_v63, %v1431_v5  ;;  %vm1448_vm4 = vweird.f32 %v3239_v7  ;;  %v3116_v2 = vld [vmem:[%s4191_s6 + $0x18] sm:$0xff] }
 0xade   : > { %v1440_v15 = vsel %vm1437_vm3, %v1439_v12, %v1435_v10  ;;  %vm1449_vm8 = vmor %vm1447_vm7, %vm1448_vm4  ;;  %vm1574_vm3 = vcmask 97280   ;;  %1737 = vmatpush.bf16.msra.mxu2 %v3116_v2 }
 0xadf   : > { %v1444_v13 = vsub.f32 1.0, %v1443_v9  ;;  %v1441_v21 = vmul.f32 %v3762_v37, %v1440_v15 }
 0xae1   : > { %v1445_v0 = vmul.f32 %v3239_v7, %v1444_v13  ;;  %v1473_v29 = vpack.c.bf16 %v1441_v21, %v1441_v21 }
 0xae2   : > { %1738 = vmatpush.bf16.msra.mxu2 %v3115_v3 }
 0xae3   : > { %v1446_v18 = vadd.f32 %v3239_v7, %v1445_v0 }
 0xae5   : > { %v1450_v19 = vsel %vm1449_vm8, %v3239_v7, %v1446_v18  ;;  %v1498_v23 = vpop.permute.xlu1 %1497 }
 0xae6   : > { %v1455_v25 = vsel %vm1452_vm11, %v1454_v22, %v1450_v19  ;;  %v1503_v26 = vsel %vm920_vm12, %v1498_v23, 0 }
 0xae7   : > { %v1456_v27 = vmul.f32 %v3766_v40, %v1455_v25  ;;  %1512 = vmatpush.bf16.msrb.mxu0 %v1503_v26 }
 0xae8   : > { %v1519_v28 = vpop.permute.xlu0 %1518 }
 0xae9   : > { %v1524_v30 = vsel %vm920_vm12, %v1519_v28, 0  ;;  %v1474_v24 = vpack.c.bf16 %v1456_v27, %v1456_v27 }
 0xaea   : > { %2937 = vmatmul.msk.bf16.vlgmr.msrb.gmra.mxu0 %vm726_vm5, %v1473_v29  ;;  %1533 = vmatpush.bf16.msrb.mxu1 %v1524_v30 }
 0xaed   : > { %2938 = vmatmul.msk.bf16.vlgmr.msrb.gmra.mxu1 %vm726_vm5, %v1474_v24 }
 0xaf0   : > { %v1477_v32 = vpop.permute.xlu0 %1476 }
 0xaf1   : > { %v1482_v33 = vsel %vm920_vm12, %v1477_v32, 0 }
 0xaf2   : > { %1491 = vmatpush.bf16.msra.mxu3 %v1482_v33 }
 0xaf6   : > { %1593 = vmatpush.bf16.msrb.mxu3 %v3111_v57 }
 0xafc   : > { %v1402_v34 = vpop.xlane.xlu2 %1401 }
 0xafd   : > { %3240 = vrcp.f32 %v1402_v34  ;;  %v1423_v38 = vand.u32 2147483648, %v1402_v34  ;;  %v1421_v40 = vand.u32 2147483647, %v1402_v34  ;;  %vm1417_vm14 = vweird.f32 %v1402_v34 }
 0xaff   : > { %v1424_v42 = vor.u32 1.1754944e-38, %v1423_v38  ;;  %vm1422_vm2 = vcmp.eq.f32.partialorder %v1421_v40, 8.507059e+37  ;;  %v3194_v38 = vld [vmem:[%s4135_s14] ss:$0 sm:$0xff] }
 0xb03   : > { %v3241_v35 = vpop.eup %3240 }
 0xb04   : > { %v1413_v36 = vmul.f32 %v3241_v35, %v1402_v34  ;;  %vm1418_vm13 = vweird.f32 %v3241_v35 }
 0xb05   : > { %vm1419_vm1 = vmor %vm1417_vm14, %vm1418_vm13 }
 0xb06   : > { %v1414_v37 = vsub.f32 1.0, %v1413_v36 }
 0xb08   : > { %v1415_v39 = vmul.f32 %v3241_v35, %v1414_v37 }
 0xb0a   : > { %v1416_v41 = vadd.f32 %v3241_v35, %v1415_v39 }
 0xb0c   : > { %v1420_v43 = vsel %vm1419_vm1, %v3241_v35, %v1416_v41 }
 0xb0d   : > { %v1425_v44 = vsel %vm1422_vm2, %v1424_v42, %v1420_v43 }
 0xb0e   : > { %v1426_v46 = vmul.f32 %v3777_v45, %v1425_v44  ;;  %v1694_v45 = vmul.f32 %v3700_v16, %v3700_v16 }
 0xb10   : > { %v1472_v47 = vpack.c.bf16 %v1426_v46, %v1426_v46  ;;  %v1695_v55 = vsel %vm657_vm0, %v1694_v45, 0.0 }
 0xb12   : > { %2936 = vmatmul.msk.bf16.vlgmr.msra.gmra.mxu3 %vm726_vm5, %v1472_v47 }
 0xb54   : > { %v1556_v48 = vpop.f32.mrf.mxu2 }
 0xb5c   : > { %v1558_v50 = vpop.f32.mrf.mxu2 }
 0xb67   : > { %v1514_v51 = vpop.f32.mrf.mxu0 }
 0xb68   : > { %1561 = vrot.lane.b32.xlu1 %v1514_v51, %s4168_s27  ;;  %s4209_s27 = smov 24  }
 0xb6a   : > { %v1535_v52 = vpop.f32.mrf.mxu1 }
 0xb6b   : > { %1565 = vrot.lane.b32.xlu0 %v1535_v52, %s4206_s28 }
 0xb6f   : > { %v1516_v53 = vpop.f32.mrf.mxu0 }
 0xb70   : > { %1569 = vrot.lane.b32.xlu1 %v1556_v48, %s4167_s21  ;;  %s4210_s21 = smov 16  }
 0xb72   : > { %v1537_v54 = vpop.f32.mrf.mxu1 }
 0xb95   : > { %1696 = vadd.xlane.f32.xlu0 %v1695_v55  ;;  %v1493_v49 = vpop.f32.mrf.mxu3  ;;  %v3114_v55 = vld [vmem:[%s4137_s16 + $0x8] sm:$0xff] }
 0xb96   : > { %1674 = vmatpush.bf16.msra.mxu1 %v3114_v55 }
 0xb9d   : > { %v1495_v56 = vpop.f32.mrf.mxu3 }
 0xbda   : > { %v1562_v58 = vpop.permute.xlu1 %1561 }
 0xbdb   : > { %v1572_v60 = vsel %vm1287_vm6, %v1493_v49, %v1562_v58  ;;  %v3113_v49 = vld [vmem:[%s4137_s16] sm:$0xff] }
 0xbdc   : > { %1675 = vmatpush.bf16.msra.mxu1 %v3113_v49 }
 0xbdd   : > { %v1566_v59 = vpop.permute.xlu0 %1565 }
 0xbde   : > { %v1573_v61 = vsel %vm726_vm5, %v1572_v60, %v1566_v59 }
 0xbe2   : > { %v1570_v62 = vpop.permute.xlu1 %1569 }
 0xbe3   : > { %v1575_v63 = vsel %vm1574_vm3, %v1573_v61, %v1570_v62 }
 0xbe4   : > { %v1576_v1 = vpack.c.bf16 %v1575_v63, %v1575_v63 }
 0xbe6   : > { %2944 = vmatmul.msk.bf16.vlgmr.msrb.gmra.mxu3 %vm1013_vm9, %v1576_v1 }
 0xc08   : > { %v1697_v4 = vpop.xlane.xlu0 %1696 }
 0xc09   : > { %v1698_v5 = vmul.f32 %v1697_v4, %v3567_v11 }
 0xc0b   : > { %v1699_v6 = vadd.f32 1e-06, %v1698_v5 }
 0xc0d   : > { %3242 = vrsqrt.f32 %v1699_v6  ;;  %vm1706_vm7 = vweird.f32 %v1699_v6 }
 0xc13   : > { %v3243_v7 = vpop.eup %3242 }
 0xc14   : > { %v1701_v8 = vmul.f32 %v3243_v7, %v1699_v6  ;;  %vm1707_vm4 = vweird.f32 %v3243_v7 }
 0xc15   : > { %vm1708_vm8 = vmor %vm1706_vm7, %vm1707_vm4 }
 0xc16   : > { %v1702_v9 = vmul.f32 %v3243_v7, %v1701_v8 }
 0xc18   : > { %v1703_v10 = vmul.f32 0.5, %v1702_v9 }
 0xc1a   : > { %v1704_v12 = vsub.f32 1.5, %v1703_v10 }
 0xc1c   : > { %v1705_v13 = vmul.f32 %v3243_v7, %v1704_v12 }
 0xc1e   : > { %v1709_v15 = vsel %vm1708_vm8, %v3243_v7, %v1705_v13 }
 0xc1f   : > { %v1710_v0 = vmul.f32 %v1709_v15, %v3700_v16 }
 0xc21   : > { %v1714_v17 = vmul.f32 %v3193_v14, %v1710_v0 }
 0xc23   : > { %v1715_v18 = vpack.c.bf16 %v1714_v17, %v1714_v17 }
 0xc25   : > { %2976 = vmatmul.msk.bf16.vlgmr.msra.gmra.mxu2 %vm657_vm0, %v1715_v18 }
 0xc69   : > { %v1595_v21 = vpop.f32.mrf.mxu3 }
 0xc6a   : > { %v3818_v22 = vadd.f32 %v1595_v21, %v3705_v20  ;;  %v3112_v20 = vld [vmem:[%s4136_s15] sm:$0xff] }
 0xc6b   : > { %1645 = vmatpush.bf16.msra.mxu0 %v3112_v20 }
 0xc6c   : > { %v1607_v19 = vmul.f32 %v3818_v22, %v3818_v22 }
 0xc6e   : > { %v1608_v23 = vsel %vm1013_vm9, %v1607_v19, 0.0 }
 0xc6f   : > { %1609 = vadd.xlane.f32.xlu1 %v1608_v23 }
 0xc71   : > { %v1597_v25 = vpop.f32.mrf.mxu3 }
 0xca8   : > { %v1740_v26 = vpop.f32.mrf.mxu2 }
 0xca9   : > { %v1744_v27 = vpack.c.bf16 %v1740_v26, %v1740_v26 }
 0xcab   : > { %1748 = vrot.lane.b32.xlu1 %v1744_v27, %s4203_s3  ;;  %1746 = vrot.lane.b32.xlu0 %v1744_v27, %s4202_s23  ;;  %v1752_v54 = vunpack.c.l.b16 %v1744_v27 }
 0xcac   : > { %1750 = vrot.lane.b32.xlu2 %v1744_v27, %s4207_s0  ;;  %s4211_s0 = smov 124  }
 0xcad   : > { %v3847_v45 = vpack.c.b16 %v1752_v54, %v1752_v54 }
 0xcb0   : > { %v1742_v28 = vpop.f32.mrf.mxu2 }
 0xce2   : > { %v1610_v29 = vpop.xlane.xlu1 %1609 }
 0xce3   : > { %v1611_v30 = vmul.f32 %v1610_v29, %v3713_v31 }
 0xce5   : > { %v1612_v24 = vadd.f32 1e-06, %v1611_v30 }
 0xce7   : > { %3244 = vrsqrt.f32 %v1612_v24  ;;  %vm1619_vm13 = vweird.f32 %v1612_v24 }
 0xced   : > { %v3245_v32 = vpop.eup %3244 }
 0xcee   : > { %v1614_v33 = vmul.f32 %v3245_v32, %v1612_v24  ;;  %vm1620_vm11 = vweird.f32 %v3245_v32 }
 0xcef   : > { %vm1621_vm14 = vmor %vm1619_vm13, %vm1620_vm11 }
 0xcf0   : > { %v1615_v34 = vmul.f32 %v3245_v32, %v1614_v33 }
 0xcf2   : > { %v1616_v35 = vmul.f32 0.5, %v1615_v34 }
 0xcf4   : > { %v1617_v36 = vsub.f32 1.5, %v1616_v35 }
 0xcf6   : > { %v1618_v37 = vmul.f32 %v3245_v32, %v1617_v36 }
 0xcf8   : > { %v1622_v39 = vsel %vm1621_vm14, %v3245_v32, %v1618_v37 }
 0xcf9   : > { %v1623_v40 = vmul.f32 %v1622_v39, %v3818_v22 }
 0xcfb   : > { %v1627_v41 = vmul.f32 %v3194_v38, %v1623_v40 }
 0xcfd   : > { %v1628_v42 = vpack.c.bf16 %v1627_v41, %v1627_v41 }
 0xcff   : > { %2949 = vmatmul.msk.bf16.vlgmr.msra.gmra.mxu0 %vm1013_vm9, %v1628_v42 }
 0xd06   : > { %v1751_v43 = vpop.permute.xlu2 %1750 }
 0xd07   : > { %v1821_v44 = vunpack.c.l.b16 %v1751_v43 }
 0xd09   : > { %v3835_v46 = vpack.c.b16 %v1821_v44, %v1821_v44 }
 0xd0b   : > { %1823 = vrot.lane.b32.xlu2 %v3835_v46, %s4205_s30 }
 0xd1d   : > { %v1749_v47 = vpop.permute.xlu1 %1748  ;;  %v1747_v48 = vpop.permute.xlu0 %1746 }
 0xd1e   : > { %v1798_v50 = vunpack.c.l.b16 %v1749_v47  ;;  %v1775_v51 = vunpack.c.l.b16 %v1747_v48 }
 0xd20   : > { %v3839_v52 = vpack.c.b16 %v1798_v50, %v1798_v50  ;;  %v3841_v53 = vpack.c.b16 %v1775_v51, %v1775_v51 }
 0xd22   : > { %1800 = vrot.lane.b32.xlu0 %v3839_v52, %s4205_s30  ;;  %1777 = vrot.lane.b32.xlu2 %v3841_v53, %s4205_s30 }
 0xd2a   : > { %1754 = vrot.lane.b32.xlu2 %v3847_v45, %s4205_s30 }
 0xd65   : > { %v1824_v56 = vpop.permute.xlu2 %1823 }
 0xd66   : > { %v1829_v57 = vsel %vm726_vm5, %v1824_v56, 0 }
 0xd67   : > { %1838 = vmatpush.bf16.xpose.msrb.mxu2 %v1829_v57 }
 0xd6e   : > { %2980 = vmatmul.msk.bf16.vlgmr.msrb.gmra.mxu2 %vm726_vm5, %v1751_v43 }
 0xd7c   : > { %v1647_v58 = vpop.f32.mrf.mxu0  ;;  %v1778_v59 = vpop.permute.xlu2 %1777 }
 0xd7d   : > { %v1651_v60 = vmax.f32 %v1647_v58, 0.0  ;;  %v1783_v61 = vsel %vm726_vm5, %v1778_v59, 0 }
 0xd7e   : > { %1792 = vmatpush.bf16.xpose.msrb.mxu0 %v1783_v61 }
 0xd7f   : > { %v1652_v62 = vpack.c.bf16 %v1651_v60, %v1651_v60 }
 0xd81   : > { %2958 = vmatmul.msk.bf16.vlgmr.msra.gmra.mxu1 %vm657_vm0, %v1652_v62 }
 0xd84   : > { %v1649_v63 = vpop.f32.mrf.mxu0  ;;  %v1755_v1 = vpop.permute.xlu2 %1754 }
 0xd85   : > { %v1760_v2 = vsel %vm726_vm5, %v1755_v1, 0  ;;  %2978 = vmatmul.msk.bf16.vlgmr.msrb.gmra.mxu0 %vm726_vm5, %v1747_v48 }
 0xd86   : > { %1769 = vmatpush.bf16.xpose.msra.mxu3 %v1760_v2 }
 0xd8d   : > { %2977 = vmatmul.msk.bf16.vlgmr.msra.gmra.mxu3 %vm726_vm5, %v1744_v27 }
 0xd94   : > { %v1801_v3 = vpop.permute.xlu0 %1800 }
 0xd95   : > { %v1806_v4 = vsel %vm726_vm5, %v1801_v3, 0 }
 0xd96   : > { %1815 = vmatpush.bf16.xpose.msrb.mxu1 %v1806_v4 }
 0xd9d   : > { %2979 = vmatmul.msk.bf16.vlgmr.msrb.gmra.mxu1 %vm726_vm5, %v1749_v47 }
 0xdf1   : > { %v1840_v5 = vpop.f32.mrf.mxu2 }
 0xdf2   : > { %v1853_v6 = vsel %vm726_vm5, %v1840_v5, -inf }
 0xdf3   : > { %1854 = vmax.xlane.f32.xlu0 %v1853_v6 }
 0xdf9   : > { %v1842_v7 = vpop.f32.mrf.mxu2 }
 0xdfe   : > { %v3867_v8 = vpop.f32.mrf.mxu1 }
 0xe02   : > { %v1794_v9 = vpop.f32.mrf.mxu0 }
 0xe03   : > { %v1847_v10 = vsel %vm726_vm5, %v1794_v9, -inf }
 0xe04   : > { %1848 = vmax.xlane.f32.xlu1 %v1847_v10 }
 0xe06   : > { %v1679_v12 = vpop.f32.mrf.mxu1 }
 0xe0a   : > { %v1796_v13 = vpop.f32.mrf.mxu0 }
 0xe10   : > { %v1771_v14 = vpop.f32.mrf.mxu3 }
 0xe11   : > { %v1844_v21 = vsel %vm726_vm5, %v1771_v14, -inf }
 0xe18   : > { %v1773_v15 = vpop.f32.mrf.mxu3 }
 0xe1a   : > { %v1817_v0 = vpop.f32.mrf.mxu1 }
 0xe1b   : > { %v1850_v17 = vsel %vm726_vm5, %v1817_v0, -inf }
 0xe1c   : > { %1851 = vmax.xlane.f32.xlu2 %v1850_v17 }
 0xe22   : > { %v1819_v18 = vpop.f32.mrf.mxu1 }
 0xe24   : > { %1845 = vmax.xlane.f32.xlu2 %v1844_v21 }
 0xe66   : > { %v1855_v19 = vpop.xlane.xlu0 %1854 }
 0xe67   : > { %v1859_v23 = vsub.f32 %v1840_v5, %v1855_v19 }
 0xe69   : > { %v1866_v25 = vmul.f32 1.442695, %v1859_v23 }
 0xe6b   : > { %3246 = vpow2.f32 %v1866_v25 }
 0xe71   : > { %v3247_v26 = vpop.eup %3246 }
 0xe72   : > { %v1877_v27 = vsel %vm726_vm5, %v3247_v26, 0.0 }
 0xe73   : > { %1878 = vadd.xlane.f32.xlu0 %v1877_v27 }
 0xe77   : > { %v1849_v28 = vpop.xlane.xlu1 %1848 }
 0xe78   : > { %v1857_v20 = vsub.f32 %v1794_v9, %v1849_v28 }
 0xe7a   : > { %v1862_v29 = vmul.f32 1.442695, %v1857_v20 }
 0xe7c   : > { %3248 = vpow2.f32 %v1862_v29 }
 0xe82   : > { %v3249_v30 = vpop.eup %3248 }
 0xe83   : > { %v1871_v24 = vsel %vm726_vm5, %v3249_v30, 0.0 }
 0xe84   : > { %1872 = vadd.xlane.f32.xlu1 %v1871_v24 }
 0xe87   : > { %2007 = vrot.lane.b32.xlu0 %v3835_v46, %s4208_s1 }
 0xe8f   : > { %v1852_v32 = vpop.xlane.xlu2 %1851 }
 0xe90   : > { %v1858_v33 = vsub.f32 %v1817_v0, %v1852_v32 }
 0xe92   : > { %v1864_v34 = vmul.f32 1.442695, %v1858_v33 }
 0xe94   : > { %3250 = vpow2.f32 %v1864_v34 }
 0xe97   : > { %v1846_v37 = vpop.xlane.xlu2 %1845 }
 0xe98   : > { %v1856_v38 = vsub.f32 %v1771_v14, %v1846_v37 }
 0xe9a   : > { %v3876_v35 = vpop.eup %3250  ;;  %v1860_v39 = vmul.f32 1.442695, %v1856_v38 }
 0xe9b   : > { %v1874_v36 = vsel %vm726_vm5, %v3876_v35, 0.0 }
 0xe9c   : > { %1875 = vadd.xlane.f32.xlu2 %v1874_v36  ;;  %3252 = vpow2.f32 %v1860_v39 }
 0xe9d   : > { %1965 = vrot.lane.b32.xlu1 %v3841_v53, %s4208_s1 }
 0xea2   : > { %v3884_v40 = vpop.eup %3252 }
 0xea3   : > { %v1868_v41 = vsel %vm726_vm5, %v3884_v40, 0.0 }
 0xea5   : > { %1944 = vrot.lane.b32.xlu1 %v3847_v45, %s4208_s1 }
 0xeb1   : > { %1869 = vadd.xlane.f32.xlu0 %v1868_v41 }
 0xeb4   : > { %1986 = vrot.lane.b32.xlu2 %v3839_v52, %s4208_s1  ;;  %s4212_s1 = smov 116  }
 0xee6   : > { %v1879_v42 = vpop.xlane.xlu0 %1878 }
 0xee7   : > { %3254 = vrcp.f32 %v1879_v42  ;;  %v1936_v47 = vand.u32 2147483648, %v1879_v42  ;;  %v1934_v50 = vand.u32 2147483647, %v1879_v42  ;;  %vm1930_vm2 = vweird.f32 %v1879_v42 }
 0xee9   : > { %v1937_v53 = vor.u32 1.1754944e-38, %v1936_v47  ;;  %vm1935_vm7 = vcmp.eq.f32.partialorder %v1934_v50, 8.507059e+37 }
 0xeed   : > { %v3255_v43 = vpop.eup %3254 }
 0xeee   : > { %v1926_v44 = vmul.f32 %v3255_v43, %v1879_v42  ;;  %vm1931_vm1 = vweird.f32 %v3255_v43 }
 0xeef   : > { %vm1932_vm4 = vmor %vm1930_vm2, %vm1931_vm1 }
 0xef0   : > { %v1927_v46 = vsub.f32 1.0, %v1926_v44 }
 0xef2   : > { %v1928_v48 = vmul.f32 %v3255_v43, %v1927_v46 }
 0xef4   : > { %v1929_v51 = vadd.f32 %v3255_v43, %v1928_v48 }
 0xef6   : > { %v1933_v54 = vsel %vm1932_vm4, %v3255_v43, %v1929_v51 }
 0xef7   : > { %v1938_v45 = vsel %vm1935_vm7, %v1937_v53, %v1933_v54  ;;  %v1873_v55 = vpop.xlane.xlu1 %1872 }
 0xef8   : > { %v1939_v49 = vmul.f32 %v3247_v26, %v1938_v45  ;;  %3256 = vrcp.f32 %v1873_v55  ;;  %v1906_v63 = vand.u32 2147483648, %v1873_v55  ;;  %vm1900_vm11 = vweird.f32 %v1873_v55  ;;  %v3117_v45 = vld [vmem:[%s4194_s7 + $0x10] sm:$0xff] }
 0xef9   : > { %v2008_v52 = vpop.permute.xlu0 %2007  ;;  %v1904_v1 = vand.u32 2147483647, %v1873_v55 }
 0xefa   : > { %v2013_v56 = vsel %vm920_vm12, %v2008_v52, 0  ;;  %v1943_v57 = vpack.c.bf16 %v1939_v49, %v1939_v49  ;;  %v1907_v3 = vor.u32 1.1754944e-38, %v1906_v63 }
 0xefb   : > { %2022 = vmatpush.bf16.msra.mxu2 %v2013_v56  ;;  %vm1905_vm14 = vcmp.eq.f32.partialorder %v1904_v1, 8.507059e+37 }
 0xefe   : > { %v3257_v58 = vpop.eup %3256  ;;  %2984 = vmatmul.msk.bf16.vlgmr.msra.gmra.mxu2 %vm726_vm5, %v1943_v57 }
 0xeff   : > { %v1896_v59 = vmul.f32 %v3257_v58, %v1873_v55  ;;  %vm1901_vm8 = vweird.f32 %v3257_v58 }
 0xf00   : > { %vm1902_vm13 = vmor %vm1900_vm11, %vm1901_vm8 }
 0xf01   : > { %v1897_v60 = vsub.f32 1.0, %v1896_v59 }
 0xf03   : > { %v1898_v61 = vmul.f32 %v3257_v58, %v1897_v60 }
 0xf05   : > { %v1899_v62 = vadd.f32 %v3257_v58, %v1898_v61 }
 0xf07   : > { %v1903_v2 = vsel %vm1902_vm13, %v3257_v58, %v1899_v62 }
 0xf08   : > { %v1908_v4 = vsel %vm1905_vm14, %v1907_v3, %v1903_v2  ;;  %v3120_v2 = vld [vmem:[%s4195_s9 + $0x18] sm:$0xff]  ;;  %v3119_v3 = vld [vmem:[%s4195_s9 + $0x10] sm:$0xff]  ;;  %s3308_s9 = scalar_lea.hbm %s4140_s19, 16 }
 0xf09   : > { %v1909_v5 = vmul.f32 %v3249_v30, %v1908_v4  ;;  %v3124_v4 = vld [vmem:[%s4196_s10 + $0x38] sm:$0xff] }
 0xf0b   : > { %v1941_v10 = vpack.c.bf16 %v1909_v5, %v1909_v5 }
 0xf0f   : > { %v1966_v6 = vpop.permute.xlu1 %1965  ;;  %v1876_v7 = vpop.xlane.xlu2 %1875 }
 0xf10   : > { %v1971_v9 = vsel %vm920_vm12, %v1966_v6, 0  ;;  %3258 = vrcp.f32 %v1876_v7  ;;  %v1921_v21 = vand.u32 2147483648, %v1876_v7  ;;  %v1919_v23 = vand.u32 2147483647, %v1876_v7 }
 0xf11   : > { %1980 = vmatpush.bf16.msra.mxu0 %v1971_v9  ;;  %vm1915_vm2 = vweird.f32 %v1876_v7  ;;  %v3122_v9 = vld [vmem:[%s4196_s10 + $0x28] sm:$0xff] }
 0xf12   : > { %v1922_v26 = vor.u32 1.1754944e-38, %v1921_v21  ;;  %vm1920_vm7 = vcmp.eq.f32.partialorder %v1919_v23, 8.507059e+37 }
 0xf14   : > { %2982 = vmatmul.msk.bf16.vlgmr.msra.gmra.mxu0 %vm726_vm5, %v1941_v10 }
 0xf15   : > { %2132 = vmatpush.bf16.msrb.mxu0 %v3120_v2 }
 0xf16   : > { %v3259_v12 = vpop.eup %3258 }
 0xf17   : > { %v1911_v13 = vmul.f32 %v3259_v12, %v1876_v7  ;;  %v1945_v14 = vpop.permute.xlu1 %1944  ;;  %v1987_v15 = vpop.permute.xlu2 %1986  ;;  %vm1916_vm1 = vweird.f32 %v3259_v12 }
 0xf18   : > { %v1950_v0 = vsel %vm920_vm12, %v1945_v14, 0  ;;  %v1992_v17 = vsel %vm920_vm12, %v1987_v15, 0  ;;  %vm1917_vm4 = vmor %vm1915_vm2, %vm1916_vm1 }
 0xf19   : > { %v1912_v18 = vsub.f32 1.0, %v1911_v13  ;;  %1959 = vmatpush.bf16.msrb.mxu3 %v1950_v0  ;;  %2001 = vmatpush.bf16.msra.mxu1 %v1992_v17  ;;  %v3195_v17 = vld [vmem:[%s4197_s8 + $0x1] ss:$0 sm:$0xff] }
 0xf1a   : > { %2133 = vmatpush.bf16.msrb.mxu0 %v3119_v3 }
 0xf1b   : > { %v1913_v19 = vmul.f32 %v3259_v12, %v1912_v18 }
 0xf1d   : > { %v1914_v25 = vadd.f32 %v3259_v12, %v1913_v19  ;;  %2172 = vmatpush.bf16.msrb.mxu1 %v3124_v4 }
 0xf1f   : > { %v1918_v27 = vsel %vm1917_vm4, %v3259_v12, %v1914_v25  ;;  %v3121_v25 = vld [vmem:[%s4196_s10 + $0x20] sm:$0xff] }
 0xf20   : > { %v1923_v28 = vsel %vm1920_vm7, %v1922_v26, %v1918_v27  ;;  %v3126_v26 = vld [vmem:[%s4200_s25 + $0x18] sm:$0xff] }
 0xf21   : > { %v1924_v20 = vmul.f32 %v3876_v35, %v1923_v28  ;;  %2209 = vmatpush.bf16.msrb.mxu2 %v3126_v26 }
 0xf23   : > { %v1942_v29 = vpack.c.bf16 %v1924_v20, %v1924_v20 }
 0xf24   : > { %v1870_v30 = vpop.xlane.xlu0 %1869 }
 0xf25   : > { %3260 = vrcp.f32 %v1870_v30  ;;  %2983 = vmatmul.msk.bf16.vlgmr.msra.gmra.mxu1 %vm726_vm5, %v1942_v29  ;;  %v1891_v34 = vand.u32 2147483648, %v1870_v30  ;;  %v1889_v37 = vand.u32 2147483647, %v1870_v30  ;;  %vm1885_vm11 = vweird.f32 %v1870_v30 }
 0xf27   : > { %v1892_v39 = vor.u32 1.1754944e-38, %v1891_v34  ;;  %vm1890_vm14 = vcmp.eq.f32.partialorder %v1889_v37, 8.507059e+37 }
 0xf2b   : > { %v3261_v24 = vpop.eup %3260 }
 0xf2c   : > { %v1881_v32 = vmul.f32 %v3261_v24, %v1870_v30  ;;  %vm1886_vm8 = vweird.f32 %v3261_v24  ;;  %v3125_v30 = vld [vmem:[%s4200_s25 + $0x10] sm:$0xff] }
 0xf2d   : > { %vm1887_vm13 = vmor %vm1885_vm11, %vm1886_vm8  ;;  %2210 = vmatpush.bf16.msrb.mxu2 %v3125_v30 }
 0xf2e   : > { %v1882_v33 = vsub.f32 1.0, %v1881_v32 }
 0xf30   : > { %v1883_v36 = vmul.f32 %v3261_v24, %v1882_v33 }
 0xf32   : > { %v1884_v38 = vadd.f32 %v3261_v24, %v1883_v36  ;;  %v1681_v36 = vadd.f32 %v3867_v8, %v3818_v22 }
 0xf34   : > { %v1888_v41 = vsel %vm1887_vm13, %v3261_v24, %v1884_v38 }
 0xf35   : > { %v1893_v42 = vsel %vm1890_vm14, %v1892_v39, %v1888_v41 }
 0xf36   : > { %v1894_v35 = vmul.f32 %v3884_v40, %v1893_v42  ;;  %v3118_v40 = vld [vmem:[%s4194_s7 + $0x18] sm:$0xff] }
 0xf37   : > { %2065 = vmatpush.bf16.msra.mxu3 %v3118_v40 }
 0xf38   : > { %v1940_v43 = vpack.c.bf16 %v1894_v35, %v1894_v35  ;;  %v3127_v35 = vld [vmem:[%s4133_s12 + $0x8] sm:$0xff] }
 0xf3a   : > { %2981 = vmatmul.msk.bf16.vlgmr.msrb.gmra.mxu3 %vm726_vm5, %v1940_v43 }
 0xf3b   : > { %2066 = vmatpush.bf16.msra.mxu3 %v3117_v45 }
 0xf3f   : > { %2263 = vmatpush.bf16.msrb.mxu3 %v3127_v35 }
 0xf81   : > { %v2024_v44 = vpop.f32.mrf.mxu2 }
 0xf89   : > { %v2026_v46 = vpop.f32.mrf.mxu2 }
 0xf91   : > { %v1982_v47 = vpop.f32.mrf.mxu0 }
 0xf92   : > { %2029 = vrot.lane.b32.xlu2 %v1982_v47, %s4206_s28 }
 0xf99   : > { %v1984_v48 = vpop.f32.mrf.mxu0 }
 0xf9a   : > { %2037 = vrot.lane.b32.xlu2 %v2024_v44, %s4209_s27 }
 0xfa2   : > { %v2003_v50 = vpop.f32.mrf.mxu1 }
 0xfa3   : > { %2033 = vrot.lane.b32.xlu1 %v2003_v50, %s4210_s21 }
 0xfaa   : > { %v2005_v51 = vpop.f32.mrf.mxu1 }
 0xfbd   : > { %v1961_v53 = vpop.f32.mrf.mxu3 }
 0xfc5   : > { %v1963_v54 = vpop.f32.mrf.mxu3 }
 0xfec   : > { %v2030_v55 = vpop.permute.xlu2 %2029 }
 0xfed   : > { %v2040_v49 = vsel %vm726_vm5, %v1961_v53, %v2030_v55  ;;  %v3196_v53 = vld [vmem:[%s4201_s11 + $0x1] ss:$0 sm:$0xff] }
 0xff4   : > { %v2038_v56 = vpop.permute.xlu2 %2037 }
0x1015   : > { %v2034_v52 = vpop.permute.xlu1 %2033 }
0x1016   : > { %v2041_v57 = vsel %vm1013_vm9, %v2040_v49, %v2034_v52 }
0x1017   : > { %v2042_v58 = vsel %vm1015_vm10, %v2041_v57, %v2038_v56 }
0x1018   : > { %v2043_v59 = vpack.c.bf16 %v2042_v58, %v2042_v58 }
0x101a   : > { %2993 = vmatmul.msk.bf16.vlgmr.msra.gmra.mxu3 %vm657_vm0, %v2043_v59 }
0x109d   : > { %v2068_v60 = vpop.f32.mrf.mxu3 }
0x109e   : > { %v2072_v61 = vadd.f32 %v2068_v60, %v3700_v16  ;;  %v3123_v16 = vld [vmem:[%s4196_s10 + $0x30] sm:$0xff] }
0x109f   : > { %2173 = vmatpush.bf16.msrb.mxu1 %v3123_v16 }
0x10a0   : > { %v2089_v62 = vmul.f32 %v2072_v61, %v2072_v61 }
0x10a2   : > { %v2090_v63 = vsel %vm657_vm0, %v2089_v62, 0.0 }
0x10a3   : > { %2091 = vadd.xlane.f32.xlu1 %v2090_v63  ;;  %2174 = vmatpush.bf16.msrb.mxu1 %v3122_v9 }
0x10a5   : > { %v2070_v1 = vpop.f32.mrf.mxu3 }
0x10a7   : > { %2175 = vmatpush.bf16.msrb.mxu1 %v3121_v25 }
0x1116   : > { %v2092_v5 = vpop.xlane.xlu1 %2091 }
0x1117   : > { %v2093_v6 = vmul.f32 %v2092_v5, %v3567_v11 }
0x1119   : > { %v2094_v7 = vadd.f32 1e-06, %v2093_v6 }
0x111b   : > { %3262 = vrsqrt.f32 %v2094_v7  ;;  %vm2101_vm1 = vweird.f32 %v2094_v7 }
0x1121   : > { %v3263_v10 = vpop.eup %3262 }
0x1122   : > { %v2096_v12 = vmul.f32 %v3263_v10, %v2094_v7  ;;  %vm2102_vm10 = vweird.f32 %v3263_v10 }
0x1123   : > { %vm2103_vm2 = vmor %vm2101_vm1, %vm2102_vm10 }
0x1124   : > { %v2097_v13 = vmul.f32 %v3263_v10, %v2096_v12 }
0x1126   : > { %v2098_v14 = vmul.f32 0.5, %v2097_v13 }
0x1128   : > { %v2099_v15 = vsub.f32 1.5, %v2098_v14 }
0x112a   : > { %v2100_v0 = vmul.f32 %v3263_v10, %v2099_v15 }
0x112c   : > { %v2104_v18 = vsel %vm2103_vm2, %v3263_v10, %v2100_v0 }
0x112d   : > { %v2105_v21 = vmul.f32 %v2104_v18, %v2072_v61 }
0x112f   : > { %v2109_v19 = vmul.f32 %v3195_v17, %v2105_v21 }
0x1131   : > { %v2110_v23 = vpack.c.bf16 %v2109_v19, %v2109_v19 }
0x1133   : > { %3015 = vmatmul.msk.bf16.vlgmr.msrb.gmra.mxu0 %vm657_vm0, %v2110_v23 }
0x11b0   : > { %v2135_v27 = vpop.f32.mrf.mxu0 }
0x11b1   : > { %v2139_v28 = vmax.f32 %v2135_v27, 0.0 }
0x11b3   : > { %v2140_v20 = vpack.c.bf16 %v2139_v28, %v2139_v28 }
0x11b5   : > { %3032 = vmatmul.msk.bf16.vlgmr.msrb.gmra.mxu1 %vm1136_vm15, %v2140_v20 }
0x11b8   : > { %v2137_v29 = vpop.f32.mrf.mxu0 }
0x1232   : > { %v2177_v24 = vpop.f32.mrf.mxu1 }
0x1233   : > { %v3945_v32 = vadd.f32 %v2177_v24, %v2072_v61 }
0x1235   : > { %v2182_v33 = vpack.c.bf16 %v3945_v32, %v3945_v32 }
0x1237   : > { %3045 = vmatmul.msk.bf16.vlgmr.msrb.gmra.mxu2 %vm657_vm0, %v2182_v33 }
0x123a   : > { %v2179_v34 = vpop.f32.mrf.mxu1 }
0x12ba   : > { %v2212_v37 = vpop.f32.mrf.mxu2 }
0x12bb   : > { %v3952_v38 = vadd.f32 %v2212_v37, %v1681_v36 }
0x12bd   : > { %v2225_v39 = vmul.f32 %v3952_v38, %v3952_v38 }
0x12bf   : > { %v2226_v41 = vsel %vm1013_vm9, %v2225_v39, 0.0 }
0x12c0   : > { %2227 = vadd.xlane.f32.xlu2 %v2226_v41 }
0x12c2   : > { %v2214_v42 = vpop.f32.mrf.mxu2 }
0x1333   : > { %v2228_v43 = vpop.xlane.xlu2 %2227 }
0x1334   : > { %v2229_v44 = vmul.f32 %v2228_v43, %v3713_v31 }
0x1336   : > { %v2230_v46 = vadd.f32 1e-06, %v2229_v44 }
0x1338   : > { %3264 = vrsqrt.f32 %v2230_v46  ;;  %vm2237_vm4 = vweird.f32 %v2230_v46 }
0x133e   : > { %v3265_v22 = vpop.eup %3264 }
0x133f   : > { %v2232_v8 = vmul.f32 %v3265_v22, %v2230_v46  ;;  %vm2238_vm15 = vweird.f32 %v3265_v22 }
0x1340   : > { %vm2239_vm7 = vmor %vm2237_vm4, %vm2238_vm15 }
0x1341   : > { %v2233_v47 = vmul.f32 %v3265_v22, %v2232_v8 }
0x1343   : > { %v2234_v48 = vmul.f32 0.5, %v2233_v47 }
0x1345   : > { %v2235_v50 = vsub.f32 1.5, %v2234_v48 }
0x1347   : > { %v2236_v51 = vmul.f32 %v3265_v22, %v2235_v50 }
0x1349   : > { %v2240_v54 = vsel %vm2239_vm7, %v3265_v22, %v2236_v51 }
0x134a   : > { %v2241_v40 = vmul.f32 %v2240_v54, %v3952_v38 }
0x134c   : > { %v2245_v45 = vmul.f32 %v3196_v53, %v2241_v40 }
0x134e   : > { %v2246_v55 = vpack.c.bf16 %v2245_v45, %v2245_v45 }
0x1350   : > { %3055 = vmatmul.msk.bf16.vlgmr.msrb.gmra.mxu3 %vm1013_vm9, %v2246_v55 }
0x13d3   : > { %v2265_v49 = vpop.f32.mrf.mxu3 }
0x13d4   : > { %v2269_v52 = vpack.c.bf16 %v2265_v49, %v2265_v49 }
0x13d6   : > { %2271 = vrot.lane.b32.xlu1 %v2269_v52, %s4211_s0  ;;  %2273 = vrot.lane.b32.xlu0 %v2269_v52, %s4202_s23  ;;  %v2277_v3 = vunpack.c.l.b16 %v2269_v52  ;;  %s4213_s23 = smov 4  }
0x13d8   : > { %v2278_v4 = vpack.c.b16 %v2277_v3, %v2277_v3 }
0x13db   : > { %v2267_v56 = vpop.f32.mrf.mxu3 }
0x13de   : > { %2275 = vrot.lane.b32.xlu0 %v2269_v52, %s4212_s1  ;;  %s2739_s1 = scalar_lea.hbm %s4140_s19, %s3092_s26 }
0x1448   : > { %v2274_v57 = vpop.permute.xlu0 %2273  ;;  %v2272_v63 = vpop.permute.xlu1 %2271 }
0x1449   : > { %v2323_v58 = vunpack.c.l.b16 %v2274_v57  ;;  %v2300_v1 = vunpack.c.l.b16 %v2272_v63 }
0x144b   : > { %v2324_v59 = vpack.c.b16 %v2323_v58, %v2323_v58  ;;  %v2301_v2 = vpack.c.b16 %v2300_v1, %v2300_v1 }
0x144d   : > { %2325 = vrot.lane.b32.xlu2 %v2324_v59, %s4203_s3 }
0x1450   : > { %v2276_v60 = vpop.permute.xlu0 %2275 }
0x1451   : > { %v2346_v61 = vunpack.c.l.b16 %v2276_v60 }
0x1453   : > { %v3970_v62 = vpack.c.b16 %v2346_v61, %v2346_v61 }
0x1455   : > { %2348 = vrot.lane.b32.xlu0 %v3970_v62, %s4203_s3 }
0x145d   : > { %2302 = vrot.lane.b32.xlu0 %v2301_v2, %s4203_s3 }
0x1465   : > { %2279 = vrot.lane.b32.xlu0 %v2278_v4, %s4203_s3  ;;  %s4214_s3 = smov 12  }
0x14a7   : > { %v2326_v16 = vpop.permute.xlu2 %2325 }
0x14a8   : > { %v2331_v5 = vsel %vm1287_vm6, %v2326_v16, 0 }
0x14a9   : > { %2340 = vmatpush.bf16.xpose.msra.mxu2 %v2331_v5 }
0x14b0   : > { %3058 = vmatmul.msk.bf16.vlgmr.msra.gmra.mxu2 %vm1287_vm6, %v2274_v57 }
0x14c7   : > { %v2349_v6 = vpop.permute.xlu0 %2348 }
0x14c8   : > { %v2354_v7 = vsel %vm1287_vm6, %v2349_v6, 0 }
0x14c9   : > { %2363 = vmatpush.bf16.xpose.msra.mxu3 %v2354_v7 }
0x14cf   : > { %v2303_v9 = vpop.permute.xlu0 %2302 }
0x14d0   : > { %v2308_v10 = vsel %vm1287_vm6, %v2303_v9, 0  ;;  %3059 = vmatmul.msk.bf16.vlgmr.msra.gmra.mxu3 %vm1287_vm6, %v2276_v60 }
0x14d1   : > { %2317 = vmatpush.bf16.xpose.msra.mxu1 %v2308_v10 }
0x14d7   : > { %v2280_v12 = vpop.permute.xlu0 %2279 }
0x14d8   : > { %v2285_v13 = vsel %vm1287_vm6, %v2280_v12, 0  ;;  %3057 = vmatmul.msk.bf16.vlgmr.msra.gmra.mxu1 %vm1287_vm6, %v2272_v63 }
0x14d9   : > { %2294 = vmatpush.bf16.xpose.msra.mxu0 %v2285_v13 }
0x14e0   : > { %3056 = vmatmul.msk.bf16.vlgmr.msra.gmra.mxu0 %vm1287_vm6, %v2269_v52 }
0x1533   : > { %v2342_v14 = vpop.f32.mrf.mxu2 }
0x1534   : > { %v2375_v15 = vsel %vm726_vm5, %v2342_v14, -inf }
0x1535   : > { %2376 = vmax.xlane.f32.xlu1 %v2375_v15 }
0x153b   : > { %v2344_v0 = vpop.f32.mrf.mxu2 }
0x1553   : > { %v2365_v17 = vpop.f32.mrf.mxu3 }
0x1554   : > { %v2378_v18 = vsel %vm726_vm5, %v2365_v17, -inf }
0x1555   : > { %v2319_v21 = vpop.f32.mrf.mxu1  ;;  %2379 = vmax.xlane.f32.xlu2 %v2378_v18 }
0x1556   : > { %v2372_v19 = vsel %vm726_vm5, %v2319_v21, -inf }
0x1557   : > { %2373 = vmax.xlane.f32.xlu0 %v2372_v19 }
0x155b   : > { %v2367_v23 = vpop.f32.mrf.mxu3 }
0x155d   : > { %v2296_v25 = vpop.f32.mrf.mxu0  ;;  %v2321_v26 = vpop.f32.mrf.mxu1 }
0x155e   : > { %v2369_v27 = vsel %vm726_vm5, %v2296_v25, -inf }
0x155f   : > { %2370 = vmax.xlane.f32.xlu1 %v2369_v27 }
0x1565   : > { %v2298_v28 = vpop.f32.mrf.mxu0 }
0x15a8   : > { %v2377_v20 = vpop.xlane.xlu1 %2376 }
0x15a9   : > { %v2383_v29 = vsub.f32 %v2342_v14, %v2377_v20 }
0x15ab   : > { %v2389_v30 = vmul.f32 1.442695, %v2383_v29 }
0x15ad   : > { %3266 = vpow2.f32 %v2389_v30 }
0x15b3   : > { %v3267_v24 = vpop.eup %3266 }
0x15b4   : > { %v2399_v33 = vsel %vm726_vm5, %v3267_v24, 0.0 }
0x15b5   : > { %2400 = vadd.xlane.f32.xlu2 %v2399_v33 }
0x15c8   : > { %v2380_v34 = vpop.xlane.xlu2 %2379 }
0x15c9   : > { %v2384_v36 = vsub.f32 %v2365_v17, %v2380_v34 }
0x15ca   : > { %v2374_v37 = vpop.xlane.xlu0 %2373 }
0x15cb   : > { %v2391_v39 = vmul.f32 1.442695, %v2384_v36  ;;  %v2382_v41 = vsub.f32 %v2319_v21, %v2374_v37 }
0x15cd   : > { %3268 = vpow2.f32 %v2391_v39  ;;  %v2387_v42 = vmul.f32 1.442695, %v2382_v41  ;;  %2511 = vrot.lane.b32.xlu2 %v2324_v59, %s4205_s30 }
0x15cf   : > { %3270 = vpow2.f32 %v2387_v42 }
0x15d2   : > { %v2371_v22 = vpop.xlane.xlu1 %2370 }
0x15d3   : > { %v3990_v35 = vpop.eup %3268  ;;  %v2381_v8 = vsub.f32 %v2296_v25, %v2371_v22 }
0x15d4   : > { %v2402_v43 = vsel %vm726_vm5, %v3990_v35, 0.0 }
0x15d5   : > { %v3994_v44 = vpop.eup %3270  ;;  %2403 = vadd.xlane.f32.xlu0 %v2402_v43  ;;  %2469 = vrot.lane.b32.xlu2 %v2278_v4, %s4205_s30  ;;  %v2385_v47 = vmul.f32 1.442695, %v2381_v8 }
0x15d6   : > { %v2396_v46 = vsel %vm726_vm5, %v3994_v44, 0.0 }
0x15d7   : > { %2397 = vadd.xlane.f32.xlu1 %v2396_v46  ;;  %3272 = vpow2.f32 %v2385_v47 }
0x15dd   : > { %v4002_v48 = vpop.eup %3272 }
0x15de   : > { %v2393_v50 = vsel %vm726_vm5, %v4002_v48, 0.0 }
0x15e9   : > { %2532 = vrot.lane.b32.xlu0 %v3970_v62, %s4205_s30 }
0x15f0   : > { %2490 = vrot.lane.b32.xlu1 %v2301_v2, %s4205_s30 }
0x1613   : > { %2394 = vadd.xlane.f32.xlu0 %v2393_v50 }
0x1628   : > { %v2401_v51 = vpop.xlane.xlu2 %2400 }
0x1629   : > { %3274 = vrcp.f32 %v2401_v51  ;;  %v2446_v49 = vand.u32 2147483648, %v2401_v51  ;;  %v2444_v56 = vand.u32 2147483647, %v2401_v51  ;;  %vm2440_vm11 = vweird.f32 %v2401_v51 }
0x162b   : > { %v2447_v58 = vor.u32 1.1754944e-38, %v2446_v49  ;;  %vm2445_vm14 = vcmp.eq.f32.partialorder %v2444_v56, 8.507059e+37 }
0x162f   : > { %v3275_v53 = vpop.eup %3274 }
0x1630   : > { %v2436_v54 = vmul.f32 %v3275_v53, %v2401_v51  ;;  %v2512_v40 = vpop.permute.xlu2 %2511  ;;  %vm2441_vm8 = vweird.f32 %v3275_v53 }
0x1631   : > { %v2517_v45 = vsel %vm920_vm12, %v2512_v40, 0  ;;  %vm2442_vm13 = vmor %vm2440_vm11, %vm2441_vm8 }
0x1632   : > { %v2437_v55 = vsub.f32 1.0, %v2436_v54  ;;  %2526 = vmatpush.bf16.msrb.mxu2 %v2517_v45 }
0x1634   : > { %v2438_v52 = vmul.f32 %v3275_v53, %v2437_v55 }
0x1636   : > { %v2439_v57 = vadd.f32 %v3275_v53, %v2438_v52  ;;  %v2678_v52 = vmul.f32 %v3945_v32, %v3945_v32 }
0x1638   : > { %v2443_v59 = vsel %vm2442_vm13, %v3275_v53, %v2439_v57  ;;  %v2470_v60 = vpop.permute.xlu2 %2469 }
0x1639   : > { %v2448_v61 = vsel %vm2445_vm14, %v2447_v58, %v2443_v59  ;;  %v2475_v62 = vsel %vm920_vm12, %v2470_v60, 0  ;;  %v3128_v58 = vld [vmem:[%s4134_s13 + $0x8] sm:$0xff] }
0x163a   : > { %v2449_v63 = vmul.f32 %v3267_v24, %v2448_v61  ;;  %2484 = vmatpush.bf16.msrb.mxu0 %v2475_v62 }
0x163c   : > { %v2467_v1 = vpack.c.bf16 %v2449_v63, %v2449_v63 }
0x163e   : > { %3062 = vmatmul.msk.bf16.vlgmr.msrb.gmra.mxu2 %vm726_vm5, %v2467_v1  ;;  %2585 = vmatpush.bf16.msra.mxu0 %v3128_v58 }
0x1648   : > { %v2404_v2 = vpop.xlane.xlu0 %2403 }
0x1649   : > { %3276 = vrcp.f32 %v2404_v2  ;;  %v2461_v9 = vand.u32 2147483648, %v2404_v2  ;;  %v2459_v12 = vand.u32 2147483647, %v2404_v2  ;;  %vm2455_vm1 = vweird.f32 %v2404_v2 }
0x164a   : > { %v2398_v3 = vpop.xlane.xlu1 %2397 }
0x164b   : > { %3278 = vrcp.f32 %v2398_v3  ;;  %v2462_v0 = vor.u32 1.1754944e-38, %v2461_v9  ;;  %vm2460_vm4 = vcmp.eq.f32.partialorder %v2459_v12, 8.507059e+37  ;;  %v2431_v21 = vand.u32 2147483648, %v2398_v3 }
0x164c   : > { %vm2425_vm7 = vweird.f32 %v2398_v3  ;;  %v2429_v23 = vand.u32 2147483647, %v2398_v3 }
0x164d   : > { %v2432_v28 = vor.u32 1.1754944e-38, %v2431_v21 }
0x164e   : > { %vm2430_vm11 = vcmp.eq.f32.partialorder %v2429_v23, 8.507059e+37  ;;  %v3129_v23 = vld [vmem:[%s4136_s15 + $0x8] sm:$0xff] }
0x164f   : > { %v3277_v4 = vpop.eup %3276 }
0x1650   : > { %v2451_v16 = vmul.f32 %v3277_v4, %v2404_v2  ;;  %vm2456_vm10 = vweird.f32 %v3277_v4 }
0x1651   : > { %v3279_v5 = vpop.eup %3278  ;;  %vm2457_vm2 = vmor %vm2455_vm1, %vm2456_vm10 }
0x1652   : > { %v2452_v6 = vsub.f32 1.0, %v2451_v16  ;;  %v2421_v7 = vmul.f32 %v3279_v5, %v2398_v3  ;;  %vm2426_vm15 = vweird.f32 %v3279_v5 }
0x1653   : > { %vm2427_vm8 = vmor %vm2425_vm7, %vm2426_vm15 }
0x1654   : > { %v2453_v10 = vmul.f32 %v3277_v4, %v2452_v6  ;;  %v2422_v13 = vsub.f32 1.0, %v2421_v7 }
0x1656   : > { %v2454_v14 = vadd.f32 %v3277_v4, %v2453_v10  ;;  %v2423_v15 = vmul.f32 %v3279_v5, %v2422_v13 }
0x1658   : > { %v2458_v17 = vsel %vm2457_vm2, %v3277_v4, %v2454_v14  ;;  %v2424_v18 = vadd.f32 %v3279_v5, %v2423_v15 }
0x1659   : > { %v2463_v19 = vsel %vm2460_vm4, %v2462_v0, %v2458_v17 }
0x165a   : > { %v2464_v25 = vmul.f32 %v3990_v35, %v2463_v19  ;;  %v2428_v26 = vsel %vm2427_vm8, %v3279_v5, %v2424_v18 }
0x165b   : > { %v2533_v27 = vpop.permute.xlu0 %2532  ;;  %v2433_v29 = vsel %vm2430_vm11, %v2432_v28, %v2428_v26 }
0x165c   : > { %v2538_v20 = vsel %vm920_vm12, %v2533_v27, 0  ;;  %v2468_v30 = vpack.c.bf16 %v2464_v25, %v2464_v25  ;;  %v2434_v24 = vmul.f32 %v3994_v44, %v2433_v29 }
0x165d   : > { %2547 = vmatpush.bf16.msrb.mxu3 %v2538_v20 }
0x165e   : > { %v2466_v36 = vpack.c.bf16 %v2434_v24, %v2434_v24 }
0x1660   : > { %3063 = vmatmul.msk.bf16.vlgmr.msrb.gmra.mxu3 %vm726_vm5, %v2468_v30 }
0x1662   : > { %v2491_v33 = vpop.permute.xlu1 %2490 }
0x1663   : > { %v2496_v34 = vsel %vm920_vm12, %v2491_v33, 0  ;;  %v3197_v33 = vld [vmem:[%s4135_s14 + $0x1] ss:$0 sm:$0xff] }
0x1664   : > { %2505 = vmatpush.bf16.msrb.mxu1 %v2496_v34 }
0x1667   : > { %3061 = vmatmul.msk.bf16.vlgmr.msrb.gmra.mxu1 %vm726_vm5, %v2466_v36 }
0x1668   : > { %2640 = vmatpush.bf16.msra.mxu1 %v3129_v23 }
0x1686   : > { %v2395_v37 = vpop.xlane.xlu0 %2394 }
0x1687   : > { %3280 = vrcp.f32 %v2395_v37  ;;  %v2416_v35 = vand.u32 2147483648, %v2395_v37  ;;  %v2414_v46 = vand.u32 2147483647, %v2395_v37  ;;  %vm2410_vm14 = vweird.f32 %v2395_v37 }
0x1689   : > { %v2417_v44 = vor.u32 1.1754944e-38, %v2416_v35  ;;  %vm2415_vm1 = vcmp.eq.f32.partialorder %v2414_v46, 8.507059e+37 }
0x168d   : > { %v3281_v39 = vpop.eup %3280 }
0x168e   : > { %v2406_v41 = vmul.f32 %v3281_v39, %v2395_v37  ;;  %vm2411_vm13 = vweird.f32 %v3281_v39 }
0x168f   : > { %vm2412_vm10 = vmor %vm2410_vm14, %vm2411_vm13 }
0x1690   : > { %v2407_v42 = vsub.f32 1.0, %v2406_v41  ;;  %v3130_v41 = vld [vmem:[%s4137_s16 + $0x10] sm:$0xff] }
0x1692   : > { %v2408_v43 = vmul.f32 %v3281_v39, %v2407_v42 }
0x1694   : > { %v2409_v22 = vadd.f32 %v3281_v39, %v2408_v43 }
0x1696   : > { %v2413_v8 = vsel %vm2412_vm10, %v3281_v39, %v2409_v22 }
0x1697   : > { %v2418_v47 = vsel %vm2415_vm1, %v2417_v44, %v2413_v8 }
0x1698   : > { %v2419_v50 = vmul.f32 %v4002_v48, %v2418_v47  ;;  %v2679_v48 = vsel %vm657_vm0, %v2678_v52, 0.0 }
0x169a   : > { %v2465_v51 = vpack.c.bf16 %v2419_v50, %v2419_v50 }
0x169c   : > { %3060 = vmatmul.msk.bf16.vlgmr.msrb.gmra.mxu0 %vm726_vm5, %v2465_v51 }
0x16c1   : > { %v2528_v53 = vpop.f32.mrf.mxu2 }
0x16c2   : > { %2558 = vrot.lane.b32.xlu2 %v2528_v53, %s4206_s28  ;;  %s4032_s28 = sand.u32 1, %s3374_s22  }
0x16c3   : > { %s4170_s6 = sshll.u32 %s4032_s28, 3  ;;  %s2724_s30 = scalar_lea.sflag [#allocation3], %s4032_s28 }
0x16c4   : > { %s4041_s27 = scalar_lea.vmem [#allocation2], %s4170_s6 }
0x16c9   : > { %v2530_v54 = vpop.f32.mrf.mxu2 }
0x16e3   : > { %v2549_v40 = vpop.f32.mrf.mxu3 }
0x16e4   : > { %v2507_v45 = vpop.f32.mrf.mxu1 }
0x16e5   : > { %2554 = vrot.lane.b32.xlu1 %v2507_v45, %s4213_s23  ;;  %s2741_s23 = sshll.u32 %s4041_s27, 4  ;;  %s2742_s23 = int_to_ptr.vmem [resolvable:$true] %s2741_s23 }
0x16eb   : > { %v2551_v55 = vpop.f32.mrf.mxu3 }
0x16ec   : > { %v2509_v49 = vpop.f32.mrf.mxu1 }
0x16ed   : > { %2562 = vrot.lane.b32.xlu1 %v2549_v40, %s4214_s3  ;;  %s2743_s3 = sshll.u32 %s2739_s1, 4  ;;  %s2744_s3 = int_to_ptr.hbm [resolvable:$true] %s2743_s3 }
0x16ee   : > { %s3302_s5 = sshra.s32 %s2744_s3, 4  ;;  %s3303_s5 = int_to_ptr.hbm [resolvable:$true] %s3302_s5 }
0x16ef   : > { %s3304_s7 = scalar_lea.hbm %s3303_s5, 8  ;;  %p3309_p0 = scmp.lt.s32.totalorder %s3303_s5, %s4140_s19 }
0x16f0   : > { %p3305_p11 = scmp.ne.s32.totalorder %s3303_s5, %s3304_s7  ;;  %p3310_p1 = scmp.lt.s32.totalorder %s3308_s9, %s3304_s7 }
0x16f2   : > { %p3306_p12 = pnand %p3305_p11, %p3541_p5  ;;  %p3311_p2 = por %p3310_p1, %p3309_p0 }
0x16f4   : > { %p3307_p13 = pneg %p3306_p12 }
0x16f6   : > { %p3312_p3 = pnand %p3311_p2, %p3307_p13 }
0x1717   : > { %2680 = vadd.xlane.f32.xlu1 %v2679_v48 }
0x1719   : > { %v2486_v56 = vpop.f32.mrf.mxu0 }
0x171c   : > { %v2559_v61 = vpop.permute.xlu2 %2558 }
0x1721   : > { %v2488_v57 = vpop.f32.mrf.mxu0 }
0x1757   : > { %v2555_v59 = vpop.permute.xlu1 %2554 }
0x1758   : > { %v2565_v60 = vsel %vm1287_vm6, %v2486_v56, %v2555_v59 }
0x1759   : > { %v2566_v63 = vsel %vm726_vm5, %v2565_v60, %v2559_v61 }
0x175f   : > { %v2563_v62 = vpop.permute.xlu1 %2562 }
0x1760   : > { %v2567_v1 = vsel %vm1574_vm3, %v2566_v63, %v2563_v62 }
0x1761   : > { %v2568_v2 = vpack.c.bf16 %v2567_v1, %v2567_v1 }
0x1763   : > { %3068 = vmatmul.msk.bf16.vlgmr.msra.gmra.mxu0 %vm1013_vm9, %v2568_v2 }
0x178a   : > { %v2681_v3 = vpop.xlane.xlu1 %2680 }
0x178b   : > { %v2682_v4 = vmul.f32 %v2681_v3, %v3567_v11  ;;  %v3198_v11 = vld [vmem:[%s4138_s17] ss:$0 sm:$0xff] }
0x178d   : > { %v2683_v16 = vadd.f32 1e-06, %v2682_v4 }
0x178f   : > { %3282 = vrsqrt.f32 %v2683_v16  ;;  %vm2690_vm5 = vweird.f32 %v2683_v16 }
0x1795   : > { %v3283_v5 = vpop.eup %3282 }
0x1796   : > { %v2685_v6 = vmul.f32 %v3283_v5, %v2683_v16  ;;  %vm2691_vm12 = vweird.f32 %v3283_v5 }
0x1797   : > { %vm2692_vm6 = vmor %vm2690_vm5, %vm2691_vm12 }
0x1798   : > { %v2686_v7 = vmul.f32 %v3283_v5, %v2685_v6 }
0x179a   : > { %v2687_v9 = vmul.f32 0.5, %v2686_v7 }
0x179c   : > { %v2688_v10 = vsub.f32 1.5, %v2687_v9 }
0x179e   : > { %v2689_v12 = vmul.f32 %v3283_v5, %v2688_v10 }
0x17a0   : > { %v2693_v13 = vsel %vm2692_vm6, %v3283_v5, %v2689_v12 }
0x17a1   : > { %v2694_v14 = vmul.f32 %v2693_v13, %v3945_v32  ;;  %v3131_v32 = vld [vmem:[%s4137_s16 + $0x18] sm:$0xff] }
0x17a2   : > { %2669 = vmatpush.bf16.msra.mxu2 %v3131_v32 }
0x17a3   : > { %v2698_v15 = vmul.f32 %v3198_v11, %v2694_v14 }
0x17a5   : > { %2699 = vst.msk [vmem:[%s4041_s27] sm:$0xff] %vm657_vm0, %v2698_v15 }
0x17a6   : > { %2670 = vmatpush.bf16.msra.mxu2 %v3130_v41 }
0x17e0   : > { %v2587_v0 = vpop.f32.mrf.mxu0 }
0x17e1   : > { %v2591_v17 = vadd.f32 %v2587_v0, %v3952_v38 }
0x17e3   : > { %v2602_v18 = vmul.f32 %v2591_v17, %v2591_v17 }
0x17e5   : > { %v2603_v21 = vsel %vm1013_vm9, %v2602_v18, 0.0 }
0x17e6   : > { %2604 = vadd.xlane.f32.xlu2 %v2603_v21 }
0x17e8   : > { %v2589_v19 = vpop.f32.mrf.mxu0 }
0x1859   : > { %v2605_v25 = vpop.xlane.xlu2 %2604 }
0x185a   : > { %v2606_v26 = vmul.f32 %v2605_v25, %v3713_v31 }
0x185c   : > { %v2607_v27 = vadd.f32 1e-06, %v2606_v26 }
0x185e   : > { %3284 = vrsqrt.f32 %v2607_v27  ;;  %vm2614_vm2 = vweird.f32 %v2607_v27 }
0x1864   : > { %v3285_v38 = vpop.eup %3284 }
0x1865   : > { %v2609_v28 = vmul.f32 %v3285_v38, %v2607_v27  ;;  %vm2615_vm3 = vweird.f32 %v3285_v38 }
0x1866   : > { %vm2616_vm15 = vmor %vm2614_vm2, %vm2615_vm3 }
0x1867   : > { %v2610_v20 = vmul.f32 %v3285_v38, %v2609_v28 }
0x1869   : > { %v2611_v29 = vmul.f32 0.5, %v2610_v20 }
0x186b   : > { %v2612_v30 = vsub.f32 1.5, %v2611_v29 }
0x186d   : > { %v2613_v24 = vmul.f32 %v3285_v38, %v2612_v30 }
0x186f   : > { %v2617_v34 = vsel %vm2616_vm15, %v3285_v38, %v2613_v24 }
0x1870   : > { %v2618_v36 = vmul.f32 %v2617_v34, %v2591_v17 }
0x1872   : > { %v2622_v37 = vmul.f32 %v3197_v33, %v2618_v36 }
0x1874   : > { %v2623_v39 = vpack.c.bf16 %v2622_v37, %v2622_v37 }
0x1876   : > { %3080 = vmatmul.msk.bf16.vlgmr.msra.gmra.mxu1 %vm1013_vm9, %v2623_v39 }
0x18f3   : > { %v2642_v42 = vpop.f32.mrf.mxu1 }
0x18f4   : > { %v2646_v35 = vmax.f32 %v2642_v42, 0.0 }
0x18f6   : > { %v2647_v43 = vpack.c.bf16 %v2646_v35, %v2646_v35 }
0x18f8   : > { %3089 = vmatmul.msk.bf16.vlgmr.msra.gmra.mxu2 %vm657_vm0, %v2647_v43 }
0x18fb   : > { %v2644_v46 = vpop.f32.mrf.mxu1 }
0x197b   : > { %v2672_v22 = vpop.f32.mrf.mxu2 }
0x197c   : > { %v2676_v44 = vadd.f32 %v2672_v22, %v2591_v17 }
0x197e   : > { %v2701_v8 = vmul.f32 %v2676_v44, %v2676_v44 }
0x1980   : > { %v2702_v47 = vsel %vm1013_vm9, %v2701_v8, 0.0 }
0x1981   : > { %2703 = vadd.xlane.f32.xlu0 %v2702_v47 }
0x1983   : > { %v2674_v50 = vpop.f32.mrf.mxu2 }
0x1984   : > { %3315 = shalt.err (!%p3312_p3)
}
0x1985   : > { %3132 = dma.vmem_to_hbm [thread:$0]  (%p3541_p5), %s2742_s23, 128, %s2744_s3, %s2724_s30  }
0x1986   : > { %s2753_s10 = scalar_lea.hbm %s4141_s20, %s3092_s26  ;;  %s4215_s27 = sshll.u32 %s4032_s28, 3 }
0x1987   : > { %s631_s21 = scalar_lea.vmem [#allocation4], %s4215_s27  ;;  %s2757_s1 = sshll.u32 %s2753_s10, 4  ;;  %s2758_s1 = int_to_ptr.hbm [resolvable:$true] %s2757_s1 }
0x1988   : > { %s2755_s0 = sshll.u32 %s631_s21, 4  ;;  %s2729_s2 = scalar_lea.sflag [#allocation5], %s4032_s28  ;;  %s2756_s0 = int_to_ptr.vmem [resolvable:$true] %s2755_s0 }
0x1989   : > { %s3330_s26 = sshra.s32 %s2758_s1, 4  ;;  %s3336_s5 = scalar_lea.hbm %s4141_s20, 16  ;;  %s3331_s26 = int_to_ptr.hbm [resolvable:$true] %s3330_s26 }
0x198a   : > { %s3332_s23 = scalar_lea.hbm %s3331_s26, 8  ;;  %p3337_p9 = scmp.lt.s32.totalorder %s3331_s26, %s4141_s20 }
0x198b   : > { %p3333_p4 = scmp.ne.s32.totalorder %s3331_s26, %s3332_s23  ;;  %p3338_p10 = scmp.lt.s32.totalorder %s3336_s5, %s3332_s23 }
0x198d   : > { %p3334_p7 = pnand %p3333_p4, %p3541_p5  ;;  %p3339_p11 = por %p3338_p10, %p3337_p9 }
0x198f   : > { %p3335_p8 = pneg %p3334_p7 }
0x1991   : > { %p3340_p12 = pnand %p3339_p11, %p3335_p8 }
0x19f4   : > { %v2704_v51 = vpop.xlane.xlu0 %2703 }
0x19f5   : > { %v2705_v53 = vmul.f32 %v2704_v51, %v3713_v31  ;;  %v3199_v31 = vld [vmem:[%s4139_s18] ss:$0 sm:$0xff] }
0x19f7   : > { %v2706_v54 = vadd.f32 1e-06, %v2705_v53 }
0x19f9   : > { %3286 = vrsqrt.f32 %v2706_v54  ;;  %vm2713_vm4 = vweird.f32 %v2706_v54 }
0x19ff   : > { %v3287_v40 = vpop.eup %3286 }
0x1a00   : > { %v2708_v45 = vmul.f32 %v3287_v40, %v2706_v54  ;;  %vm2714_vm0 = vweird.f32 %v3287_v40 }
0x1a01   : > { %vm2715_vm7 = vmor %vm2713_vm4, %vm2714_vm0 }
0x1a02   : > { %v2709_v55 = vmul.f32 %v3287_v40, %v2708_v45 }
0x1a04   : > { %v2710_v49 = vmul.f32 0.5, %v2709_v55 }
0x1a06   : > { %v2711_v52 = vsub.f32 1.5, %v2710_v49 }
0x1a08   : > { %v2712_v48 = vmul.f32 %v3287_v40, %v2711_v52 }
0x1a0a   : > { %v2716_v56 = vsel %vm2715_vm7, %v3287_v40, %v2712_v48 }
0x1a0b   : > { %v2717_v57 = vmul.f32 %v2716_v56, %v2676_v44 }
0x1a0d   : > { %v2721_v58 = vmul.f32 %v3199_v31, %v2717_v57 }
0x1a0f   : > { %2722 = vst.msk [vmem:[%s631_s21] sm:$0xff] %vm1013_vm9, %v2721_v58 }
0x1a10   : > { %3343 = shalt.err (!%p3340_p12)
}
0x1a11   : > { %3133 = dma.vmem_to_hbm [thread:$0]  (%p3541_p5), %s2756_s0, 128, %s2758_s1, %s2729_s2  }
0x1a12 PF: > { %s4216_s28 = sld [smem:[#allocation8_spill]]  ;;  %p3143_p13 = scmp.ge.s32.totalorder %s3382_s24, 2 }
0x1a14   : > { %p3137_p0 = pnand %p3143_p13, %p3545_p6 }
0x1a16   : > { %p3138_p1 = pneg %p3137_p0 }
0x1a18   : > { %s2769_s10 = sand.u32 1, %s4216_s28  }
0x1a19   : > { %s2770_s11 = scalar_lea.sflag [#allocation3], %s2769_s10 }
0x1a1a   : > { %3361 = dma.done.wait (%p3138_p1), %s2770_s11, 128  }
0x1a1b   : > { %3363 = vsyncadd (%p3138_p1), %s2770_s11, 4294967168  ;;  %s2780_s6 = scalar_lea.sflag [#allocation5], %s2769_s10 }
0x1a1c   : > { %3365 = dma.done.wait (%p3138_p1), %s2780_s6, 128  }
0x1a1d   : > { %3367 = vsyncadd (%p3138_p1), %s2780_s6, 4294967168  ;;  %s4218_s24 = sld [smem:[#allocation10_spill]]  ;;  %s4221_s1 = smov %s3374_s22 }
0x1a1e   : > { %s4219_s27 = sld [smem:[#allocation9_spill]] }
0x1a1f   : > { %s4220_s23 = sld [smem:[#allocation11_spill]] }
0x1a23   : > { %p34_p5 = scmp.ge.s32.totalorder %s4218_s24, 4  }
0x1a24   : > { %s4222_s22 = smov %s4219_s27 }
0x1a25   :  { %36 = sbr.rel (!%p34_p5) target bundleno = 18 (0x12), region = 161 }
0x1a2a   :  { %2786 = vsyncpa [#allocation3], 1 }
0x1a2b   :  { %2788 = vsyncpa [#allocation3 + $0x1], 1 }
0x1a2c   :  { %2789 = vsyncpa [#allocation5], 1 }
0x1a2d   :  { %2791 = vsyncpa [#allocation5 + $0x1], 1 }

</bundles_post_ra>
